<compile_context>
chip_gen: v7x
topology: tpu7x:2x2x1
jax: 0.10.0
libtpu: 0.0.40
codegen_flags: <defaults>
</compile_context>

<pallas_src>
import functools

import numpy as np

import jax
import jax.numpy as jnp
from jax.experimental import pallas as pl
from jax.experimental.pallas import tpu as pltpu


VMEM_LIMIT = 32 * 1024 * 1024


# --------------------------------------------------------------------------
# small helpers
# --------------------------------------------------------------------------

def _round_up(x, m):
    return -(-x // m) * m


def _act(y, act):
    if act == "ReLU":
        return jnp.maximum(y, 0.0)
    if act == "HS":                                   # hard-swish: x * relu6(x+3)/6
        return y * jnp.clip(y + 3.0, 0.0, 6.0) * (1.0 / 6.0)
    if act == "none":
        return y
    raise NotImplementedError(act)


def bn_fold(bn, eps=1e-5):
    scale = bn["gamma"] / jnp.sqrt(bn["var"] + eps)
    bias = bn["beta"] - bn["mean"] * scale
    return scale, bias


def shuffle_perm(c, groups):
    # ShuffleLayer: view(N,g,c/g,H,W).transpose(1,2)  ==  x[..., perm]   (static)
    return np.arange(c).reshape(groups, c // groups).T.reshape(-1)


def shuffle_trans_perm(c, groups):
    # ShuffleLayerTrans: view(N,c/g,g,H,W).transpose(1,2)  ==  x[..., perm] (static)
    return np.arange(c).reshape(c // groups, groups).T.reshape(-1)


# --------------------------------------------------------------------------
# Fused:  BN+act prologue -> dense matmul -> (BN+act epilogue | post | residual)
# --------------------------------------------------------------------------

def _fused_conv_kernel(*refs, act_in, act_epi,
                       has_affine, has_epi, has_post, has_residual):
    i = 0
    a_ref = refs[i]; i += 1
    if has_affine:
        s_ref, b_ref = refs[i], refs[i + 1]; i += 2
    w_ref = refs[i]; i += 1
    if has_epi:
        es_ref, eb_ref = refs[i], refs[i + 1]; i += 2
    if has_post:
        p_ref = refs[i]; i += 1
    if has_residual:
        r_ref = refs[i]; i += 1
    o_ref = refs[i]

    a = a_ref[...]
    if has_affine:                                    # inference BN + activation (f32)
        a = _act(a * s_ref[...] + b_ref[...], act_in)
    a = a.astype(jnp.bfloat16)                        # bf16 into the MXU

    y = jnp.dot(a, w_ref[...], preferred_element_type=jnp.float32)

    if has_epi:                                       # next layer's BN + act
        y = _act(y * es_ref[...] + eb_ref[...], act_epi)
    if has_post:                                      # CondenseSFR index matmul
        y = jnp.dot(y.astype(jnp.bfloat16), p_ref[...],
                    preferred_element_type=jnp.float32)
    if has_residual:
        y = y + r_ref[...]
    o_ref[...] = y.astype(o_ref.dtype)


def fused_matmul(a, w, *, scale=None, bias=None, act_in="none",
                 epi_scale=None, epi_bias=None, act_epi="none",
                 post=None, residual=None, tm_max=256):
    """a:(M,K), w:(K,Cout) dense -> (M, out_cols) f32.  K left unpadded."""
    M, K = a.shape
    K2, cout = w.shape
    assert K == K2, (K, K2)
    out_cols = post.shape[1] if post is not None else cout

    has_affine = scale is not None
    has_epi = epi_scale is not None
    has_post = post is not None
    has_res = residual is not None

    # Affine math stays f32 (v5e-safe); without affine, ship the input in bf16.
    a = a.astype(jnp.float32 if has_affine else jnp.bfloat16)

    Mp = _round_up(M, 16)
    tm = min(tm_max, Mp)
    Mp = _round_up(Mp, tm)
    if Mp != M:
        a = jnp.pad(a, ((0, Mp - M), (0, 0)))

    def _const(arr):
        return pl.BlockSpec(arr.shape, lambda i, _n=arr.ndim: (0,) * _n)

    operands = [a]
    in_specs = [pl.BlockSpec((tm, K), lambda i: (i, 0))]
    if has_affine:
        s = scale.reshape(1, K).astype(jnp.float32)
        b = bias.reshape(1, K).astype(jnp.float32)
        operands += [s, b]; in_specs += [_const(s), _const(b)]
    wb = w.astype(jnp.bfloat16)
    operands.append(wb); in_specs.append(_const(wb))
    if has_epi:
        es = epi_scale.reshape(1, cout).astype(jnp.float32)
        eb = epi_bias.reshape(1, cout).astype(jnp.float32)
        operands += [es, eb]; in_specs += [_const(es), _const(eb)]
    if has_post:
        pb = post.astype(jnp.bfloat16)
        operands.append(pb); in_specs.append(_const(pb))
    if has_res:
        r = residual.astype(jnp.float32)
        if Mp != M:
            r = jnp.pad(r, ((0, Mp - M), (0, 0)))
        operands.append(r)
        in_specs.append(pl.BlockSpec((tm, out_cols), lambda i: (i, 0)))

    out = pl.pallas_call(
        functools.partial(_fused_conv_kernel, act_in=act_in, act_epi=act_epi,
                          has_affine=has_affine, has_epi=has_epi,
                          has_post=has_post, has_residual=has_res),
        out_shape=jax.ShapeDtypeStruct((Mp, out_cols), jnp.float32),
        grid=(Mp // tm,),
        in_specs=in_specs,
        out_specs=pl.BlockSpec((tm, out_cols), lambda i: (i, 0)),
        compiler_params=pltpu.CompilerParams(
            dimension_semantics=("parallel",),        # megacore over M tiles
            vmem_limit_bytes=VMEM_LIMIT),
    )(*operands)
    return out[:M] if Mp != M else out


# --------------------------------------------------------------------------
# Fused (optional BN + act) + global average pool:  (N, HW, C) -> (N, C)
# --------------------------------------------------------------------------

def _gap_kernel(*refs, act, hw, inv_hw, has_affine):
    if has_affine:
        x_ref, s_ref, b_ref, o_ref, acc_ref = refs
    else:
        x_ref, o_ref, acc_ref = refs

    @pl.when(pl.program_id(0) == 0)
    def _():
        acc_ref[...] = jnp.zeros_like(acc_ref)

    y = x_ref[...]
    if has_affine:
        y = _act(y * s_ref[...] + b_ref[...], act)
    thw = y.shape[1]
    # Mask rows beyond the true HW (padding rows would otherwise pollute the sum
    # once an affine bias / activation is applied).
    row = pl.program_id(0) * thw + jax.lax.broadcasted_iota(jnp.int32, y.shape, 1)
    y = jnp.where(row < hw, y, 0.0)
    acc_ref[...] += jnp.sum(y, axis=1, keepdims=True)

    @pl.when(pl.program_id(0) == pl.num_programs(0) - 1)
    def _():
        o_ref[...] = acc_ref[...] * inv_hw


def pallas_bn_act_gap(x3d, scale=None, bias=None, act="none", thw_max=512):
    N, HW, C = x3d.shape
    x = x3d.astype(jnp.float32)
    HWp = _round_up(HW, 8)
    thw = min(thw_max, HWp)
    HWp = _round_up(HWp, thw)
    if HWp != HW:
        x = jnp.pad(x, ((0, 0), (0, HWp - HW), (0, 0)))
    has_affine = scale is not None

    operands = [x]
    in_specs = [pl.BlockSpec((N, thw, C), lambda i: (0, i, 0))]
    if has_affine:
        s = scale.reshape(1, 1, C).astype(jnp.float32)
        b = bias.reshape(1, 1, C).astype(jnp.float32)
        operands += [s, b]
        in_specs += [pl.BlockSpec((1, 1, C), lambda i: (0, 0, 0)),
                     pl.BlockSpec((1, 1, C), lambda i: (0, 0, 0))]

    out = pl.pallas_call(
        functools.partial(_gap_kernel, act=act, hw=HW, inv_hw=1.0 / HW,
                          has_affine=has_affine),
        out_shape=jax.ShapeDtypeStruct((N, 1, C), jnp.float32),
        grid=(HWp // thw,),
        in_specs=in_specs,
        out_specs=pl.BlockSpec((N, 1, C), lambda i: (0, 0, 0)),
        scratch_shapes=[pltpu.VMEM((N, 1, C), jnp.float32)],
        compiler_params=pltpu.CompilerParams(
            dimension_semantics=("arbitrary",),       # reduction axis
            vmem_limit_bytes=VMEM_LIMIT),
    )(*operands)
    return out[:, 0, :]


# --------------------------------------------------------------------------
# Conv = (optional im2col, plain JAX) + fused Pallas kernel
# --------------------------------------------------------------------------

def conv_weight_dense(w, groups):
    """PyTorch grouped weight (Cout, Cin_g, kh, kw) -> dense (kh*kw*Cin, Cout).

    Rows are tap-major / channel-minor (matches _im2col layout); off-group
    entries are exact zeros (block-diagonal), so a single MXU dot reproduces
    the grouped conv.
    """
    cout, cin_g, kh, kw = w.shape
    cin = cin_g * groups
    cout_g = cout // groups
    dense = jnp.zeros((kh * kw, cin, cout), jnp.float32)
    for g in range(groups):
        wg = w[g * cout_g:(g + 1) * cout_g]                   # (cout_g, cin_g, kh, kw)
        wg = jnp.transpose(wg, (2, 3, 1, 0)).reshape(kh * kw, cin_g, cout_g)
        dense = dense.at[:, g * cin_g:(g + 1) * cin_g,
                         g * cout_g:(g + 1) * cout_g].set(wg)
    return dense.reshape(kh * kw * cin, cout)


def _im2col(x, kh, kw, stride, padding):
    """NHWC -> (N*Ho*Wo, kh*kw*C), tap-major / channel-minor columns."""
    N, H, W, C = x.shape
    if padding:
        x = jnp.pad(x, ((0, 0), (padding, padding), (padding, padding), (0, 0)))
    Hp, Wp = x.shape[1], x.shape[2]
    Ho = (Hp - kh) // stride + 1
    Wo = (Wp - kw) // stride + 1
    taps = []
    for ky in range(kh):
        for kx in range(kw):
            taps.append(x[:, ky:ky + Ho * stride:stride, kx:kx + Wo * stride:stride, :])
    p = jnp.stack(taps, axis=3)                               # (N,Ho,Wo,T,C)
    return p.reshape(N * Ho * Wo, kh * kw * C), Ho, Wo


def conv2d_fused(x, w_dense, *, kh=1, kw=1, stride=1, padding=0,
                 scale=None, bias=None, act_in="none",
                 epi_scale=None, epi_bias=None, act_epi="none",
                 post=None, residual2d=None):
    N = x.shape[0]
    if kh == 1 and kw == 1 and stride == 1 and padding == 0:
        _, H, W, C = x.shape
        a, Ho, Wo = x.reshape(N * H * W, C), H, W
    else:
        a, Ho, Wo = _im2col(x, kh, kw, stride, padding)
    out2d = fused_matmul(a, w_dense,
                         scale=scale, bias=bias, act_in=act_in,
                         epi_scale=epi_scale, epi_bias=epi_bias, act_epi=act_epi,
                         post=post, residual=residual2d)
    return out2d.reshape(N, Ho, Wo, out2d.shape[1])


# --------------------------------------------------------------------------
# Model pieces
# --------------------------------------------------------------------------

def se_layer(x, p):
    """SELayer on NHWC; GAP is Pallas, tiny GEMMs stay in XLA."""
    N, H, W, C = x.shape
    y = pallas_bn_act_gap(x.reshape(N, H * W, C))
    y = jnp.maximum(y @ p["fc1_w"].T + p["fc1_b"], 0.0)
    y = jax.nn.sigmoid(y @ p["fc2_w"].T + p["fc2_b"])
    return x * y[:, None, None, :]


def se_vec(v, p):
    """SELayer on an already-pooled (N, C) vector (se_last after pool_last)."""
    y = jnp.maximum(v @ p["fc1_w"].T + p["fc1_b"], 0.0)
    y = jax.nn.sigmoid(y @ p["fc2_w"].T + p["fc2_b"])
    return v * y


def sfr_dense_layer(x, p, args, act, use_se):
    N, H, W, in_ch = x.shape
    g1, g3, gt = args["group_1x1"], args["group_3x3"], args["group_trans"]

    # conv_1 (CondenseLGC): index_select -> BN -> act -> 1x1 grouped conv ->
    # ShuffleLayer.  The shuffle is folded into the dense weight's columns and
    # conv_2's BN+act is fused as the kernel epilogue (in shuffled order), so
    # the kernel directly produces conv_2's normalized/activated input.
    # The learned `index` select stays as an explicit gather (may not be a
    # permutation in a real converted checkpoint).
    x_sel = jnp.take(x, p["conv_1"]["index"], axis=-1)
    s1, b1 = bn_fold(p["conv_1"]["bn"])
    s2, b2 = bn_fold(p["conv_2"]["bn"])
    mid = p["conv_1"]["conv_w"].shape[0]
    perm1 = shuffle_perm(mid, g1)                              # static np permutation
    w1 = conv_weight_dense(p["conv_1"]["conv_w"], g1)          # (in_ch, mid)
    w1 = jnp.take(w1, perm1, axis=1)                           # fold ShuffleLayer
    u = conv2d_fused(x_sel, w1, kh=1, kw=1,
                     scale=s1, bias=b1, act_in=act,
                     epi_scale=s2, epi_bias=b2, act_epi=act)

    # conv_2: 3x3 grouped conv, padding=1 (input already normalized+activated,
    # so zero-padding before im2col matches the reference semantics).
    w2 = conv_weight_dense(p["conv_2"]["conv_w"], g3)          # (9*mid, growth)
    z = conv2d_fused(u, w2, kh=3, kw=3, stride=1, padding=1)

    if use_se:
        z = se_layer(z, p["se"])

    # sfr (CondenseSFR): BN -> act -> ShuffleLayerTrans -> 1x1 grouped conv ->
    # "index" matmul; ShuffleLayerTrans is folded into the dense weight's rows,
    # and the post-matrix + residual add (y = x + sfr) are fused in-kernel.
    growth = z.shape[-1]
    perm_t = shuffle_trans_perm(growth, gt)
    inv_t = np.argsort(perm_t)
    s3, b3 = bn_fold(p["sfr"]["bn"])
    w3 = conv_weight_dense(p["sfr"]["conv_w"], gt)             # (growth, in_ch)
    w3 = jnp.take(w3, inv_t, axis=0)                           # fold ShuffleLayerTrans
    y = conv2d_fused(z, w3, kh=1, kw=1,
                     scale=s3, bias=b3, act_in=act,
                     post=p["sfr"]["index"],
                     residual2d=x.reshape(N * H * W, in_ch))
    return jnp.concatenate([y, z], axis=-1)


def transition_avgpool2x2(x):
    N, H, W, C = x.shape
    return x.reshape(N, H // 2, 2, W // 2, 2, C).mean(axis=(2, 4))


def hard_swish(x):
    return x * jnp.clip(x + 3.0, 0.0, 6.0) * (1.0 / 6.0)


def condensenetv2_forward(x_nchw, params, args):
    x = jnp.transpose(x_nchw, (0, 2, 3, 1)).astype(jnp.float32)     # NCHW -> NHWC
    init_stride = 1 if args["dataset"] in ("cifar10", "cifar100") else 2
    w_init = conv_weight_dense(params["init_conv_w"], 1)
    x = conv2d_fused(x, w_init, kh=3, kw=3, stride=init_stride, padding=1)

    n_blocks = len(args["stages"])
    for bi in range(n_blocks):
        act = "HS" if bi >= args["HS_start_block"] else "ReLU"
        use_se = bi >= args["SE_start_block"]
        for layer_p in params["blocks"][bi]["layers"]:
            x = sfr_dense_layer(x, layer_p, args, act, use_se)
        last = bi == n_blocks - 1
        if not last:
            x = transition_avgpool2x2(x)
        else:
            N, H, W, C = x.shape
            s, b = bn_fold(params["norm_last"])
            # norm_last -> ReLU -> AvgPool2d(pool_size) with H == W == pool_size,
            # fused into one Pallas reduction kernel.
            x = pallas_bn_act_gap(x.reshape(N, H * W, C), s, b, "ReLU")
            if use_se:
                x = se_vec(x, params["se_last"])

    # Head (tiny GEMMs -> plain XLA): fc -> HS -> classifier.
    out = x @ params["fc_w"].T + params["fc_b"]
    out = hard_swish(out)
    out = out @ params["classifier_w"].T + params["classifier_b"]
    return out


# --------------------------------------------------------------------------
# Deterministic synthetic parameter construction
# --------------------------------------------------------------------------

class KeyGen:
    def __init__(self, key):
        self.key, self.i = key, 0

    def __call__(self):
        self.i += 1
        return jax.random.fold_in(self.key, self.i)


def kaiming_normal(key, shape):          # conv weight (Cout, Cin_g, kh, kw)
    fan_out = shape[0] * shape[2] * shape[3]
    return jax.random.normal(key, shape, jnp.float32) * (2.0 / fan_out) ** 0.5


def linear_init(key, out_f, in_f):
    k1, k2 = jax.random.split(key)
    bound = 1.0 / (in_f ** 0.5)
    w = jax.random.uniform(k1, (out_f, in_f), jnp.float32, -bound, bound)
    b = jax.random.uniform(k2, (out_f,), jnp.float32, -bound, bound)
    return w, b


def bn_init(c):
    return dict(gamma=jnp.ones(c, jnp.float32), beta=jnp.zeros(c, jnp.float32),
                mean=jnp.zeros(c, jnp.float32), var=jnp.ones(c, jnp.float32))


def build_params(args, key):
    kg = KeyGen(key)
    num_features = 2 * args["growth"][0]
    params = dict(init_conv_w=kaiming_normal(kg(), (num_features, 3, 3, 3)),
                  blocks=[])
    for bi, (num_layers, growth) in enumerate(zip(args["stages"], args["growth"])):
        use_se = bi >= args["SE_start_block"]
        layers = []
        for li in range(num_layers):
            in_ch = num_features + li * growth
            mid = args["bottleneck"] * growth
            lp = dict(
                conv_1=dict(
                    index=jax.random.permutation(kg(), jnp.arange(in_ch)),
                    bn=bn_init(in_ch),
                    conv_w=kaiming_normal(
                        kg(), (mid, in_ch // args["group_1x1"], 1, 1))),
                conv_2=dict(
                    bn=bn_init(mid),
                    conv_w=kaiming_normal(
                        kg(), (growth, mid // args["group_3x3"], 3, 3))),
                sfr=dict(
                    bn=bn_init(growth),
                    conv_w=kaiming_normal(
                        kg(), (in_ch, growth // args["group_trans"], 1, 1)),
                    # TODO(synk): dense 0/1 stand-in for the converted model's sparse
                    # channel-selection matrix; a gather would avoid the C^2 matmul.
                    index=jax.random.bernoulli(
                        kg(), 0.5, (in_ch, in_ch)).astype(jnp.float32)),
            )
            if use_se:
                w1, b1 = linear_init(kg(), growth, growth)   # SELayer reduction=1
                w2, b2 = linear_init(kg(), growth, growth)
                lp["se"] = dict(fc1_w=w1, fc1_b=b1, fc2_w=w2, fc2_b=b2)
            layers.append(lp)
        params["blocks"].append(dict(layers=layers))
        num_features += num_layers * growth
        if bi == len(args["stages"]) - 1:
            params["norm_last"] = bn_init(num_features)
            if use_se:
                red = args["last_se_reduction"]
                w1, b1 = linear_init(kg(), num_features // red, num_features)
                w2, b2 = linear_init(kg(), num_features, num_features // red)
                params["se_last"] = dict(fc1_w=w1, fc1_b=b1, fc2_w=w2, fc2_b=b2)
    fc_w, fc_b = linear_init(kg(), args["fc_channel"], num_features)
    cls_w, cls_b = linear_init(kg(), args["num_classes"], args["fc_channel"])
    params.update(fc_w=fc_w, fc_b=fc_b, classifier_w=cls_w, classifier_b=cls_b)
    return params


# --------------------------------------------------------------------------

ARGS = dict(
    stages=[1, 1], growth=[4, 4], paths=[1, 1],
    bottleneck=4, group_1x1=2, group_3x3=2, group_trans=2,
    HS_start_block=1, SE_start_block=1, last_se_reduction=2,
    fc_channel=32, num_classes=10, dataset="cifar10", ltdn_model=False,
)

if __name__ == "__main__":
    key = jax.random.PRNGKey(0)
    params = build_params(ARGS, jax.random.fold_in(key, 1))
    # NCHW input, cifar-style but small: (2, 3, 16, 16)
    x = jax.random.normal(jax.random.fold_in(key, 2), (2, 3, 16, 16), jnp.float32)

    fwd = jax.jit(lambda inp: condensenetv2_forward(inp, params, ARGS))
    out = fwd(x)
    jax.block_until_ready(out)
    assert out.shape == (2, ARGS["num_classes"]), out.shape
    assert bool(jnp.all(jnp.isfinite(out)))
    print("KERNEL_OK")
</pallas_src>

<mosaic_0001>
module attributes {stable_mosaic.version = 11 : i64} {
  func.func @_fused_conv_kernel(%arg0: i32, %arg1: memref<256x27xbf16, #tpu.memory_space<vmem>>, %arg2: memref<27x8xbf16, #tpu.memory_space<vmem>>, %arg3: memref<256x8xf32, #tpu.memory_space<vmem>>) attributes {dimension_semantics = [#tpu.dimension_semantics<parallel>], iteration_bounds = array<i64: 2>, scalar_prefetch = 0 : i64, scratch_operands = 0 : i64, tpu.core_type = #tpu.core_type<tc>, window_params = [{transform_indices = @transform_0, window_bounds = array<i64: 256, 27>}, {pipeline_mode = #tpu.pipeline_mode<synchronous>, transform_indices = @transform_1, window_bounds = array<i64: 27, 8>}, {transform_indices = @transform_2, window_bounds = array<i64: 256, 8>}]} {
    %c0 = arith.constant 0 : index
    %c0_0 = arith.constant 0 : index
    %0 = vector.load %arg1[%c0, %c0_0] : memref<256x27xbf16, #tpu.memory_space<vmem>>, vector<256x27xbf16>
    %c0_1 = arith.constant 0 : index
    %c0_2 = arith.constant 0 : index
    %1 = vector.load %arg2[%c0_1, %c0_2] : memref<27x8xbf16, #tpu.memory_space<vmem>>, vector<27x8xbf16>
    %cst = arith.constant dense<0.000000e+00> : vector<256x8xf32>
    %2 = tpu.matmul %0, %1, %cst {dimension_numbers = #tpu.dot_dimension_numbers<[1], [0], [0], [1], [0, 0, 1, 1], [], []>} : vector<256x27xbf16>, vector<27x8xbf16>, vector<256x8xf32> -> vector<256x8xf32>
    %c0_3 = arith.constant 0 : index
    %c0_4 = arith.constant 0 : index
    %3 = vector.load %arg3[%c0_3, %c0_4] : memref<256x8xf32, #tpu.memory_space<vmem>>, vector<256x8xf32>
    tpu.vector_store %arg3[%c0_3, %c0_4], %2 {strides = array<i32>} : memref<256x8xf32, #tpu.memory_space<vmem>>, vector<256x8xf32>,
    return
  }
  func.func @transform_0(%arg0: i32) -> (i32, i32) {
    %c0_i32 = arith.constant 0 : i32
    %c0_i32_0 = arith.constant 0 : i32
    return %arg0, %c0_i32 : i32, i32
  }
  func.func @transform_1(%arg0: i32) -> (i32, i32) {
    %c0_i32 = arith.constant 0 : i32
    %c0_i32_0 = arith.constant 0 : i32
    %c0_i32_1 = arith.constant 0 : i32
    return %c0_i32, %c0_i32_0 : i32, i32
  }
  func.func @transform_2(%arg0: i32) -> (i32, i32) {
    %c0_i32 = arith.constant 0 : i32
    %c0_i32_0 = arith.constant 0 : i32
    return %arg0, %c0_i32 : i32, i32
  }
}

module attributes {stable_mosaic.version = 11 : i64} {
  func.func @_fused_conv_kernel(%arg0: i32, %arg1: memref<256x8xf32, #tpu.memory_space<vmem>>, %arg2: memref<1x8xf32, #tpu.memory_space<vmem>>, %arg3: memref<1x8xf32, #tpu.memory_space<vmem>>, %arg4: memref<8x16xbf16, #tpu.memory_space<vmem>>, %arg5: memref<1x16xf32, #tpu.memory_space<vmem>>, %arg6: memref<1x16xf32, #tpu.memory_space<vmem>>, %arg7: memref<256x16xf32, #tpu.memory_space<vmem>>) attributes {dimension_semantics = [#tpu.dimension_semantics<parallel>], iteration_bounds = array<i64: 2>, scalar_prefetch = 0 : i64, scratch_operands = 0 : i64, tpu.core_type = #tpu.core_type<tc>, window_params = [{transform_indices = @transform_0, window_bounds = array<i64: 256, 8>}, {pipeline_mode = #tpu.pipeline_mode<synchronous>, transform_indices = @transform_1, window_bounds = array<i64: 1, 8>}, {pipeline_mode = #tpu.pipeline_mode<synchronous>, transform_indices = @transform_2, window_bounds = array<i64: 1, 8>}, {pipeline_mode = #tpu.pipeline_mode<synchronous>, transform_indices = @transform_3, window_bounds = array<i64: 8, 16>}, {pipeline_mode = #tpu.pipeline_mode<synchronous>, transform_indices = @transform_4, window_bounds = array<i64: 1, 16>}, {pipeline_mode = #tpu.pipeline_mode<synchronous>, transform_indices = @transform_5, window_bounds = array<i64: 1, 16>}, {transform_indices = @transform_6, window_bounds = array<i64: 256, 16>}]} {
    %c0 = arith.constant 0 : index
    %c0_0 = arith.constant 0 : index
    %0 = vector.load %arg1[%c0, %c0_0] : memref<256x8xf32, #tpu.memory_space<vmem>>, vector<256x8xf32>
    %c0_1 = arith.constant 0 : index
    %c0_2 = arith.constant 0 : index
    %1 = vector.load %arg2[%c0_1, %c0_2] : memref<1x8xf32, #tpu.memory_space<vmem>>, vector<1x8xf32>
    %2 = vector.broadcast %1 : vector<1x8xf32> to vector<256x8xf32>
    %3 = arith.mulf %0, %2 : vector<256x8xf32>
    %c0_3 = arith.constant 0 : index
    %c0_4 = arith.constant 0 : index
    %4 = vector.load %arg3[%c0_3, %c0_4] : memref<1x8xf32, #tpu.memory_space<vmem>>, vector<1x8xf32>
    %5 = vector.broadcast %4 : vector<1x8xf32> to vector<256x8xf32>
    %6 = arith.addf %3, %5 : vector<256x8xf32>
    %cst = arith.constant 0.000000e+00 : f32
    %7 = vector.broadcast %cst : f32 to vector<256x8xf32>
    %8 = arith.maximumf %6, %7 : vector<256x8xf32>
    %9 = arith.truncf %8 : vector<256x8xf32> to vector<256x8xbf16>
    %c0_5 = arith.constant 0 : index
    %c0_6 = arith.constant 0 : index
    %10 = vector.load %arg4[%c0_5, %c0_6] : memref<8x16xbf16, #tpu.memory_space<vmem>>, vector<8x16xbf16>
    %cst_7 = arith.constant dense<0.000000e+00> : vector<256x16xf32>
    %11 = tpu.matmul %9, %10, %cst_7 {dimension_numbers = #tpu.dot_dimension_numbers<[1], [0], [0], [1], [0, 0, 1, 1], [], []>} : vector<256x8xbf16>, vector<8x16xbf16>, vector<256x16xf32> -> vector<256x16xf32>
    %c0_8 = arith.constant 0 : index
    %c0_9 = arith.constant 0 : index
    %12 = vector.load %arg5[%c0_8, %c0_9] : memref<1x16xf32, #tpu.memory_space<vmem>>, vector<1x16xf32>
    %13 = vector.broadcast %12 : vector<1x16xf32> to vector<256x16xf32>
    %14 = arith.mulf %11, %13 : vector<256x16xf32>
    %c0_10 = arith.constant 0 : index
    %c0_11 = arith.constant 0 : index
    %15 = vector.load %arg6[%c0_10, %c0_11] : memref<1x16xf32, #tpu.memory_space<vmem>>, vector<1x16xf32>
    %16 = vector.broadcast %15 : vector<1x16xf32> to vector<256x16xf32>
    %17 = arith.addf %14, %16 : vector<256x16xf32>
    %cst_12 = arith.constant 0.000000e+00 : f32
    %18 = vector.broadcast %cst_12 : f32 to vector<256x16xf32>
    %19 = arith.maximumf %17, %18 : vector<256x16xf32>
    %c0_13 = arith.constant 0 : index
    %c0_14 = arith.constant 0 : index
    %20 = vector.load %arg7[%c0_13, %c0_14] : memref<256x16xf32, #tpu.memory_space<vmem>>, vector<256x16xf32>
    tpu.vector_store %arg7[%c0_13, %c0_14], %19 {strides = array<i32>} : memref<256x16xf32, #tpu.memory_space<vmem>>, vector<256x16xf32>,
    return
  }
  func.func @transform_0(%arg0: i32) -> (i32, i32) {
    %c0_i32 = arith.constant 0 : i32
    %c0_i32_0 = arith.constant 0 : i32
    return %arg0, %c0_i32 : i32, i32
  }
  func.func @transform_1(%arg0: i32) -> (i32, i32) {
    %c0_i32 = arith.constant 0 : i32
    %c0_i32_0 = arith.constant 0 : i32
    %c0_i32_1 = arith.constant 0 : i32
    return %c0_i32, %c0_i32_0 : i32, i32
  }
  func.func @transform_2(%arg0: i32) -> (i32, i32) {
    %c0_i32 = arith.constant 0 : i32
    %c0_i32_0 = arith.constant 0 : i32
    %c0_i32_1 = arith.constant 0 : i32
    return %c0_i32, %c0_i32_0 : i32, i32
  }
  func.func @transform_3(%arg0: i32) -> (i32, i32) {
    %c0_i32 = arith.constant 0 : i32
    %c0_i32_0 = arith.constant 0 : i32
    %c0_i32_1 = arith.constant 0 : i32
    return %c0_i32, %c0_i32_0 : i32, i32
  }
  func.func @transform_4(%arg0: i32) -> (i32, i32) {
    %c0_i32 = arith.constant 0 : i32
    %c0_i32_0 = arith.constant 0 : i32
    %c0_i32_1 = arith.constant 0 : i32
    return %c0_i32, %c0_i32_0 : i32, i32
  }
  func.func @transform_5(%arg0: i32) -> (i32, i32) {
    %c0_i32 = arith.constant 0 : i32
    %c0_i32_0 = arith.constant 0 : i32
    %c0_i32_1 = arith.constant 0 : i32
    return %c0_i32, %c0_i32_0 : i32, i32
  }
  func.func @transform_6(%arg0: i32) -> (i32, i32) {
    %c0_i32 = arith.constant 0 : i32
    %c0_i32_0 = arith.constant 0 : i32
    return %arg0, %c0_i32 : i32, i32
  }
}

module attributes {stable_mosaic.version = 11 : i64} {
  func.func @_fused_conv_kernel(%arg0: i32, %arg1: memref<256x144xbf16, #tpu.memory_space<vmem>>, %arg2: memref<144x4xbf16, #tpu.memory_space<vmem>>, %arg3: memref<256x4xf32, #tpu.memory_space<vmem>>) attributes {dimension_semantics = [#tpu.dimension_semantics<parallel>], iteration_bounds = array<i64: 2>, scalar_prefetch = 0 : i64, scratch_operands = 0 : i64, tpu.core_type = #tpu.core_type<tc>, window_params = [{transform_indices = @transform_0, window_bounds = array<i64: 256, 144>}, {pipeline_mode = #tpu.pipeline_mode<synchronous>, transform_indices = @transform_1, window_bounds = array<i64: 144, 4>}, {transform_indices = @transform_2, window_bounds = array<i64: 256, 4>}]} {
    %c0 = arith.constant 0 : index
    %c0_0 = arith.constant 0 : index
    %0 = vector.load %arg1[%c0, %c0_0] : memref<256x144xbf16, #tpu.memory_space<vmem>>, vector<256x144xbf16>
    %c0_1 = arith.constant 0 : index
    %c0_2 = arith.constant 0 : index
    %1 = vector.load %arg2[%c0_1, %c0_2] : memref<144x4xbf16, #tpu.memory_space<vmem>>, vector<144x4xbf16>
    %cst = arith.constant dense<0.000000e+00> : vector<256x4xf32>
    %2 = tpu.matmul %0, %1, %cst {dimension_numbers = #tpu.dot_dimension_numbers<[1], [0], [0], [1], [0, 0, 1, 1], [], []>} : vector<256x144xbf16>, vector<144x4xbf16>, vector<256x4xf32> -> vector<256x4xf32>
    %c0_3 = arith.constant 0 : index
    %c0_4 = arith.constant 0 : index
    %3 = vector.load %arg3[%c0_3, %c0_4] : memref<256x4xf32, #tpu.memory_space<vmem>>, vector<256x4xf32>
    tpu.vector_store %arg3[%c0_3, %c0_4], %2 {strides = array<i32>} : memref<256x4xf32, #tpu.memory_space<vmem>>, vector<256x4xf32>,
    return
  }
  func.func @transform_0(%arg0: i32) -> (i32, i32) {
    %c0_i32 = arith.constant 0 : i32
    %c0_i32_0 = arith.constant 0 : i32
    return %arg0, %c0_i32 : i32, i32
  }
  func.func @transform_1(%arg0: i32) -> (i32, i32) {
    %c0_i32 = arith.constant 0 : i32
    %c0_i32_0 = arith.constant 0 : i32
    %c0_i32_1 = arith.constant 0 : i32
    return %c0_i32, %c0_i32_0 : i32, i32
  }
  func.func @transform_2(%arg0: i32) -> (i32, i32) {
    %c0_i32 = arith.constant 0 : i32
    %c0_i32_0 = arith.constant 0 : i32
    return %arg0, %c0_i32 : i32, i32
  }
}

module attributes {stable_mosaic.version = 11 : i64} {
  func.func @_fused_conv_kernel(%arg0: i32, %arg1: memref<256x4xf32, #tpu.memory_space<vmem>>, %arg2: memref<1x4xf32, #tpu.memory_space<vmem>>, %arg3: memref<1x4xf32, #tpu.memory_space<vmem>>, %arg4: memref<4x8xbf16, #tpu.memory_space<vmem>>, %arg5: memref<8x8xbf16, #tpu.memory_space<vmem>>, %arg6: memref<256x8xf32, #tpu.memory_space<vmem>>, %arg7: memref<256x8xf32, #tpu.memory_space<vmem>>) attributes {dimension_semantics = [#tpu.dimension_semantics<parallel>], iteration_bounds = array<i64: 2>, scalar_prefetch = 0 : i64, scratch_operands = 0 : i64, tpu.core_type = #tpu.core_type<tc>, window_params = [{transform_indices = @transform_0, window_bounds = array<i64: 256, 4>}, {pipeline_mode = #tpu.pipeline_mode<synchronous>, transform_indices = @transform_1, window_bounds = array<i64: 1, 4>}, {pipeline_mode = #tpu.pipeline_mode<synchronous>, transform_indices = @transform_2, window_bounds = array<i64: 1, 4>}, {pipeline_mode = #tpu.pipeline_mode<synchronous>, transform_indices = @transform_3, window_bounds = array<i64: 4, 8>}, {pipeline_mode = #tpu.pipeline_mode<synchronous>, transform_indices = @transform_4, window_bounds = array<i64: 8, 8>}, {transform_indices = @transform_5, window_bounds = array<i64: 256, 8>}, {transform_indices = @transform_6, window_bounds = array<i64: 256, 8>}]} {
    %c0 = arith.constant 0 : index
    %c0_0 = arith.constant 0 : index
    %0 = vector.load %arg1[%c0, %c0_0] : memref<256x4xf32, #tpu.memory_space<vmem>>, vector<256x4xf32>
    %c0_1 = arith.constant 0 : index
    %c0_2 = arith.constant 0 : index
    %1 = vector.load %arg2[%c0_1, %c0_2] : memref<1x4xf32, #tpu.memory_space<vmem>>, vector<1x4xf32>
    %2 = vector.broadcast %1 : vector<1x4xf32> to vector<256x4xf32>
    %3 = arith.mulf %0, %2 : vector<256x4xf32>
    %c0_3 = arith.constant 0 : index
    %c0_4 = arith.constant 0 : index
    %4 = vector.load %arg3[%c0_3, %c0_4] : memref<1x4xf32, #tpu.memory_space<vmem>>, vector<1x4xf32>
    %5 = vector.broadcast %4 : vector<1x4xf32> to vector<256x4xf32>
    %6 = arith.addf %3, %5 : vector<256x4xf32>
    %cst = arith.constant 0.000000e+00 : f32
    %7 = vector.broadcast %cst : f32 to vector<256x4xf32>
    %8 = arith.maximumf %6, %7 : vector<256x4xf32>
    %9 = arith.truncf %8 : vector<256x4xf32> to vector<256x4xbf16>
    %c0_5 = arith.constant 0 : index
    %c0_6 = arith.constant 0 : index
    %10 = vector.load %arg4[%c0_5, %c0_6] : memref<4x8xbf16, #tpu.memory_space<vmem>>, vector<4x8xbf16>
    %cst_7 = arith.constant dense<0.000000e+00> : vector<256x8xf32>
    %11 = tpu.matmul %9, %10, %cst_7 {dimension_numbers = #tpu.dot_dimension_numbers<[1], [0], [0], [1], [0, 0, 1, 1], [], []>} : vector<256x4xbf16>, vector<4x8xbf16>, vector<256x8xf32> -> vector<256x8xf32>
    %12 = arith.truncf %11 : vector<256x8xf32> to vector<256x8xbf16>
    %c0_8 = arith.constant 0 : index
    %c0_9 = arith.constant 0 : index
    %13 = vector.load %arg5[%c0_8, %c0_9] : memref<8x8xbf16, #tpu.memory_space<vmem>>, vector<8x8xbf16>
    %cst_10 = arith.constant dense<0.000000e+00> : vector<256x8xf32>
    %14 = tpu.matmul %12, %13, %cst_10 {dimension_numbers = #tpu.dot_dimension_numbers<[1], [0], [0], [1], [0, 0, 1, 1], [], []>} : vector<256x8xbf16>, vector<8x8xbf16>, vector<256x8xf32> -> vector<256x8xf32>
    %c0_11 = arith.constant 0 : index
    %c0_12 = arith.constant 0 : index
    %15 = vector.load %arg6[%c0_11, %c0_12] : memref<256x8xf32, #tpu.memory_space<vmem>>, vector<256x8xf32>
    %16 = arith.addf %14, %15 : vector<256x8xf32>
    %c0_13 = arith.constant 0 : index
    %c0_14 = arith.constant 0 : index
    %17 = vector.load %arg7[%c0_13, %c0_14] : memref<256x8xf32, #tpu.memory_space<vmem>>, vector<256x8xf32>
    tpu.vector_store %arg7[%c0_13, %c0_14], %16 {strides = array<i32>} : memref<256x8xf32, #tpu.memory_space<vmem>>, vector<256x8xf32>,
    return
  }
  func.func @transform_0(%arg0: i32) -> (i32, i32) {
    %c0_i32 = arith.constant 0 : i32
    %c0_i32_0 = arith.constant 0 : i32
    return %arg0, %c0_i32 : i32, i32
  }
  func.func @transform_1(%arg0: i32) -> (i32, i32) {
    %c0_i32 = arith.constant 0 : i32
    %c0_i32_0 = arith.constant 0 : i32
    %c0_i32_1 = arith.constant 0 : i32
    return %c0_i32, %c0_i32_0 : i32, i32
  }
  func.func @transform_2(%arg0: i32) -> (i32, i32) {
    %c0_i32 = arith.constant 0 : i32
    %c0_i32_0 = arith.constant 0 : i32
    %c0_i32_1 = arith.constant 0 : i32
    return %c0_i32, %c0_i32_0 : i32, i32
  }
  func.func @transform_3(%arg0: i32) -> (i32, i32) {
    %c0_i32 = arith.constant 0 : i32
    %c0_i32_0 = arith.constant 0 : i32
    %c0_i32_1 = arith.constant 0 : i32
    return %c0_i32, %c0_i32_0 : i32, i32
  }
  func.func @transform_4(%arg0: i32) -> (i32, i32) {
    %c0_i32 = arith.constant 0 : i32
    %c0_i32_0 = arith.constant 0 : i32
    %c0_i32_1 = arith.constant 0 : i32
    return %c0_i32, %c0_i32_0 : i32, i32
  }
  func.func @transform_5(%arg0: i32) -> (i32, i32) {
    %c0_i32 = arith.constant 0 : i32
    %c0_i32_0 = arith.constant 0 : i32
    return %arg0, %c0_i32 : i32, i32
  }
  func.func @transform_6(%arg0: i32) -> (i32, i32) {
    %c0_i32 = arith.constant 0 : i32
    %c0_i32_0 = arith.constant 0 : i32
    return %arg0, %c0_i32 : i32, i32
  }
}

module attributes {stable_mosaic.version = 11 : i64} {
  func.func @_fused_conv_kernel(%arg0: i32, %arg1: memref<128x12xf32, #tpu.memory_space<vmem>>, %arg2: memref<1x12xf32, #tpu.memory_space<vmem>>, %arg3: memref<1x12xf32, #tpu.memory_space<vmem>>, %arg4: memref<12x16xbf16, #tpu.memory_space<vmem>>, %arg5: memref<1x16xf32, #tpu.memory_space<vmem>>, %arg6: memref<1x16xf32, #tpu.memory_space<vmem>>, %arg7: memref<128x16xf32, #tpu.memory_space<vmem>>) attributes {dimension_semantics = [#tpu.dimension_semantics<parallel>], iteration_bounds = array<i64: 1>, scalar_prefetch = 0 : i64, scratch_operands = 0 : i64, tpu.core_type = #tpu.core_type<tc>, window_params = [{transform_indices = @transform_0, window_bounds = array<i64: 128, 12>}, {pipeline_mode = #tpu.pipeline_mode<synchronous>, transform_indices = @transform_1, window_bounds = array<i64: 1, 12>}, {pipeline_mode = #tpu.pipeline_mode<synchronous>, transform_indices = @transform_2, window_bounds = array<i64: 1, 12>}, {pipeline_mode = #tpu.pipeline_mode<synchronous>, transform_indices = @transform_3, window_bounds = array<i64: 12, 16>}, {pipeline_mode = #tpu.pipeline_mode<synchronous>, transform_indices = @transform_4, window_bounds = array<i64: 1, 16>}, {pipeline_mode = #tpu.pipeline_mode<synchronous>, transform_indices = @transform_5, window_bounds = array<i64: 1, 16>}, {transform_indices = @transform_6, window_bounds = array<i64: 128, 16>}]} {
    %c0 = arith.constant 0 : index
    %c0_0 = arith.constant 0 : index
    %0 = vector.load %arg1[%c0, %c0_0] : memref<128x12xf32, #tpu.memory_space<vmem>>, vector<128x12xf32>
    %c0_1 = arith.constant 0 : index
    %c0_2 = arith.constant 0 : index
    %1 = vector.load %arg2[%c0_1, %c0_2] : memref<1x12xf32, #tpu.memory_space<vmem>>, vector<1x12xf32>
    %2 = vector.broadcast %1 : vector<1x12xf32> to vector<128x12xf32>
    %3 = arith.mulf %0, %2 : vector<128x12xf32>
    %c0_3 = arith.constant 0 : index
    %c0_4 = arith.constant 0 : index
    %4 = vector.load %arg3[%c0_3, %c0_4] : memref<1x12xf32, #tpu.memory_space<vmem>>, vector<1x12xf32>
    %5 = vector.broadcast %4 : vector<1x12xf32> to vector<128x12xf32>
    %6 = arith.addf %3, %5 : vector<128x12xf32>
    %cst = arith.constant 3.000000e+00 : f32
    %7 = vector.broadcast %cst : f32 to vector<128x12xf32>
    %8 = arith.addf %6, %7 : vector<128x12xf32>
    %cst_5 = arith.constant 0.000000e+00 : f32
    %cst_6 = arith.constant 6.000000e+00 : f32
    %9 = vector.broadcast %cst_5 : f32 to vector<128x12xf32>
    %10 = arith.maximumf %9, %8 : vector<128x12xf32>
    %11 = vector.broadcast %cst_6 : f32 to vector<128x12xf32>
    %12 = arith.minimumf %11, %10 : vector<128x12xf32>
    %13 = arith.mulf %6, %12 : vector<128x12xf32>
    %cst_7 = arith.constant 0.166666672 : f32
    %14 = vector.broadcast %cst_7 : f32 to vector<128x12xf32>
    %15 = arith.mulf %13, %14 : vector<128x12xf32>
    %16 = arith.truncf %15 : vector<128x12xf32> to vector<128x12xbf16>
    %c0_8 = arith.constant 0 : index
    %c0_9 = arith.constant 0 : index
    %17 = vector.load %arg4[%c0_8, %c0_9] : memref<12x16xbf16, #tpu.memory_space<vmem>>, vector<12x16xbf16>
    %cst_10 = arith.constant dense<0.000000e+00> : vector<128x16xf32>
    %18 = tpu.matmul %16, %17, %cst_10 {dimension_numbers = #tpu.dot_dimension_numbers<[1], [0], [0], [1], [0, 0, 1, 1], [], []>} : vector<128x12xbf16>, vector<12x16xbf16>, vector<128x16xf32> -> vector<128x16xf32>
    %c0_11 = arith.constant 0 : index
    %c0_12 = arith.constant 0 : index
    %19 = vector.load %arg5[%c0_11, %c0_12] : memref<1x16xf32, #tpu.memory_space<vmem>>, vector<1x16xf32>
    %20 = vector.broadcast %19 : vector<1x16xf32> to vector<128x16xf32>
    %21 = arith.mulf %18, %20 : vector<128x16xf32>
    %c0_13 = arith.constant 0 : index
    %c0_14 = arith.constant 0 : index
    %22 = vector.load %arg6[%c0_13, %c0_14] : memref<1x16xf32, #tpu.memory_space<vmem>>, vector<1x16xf32>
    %23 = vector.broadcast %22 : vector<1x16xf32> to vector<128x16xf32>
    %24 = arith.addf %21, %23 : vector<128x16xf32>
    %cst_15 = arith.constant 3.000000e+00 : f32
    %25 = vector.broadcast %cst_15 : f32 to vector<128x16xf32>
    %26 = arith.addf %24, %25 : vector<128x16xf32>
    %cst_16 = arith.constant 0.000000e+00 : f32
    %cst_17 = arith.constant 6.000000e+00 : f32
    %27 = vector.broadcast %cst_16 : f32 to vector<128x16xf32>
    %28 = arith.maximumf %27, %26 : vector<128x16xf32>
    %29 = vector.broadcast %cst_17 : f32 to vector<128x16xf32>
    %30 = arith.minimumf %29, %28 : vector<128x16xf32>
    %31 = arith.mulf %24, %30 : vector<128x16xf32>
    %cst_18 = arith.constant 0.166666672 : f32
    %32 = vector.broadcast %cst_18 : f32 to vector<128x16xf32>
    %33 = arith.mulf %31, %32 : vector<128x16xf32>
    %c0_19 = arith.constant 0 : index
    %c0_20 = arith.constant 0 : index
    %34 = vector.load %arg7[%c0_19, %c0_20] : memref<128x16xf32, #tpu.memory_space<vmem>>, vector<128x16xf32>
    tpu.vector_store %arg7[%c0_19, %c0_20], %33 {strides = array<i32>} : memref<128x16xf32, #tpu.memory_space<vmem>>, vector<128x16xf32>,
    return
  }
  func.func @transform_0(%arg0: i32) -> (i32, i32) {
    %c0_i32 = arith.constant 0 : i32
    %c0_i32_0 = arith.constant 0 : i32
    return %arg0, %c0_i32 : i32, i32
  }
  func.func @transform_1(%arg0: i32) -> (i32, i32) {
    %c0_i32 = arith.constant 0 : i32
    %c0_i32_0 = arith.constant 0 : i32
    %c0_i32_1 = arith.constant 0 : i32
    return %c0_i32, %c0_i32_0 : i32, i32
  }
  func.func @transform_2(%arg0: i32) -> (i32, i32) {
    %c0_i32 = arith.constant 0 : i32
    %c0_i32_0 = arith.constant 0 : i32
    %c0_i32_1 = arith.constant 0 : i32
    return %c0_i32, %c0_i32_0 : i32, i32
  }
  func.func @transform_3(%arg0: i32) -> (i32, i32) {
    %c0_i32 = arith.constant 0 : i32
    %c0_i32_0 = arith.constant 0 : i32
    %c0_i32_1 = arith.constant 0 : i32
    return %c0_i32, %c0_i32_0 : i32, i32
  }
  func.func @transform_4(%arg0: i32) -> (i32, i32) {
    %c0_i32 = arith.constant 0 : i32
    %c0_i32_0 = arith.constant 0 : i32
    %c0_i32_1 = arith.constant 0 : i32
    return %c0_i32, %c0_i32_0 : i32, i32
  }
  func.func @transform_5(%arg0: i32) -> (i32, i32) {
    %c0_i32 = arith.constant 0 : i32
    %c0_i32_0 = arith.constant 0 : i32
    %c0_i32_1 = arith.constant 0 : i32
    return %c0_i32, %c0_i32_0 : i32, i32
  }
  func.func @transform_6(%arg0: i32) -> (i32, i32) {
    %c0_i32 = arith.constant 0 : i32
    %c0_i32_0 = arith.constant 0 : i32
    return %arg0, %c0_i32 : i32, i32
  }
}

module attributes {stable_mosaic.version = 11 : i64} {
  func.func @_fused_conv_kernel(%arg0: i32, %arg1: memref<128x144xbf16, #tpu.memory_space<vmem>>, %arg2: memref<144x4xbf16, #tpu.memory_space<vmem>>, %arg3: memref<128x4xf32, #tpu.memory_space<vmem>>) attributes {dimension_semantics = [#tpu.dimension_semantics<parallel>], iteration_bounds = array<i64: 1>, scalar_prefetch = 0 : i64, scratch_operands = 0 : i64, tpu.core_type = #tpu.core_type<tc>, window_params = [{transform_indices = @transform_0, window_bounds = array<i64: 128, 144>}, {pipeline_mode = #tpu.pipeline_mode<synchronous>, transform_indices = @transform_1, window_bounds = array<i64: 144, 4>}, {transform_indices = @transform_2, window_bounds = array<i64: 128, 4>}]} {
    %c0 = arith.constant 0 : index
    %c0_0 = arith.constant 0 : index
    %0 = vector.load %arg1[%c0, %c0_0] : memref<128x144xbf16, #tpu.memory_space<vmem>>, vector<128x144xbf16>
    %c0_1 = arith.constant 0 : index
    %c0_2 = arith.constant 0 : index
    %1 = vector.load %arg2[%c0_1, %c0_2] : memref<144x4xbf16, #tpu.memory_space<vmem>>, vector<144x4xbf16>
    %cst = arith.constant dense<0.000000e+00> : vector<128x4xf32>
    %2 = tpu.matmul %0, %1, %cst {dimension_numbers = #tpu.dot_dimension_numbers<[1], [0], [0], [1], [0, 0, 1, 1], [], []>} : vector<128x144xbf16>, vector<144x4xbf16>, vector<128x4xf32> -> vector<128x4xf32>
    %c0_3 = arith.constant 0 : index
    %c0_4 = arith.constant 0 : index
    %3 = vector.load %arg3[%c0_3, %c0_4] : memref<128x4xf32, #tpu.memory_space<vmem>>, vector<128x4xf32>
    tpu.vector_store %arg3[%c0_3, %c0_4], %2 {strides = array<i32>} : memref<128x4xf32, #tpu.memory_space<vmem>>, vector<128x4xf32>,
    return
  }
  func.func @transform_0(%arg0: i32) -> (i32, i32) {
    %c0_i32 = arith.constant 0 : i32
    %c0_i32_0 = arith.constant 0 : i32
    return %arg0, %c0_i32 : i32, i32
  }
  func.func @transform_1(%arg0: i32) -> (i32, i32) {
    %c0_i32 = arith.constant 0 : i32
    %c0_i32_0 = arith.constant 0 : i32
    %c0_i32_1 = arith.constant 0 : i32
    return %c0_i32, %c0_i32_0 : i32, i32
  }
  func.func @transform_2(%arg0: i32) -> (i32, i32) {
    %c0_i32 = arith.constant 0 : i32
    %c0_i32_0 = arith.constant 0 : i32
    return %arg0, %c0_i32 : i32, i32
  }
}

module attributes {stable_mosaic.version = 11 : i64} {
  func.func @_gap_kernel(%arg0: i32, %arg1: memref<2x64x4xf32, #tpu.memory_space<vmem>>, %arg2: memref<2x1x4xf32, #tpu.memory_space<vmem>>, %arg3: memref<2x1x4xf32, #tpu.memory_space<vmem>>) attributes {dimension_semantics = [#tpu.dimension_semantics<arbitrary>], iteration_bounds = array<i64: 1>, scalar_prefetch = 0 : i64, scratch_operands = 1 : i64, tpu.core_type = #tpu.core_type<tc>, window_params = [{transform_indices = @transform_0, window_bounds = array<i64: 2, 64, 4>}, {pipeline_mode = #tpu.pipeline_mode<synchronous>, transform_indices = @transform_1, window_bounds = array<i64: 2, 1, 4>}]} {
    %c0_i32 = arith.constant 0 : i32
    %0 = arith.cmpi eq, %arg0, %c0_i32 : i32
    %1 = arith.extui %0 : i1 to i32
    %c0_i32_0 = arith.constant 0 : i32
    %2 = arith.cmpi ne, %1, %c0_i32_0 : i32
    scf.if %2 {
      %cst_13 = arith.constant 0.000000e+00 : f32
      %20 = vector.broadcast %cst_13 : f32 to vector<2x1x4xf32>
      %c0_14 = arith.constant 0 : index
      %c0_15 = arith.constant 0 : index
      %c0_16 = arith.constant 0 : index
      %21 = vector.load %arg3[%c0_14, %c0_15, %c0_16] : memref<2x1x4xf32, #tpu.memory_space<vmem>>, vector<2x1x4xf32>
      tpu.vector_store %arg3[%c0_14, %c0_15, %c0_16], %20 {strides = array<i32>} : memref<2x1x4xf32, #tpu.memory_space<vmem>>, vector<2x1x4xf32>,
    } else {
    }
    %c0 = arith.constant 0 : index
    %c0_1 = arith.constant 0 : index
    %c0_2 = arith.constant 0 : index
    %3 = vector.load %arg1[%c0, %c0_1, %c0_2] : memref<2x64x4xf32, #tpu.memory_space<vmem>>, vector<2x64x4xf32>
    %c64_i32 = arith.constant 64 : i32
    %4 = arith.muli %arg0, %c64_i32 : i32
    %5 = tpu.iota {dimensions = array<i32: 1>} : vector<2x64x4xi32>
    %6 = vector.broadcast %4 : i32 to vector<2x64x4xi32>
    %7 = arith.addi %6, %5 : vector<2x64x4xi32>
    %c64_i32_3 = arith.constant 64 : i32
    %8 = vector.broadcast %c64_i32_3 : i32 to vector<2x64x4xi32>
    %9 = arith.cmpi slt, %7, %8 : vector<2x64x4xi32>
    %cst = arith.constant 0.000000e+00 : f32
    %10 = vector.broadcast %cst : f32 to vector<2x64x4xf32>
    %11 = arith.select %9, %3, %10 : vector<2x64x4xi1>, vector<2x64x4xf32>
    %c0_4 = arith.constant 0 : index
    %c0_5 = arith.constant 0 : index
    %c0_6 = arith.constant 0 : index
    %12 = vector.load %arg3[%c0_4, %c0_5, %c0_6] : memref<2x1x4xf32, #tpu.memory_space<vmem>>, vector<2x1x4xf32>
    %cst_7 = arith.constant dense<0.000000e+00> : vector<2x4xf32>
    %13 = vector.multi_reduction <add>, %11, %cst_7 [1] : vector<2x64x4xf32> to vector<2x4xf32>
    %14 = vector.shape_cast %13 : vector<2x4xf32> to vector<2x1x4xf32>
    %15 = arith.addf %12, %14 : vector<2x1x4xf32>
    %c0_8 = arith.constant 0 : index
    %c0_9 = arith.constant 0 : index
    %c0_10 = arith.constant 0 : index
    %16 = vector.load %arg3[%c0_8, %c0_9, %c0_10] : memref<2x1x4xf32, #tpu.memory_space<vmem>>, vector<2x1x4xf32>
    tpu.vector_store %arg3[%c0_8, %c0_9, %c0_10], %15 {strides = array<i32>} : memref<2x1x4xf32, #tpu.memory_space<vmem>>, vector<2x1x4xf32>,
    %c0_i32_11 = arith.constant 0 : i32
    %17 = arith.cmpi eq, %arg0, %c0_i32_11 : i32
    %18 = arith.extui %17 : i1 to i32
    %c0_i32_12 = arith.constant 0 : i32
    %19 = arith.cmpi ne, %18, %c0_i32_12 : i32
    scf.if %19 {
      %c0_13 = arith.constant 0 : index
      %c0_14 = arith.constant 0 : index
      %c0_15 = arith.constant 0 : index
      %20 = vector.load %arg3[%c0_13, %c0_14, %c0_15] : memref<2x1x4xf32, #tpu.memory_space<vmem>>, vector<2x1x4xf32>
      %cst_16 = arith.constant 1.562500e-02 : f32
      %21 = vector.broadcast %cst_16 : f32 to vector<2x1x4xf32>
      %22 = arith.mulf %20, %21 : vector<2x1x4xf32>
      %c0_17 = arith.constant 0 : index
      %c0_18 = arith.constant 0 : index
      %c0_19 = arith.constant 0 : index
      %23 = vector.load %arg2[%c0_17, %c0_18, %c0_19] : memref<2x1x4xf32, #tpu.memory_space<vmem>>, vector<2x1x4xf32>
      tpu.vector_store %arg2[%c0_17, %c0_18, %c0_19], %22 {strides = array<i32>} : memref<2x1x4xf32, #tpu.memory_space<vmem>>, vector<2x1x4xf32>,
    } else {
    }
    return
  }
  func.func @transform_0(%arg0: i32) -> (i32, i32, i32) {
    %c0_i32 = arith.constant 0 : i32
    %c0_i32_0 = arith.constant 0 : i32
    %c0_i32_1 = arith.constant 0 : i32
    return %c0_i32, %arg0, %c0_i32_0 : i32, i32, i32
  }
  func.func @transform_1(%arg0: i32) -> (i32, i32, i32) {
    %c0_i32 = arith.constant 0 : i32
    %c0_i32_0 = arith.constant 0 : i32
    %c0_i32_1 = arith.constant 0 : i32
    %c0_i32_2 = arith.constant 0 : i32
    return %c0_i32, %c0_i32_0, %c0_i32_1 : i32, i32, i32
  }
}

module attributes {stable_mosaic.version = 11 : i64} {
  func.func @_fused_conv_kernel(%arg0: i32, %arg1: memref<128x4xf32, #tpu.memory_space<vmem>>, %arg2: memref<1x4xf32, #tpu.memory_space<vmem>>, %arg3: memref<1x4xf32, #tpu.memory_space<vmem>>, %arg4: memref<4x12xbf16, #tpu.memory_space<vmem>>, %arg5: memref<12x12xbf16, #tpu.memory_space<vmem>>, %arg6: memref<128x12xf32, #tpu.memory_space<vmem>>, %arg7: memref<128x12xf32, #tpu.memory_space<vmem>>) attributes {dimension_semantics = [#tpu.dimension_semantics<parallel>], iteration_bounds = array<i64: 1>, scalar_prefetch = 0 : i64, scratch_operands = 0 : i64, tpu.core_type = #tpu.core_type<tc>, window_params = [{transform_indices = @transform_0, window_bounds = array<i64: 128, 4>}, {pipeline_mode = #tpu.pipeline_mode<synchronous>, transform_indices = @transform_1, window_bounds = array<i64: 1, 4>}, {pipeline_mode = #tpu.pipeline_mode<synchronous>, transform_indices = @transform_2, window_bounds = array<i64: 1, 4>}, {pipeline_mode = #tpu.pipeline_mode<synchronous>, transform_indices = @transform_3, window_bounds = array<i64: 4, 12>}, {pipeline_mode = #tpu.pipeline_mode<synchronous>, transform_indices = @transform_4, window_bounds = array<i64: 12, 12>}, {transform_indices = @transform_5, window_bounds = array<i64: 128, 12>}, {transform_indices = @transform_6, window_bounds = array<i64: 128, 12>}]} {
    %c0 = arith.constant 0 : index
    %c0_0 = arith.constant 0 : index
    %0 = vector.load %arg1[%c0, %c0_0] : memref<128x4xf32, #tpu.memory_space<vmem>>, vector<128x4xf32>
    %c0_1 = arith.constant 0 : index
    %c0_2 = arith.constant 0 : index
    %1 = vector.load %arg2[%c0_1, %c0_2] : memref<1x4xf32, #tpu.memory_space<vmem>>, vector<1x4xf32>
    %2 = vector.broadcast %1 : vector<1x4xf32> to vector<128x4xf32>
    %3 = arith.mulf %0, %2 : vector<128x4xf32>
    %c0_3 = arith.constant 0 : index
    %c0_4 = arith.constant 0 : index
    %4 = vector.load %arg3[%c0_3, %c0_4] : memref<1x4xf32, #tpu.memory_space<vmem>>, vector<1x4xf32>
    %5 = vector.broadcast %4 : vector<1x4xf32> to vector<128x4xf32>
    %6 = arith.addf %3, %5 : vector<128x4xf32>
    %cst = arith.constant 3.000000e+00 : f32
    %7 = vector.broadcast %cst : f32 to vector<128x4xf32>
    %8 = arith.addf %6, %7 : vector<128x4xf32>
    %cst_5 = arith.constant 0.000000e+00 : f32
    %cst_6 = arith.constant 6.000000e+00 : f32
    %9 = vector.broadcast %cst_5 : f32 to vector<128x4xf32>
    %10 = arith.maximumf %9, %8 : vector<128x4xf32>
    %11 = vector.broadcast %cst_6 : f32 to vector<128x4xf32>
    %12 = arith.minimumf %11, %10 : vector<128x4xf32>
    %13 = arith.mulf %6, %12 : vector<128x4xf32>
    %cst_7 = arith.constant 0.166666672 : f32
    %14 = vector.broadcast %cst_7 : f32 to vector<128x4xf32>
    %15 = arith.mulf %13, %14 : vector<128x4xf32>
    %16 = arith.truncf %15 : vector<128x4xf32> to vector<128x4xbf16>
    %c0_8 = arith.constant 0 : index
    %c0_9 = arith.constant 0 : index
    %17 = vector.load %arg4[%c0_8, %c0_9] : memref<4x12xbf16, #tpu.memory_space<vmem>>, vector<4x12xbf16>
    %cst_10 = arith.constant dense<0.000000e+00> : vector<128x12xf32>
    %18 = tpu.matmul %16, %17, %cst_10 {dimension_numbers = #tpu.dot_dimension_numbers<[1], [0], [0], [1], [0, 0, 1, 1], [], []>} : vector<128x4xbf16>, vector<4x12xbf16>, vector<128x12xf32> -> vector<128x12xf32>
    %19 = arith.truncf %18 : vector<128x12xf32> to vector<128x12xbf16>
    %c0_11 = arith.constant 0 : index
    %c0_12 = arith.constant 0 : index
    %20 = vector.load %arg5[%c0_11, %c0_12] : memref<12x12xbf16, #tpu.memory_space<vmem>>, vector<12x12xbf16>
    %cst_13 = arith.constant dense<0.000000e+00> : vector<128x12xf32>
    %21 = tpu.matmul %19, %20, %cst_13 {dimension_numbers = #tpu.dot_dimension_numbers<[1], [0], [0], [1], [0, 0, 1, 1], [], []>} : vector<128x12xbf16>, vector<12x12xbf16>, vector<128x12xf32> -> vector<128x12xf32>
    %c0_14 = arith.constant 0 : index
    %c0_15 = arith.constant 0 : index
    %22 = vector.load %arg6[%c0_14, %c0_15] : memref<128x12xf32, #tpu.memory_space<vmem>>, vector<128x12xf32>
    %23 = arith.addf %21, %22 : vector<128x12xf32>
    %c0_16 = arith.constant 0 : index
    %c0_17 = arith.constant 0 : index
    %24 = vector.load %arg7[%c0_16, %c0_17] : memref<128x12xf32, #tpu.memory_space<vmem>>, vector<128x12xf32>
    tpu.vector_store %arg7[%c0_16, %c0_17], %23 {strides = array<i32>} : memref<128x12xf32, #tpu.memory_space<vmem>>, vector<128x12xf32>,
    return
  }
  func.func @transform_0(%arg0: i32) -> (i32, i32) {
    %c0_i32 = arith.constant 0 : i32
    %c0_i32_0 = arith.constant 0 : i32
    return %arg0, %c0_i32 : i32, i32
  }
  func.func @transform_1(%arg0: i32) -> (i32, i32) {
    %c0_i32 = arith.constant 0 : i32
    %c0_i32_0 = arith.constant 0 : i32
    %c0_i32_1 = arith.constant 0 : i32
    return %c0_i32, %c0_i32_0 : i32, i32
  }
  func.func @transform_2(%arg0: i32) -> (i32, i32) {
    %c0_i32 = arith.constant 0 : i32
    %c0_i32_0 = arith.constant 0 : i32
    %c0_i32_1 = arith.constant 0 : i32
    return %c0_i32, %c0_i32_0 : i32, i32
  }
  func.func @transform_3(%arg0: i32) -> (i32, i32) {
    %c0_i32 = arith.constant 0 : i32
    %c0_i32_0 = arith.constant 0 : i32
    %c0_i32_1 = arith.constant 0 : i32
    return %c0_i32, %c0_i32_0 : i32, i32
  }
  func.func @transform_4(%arg0: i32) -> (i32, i32) {
    %c0_i32 = arith.constant 0 : i32
    %c0_i32_0 = arith.constant 0 : i32
    %c0_i32_1 = arith.constant 0 : i32
    return %c0_i32, %c0_i32_0 : i32, i32
  }
  func.func @transform_5(%arg0: i32) -> (i32, i32) {
    %c0_i32 = arith.constant 0 : i32
    %c0_i32_0 = arith.constant 0 : i32
    return %arg0, %c0_i32 : i32, i32
  }
  func.func @transform_6(%arg0: i32) -> (i32, i32) {
    %c0_i32 = arith.constant 0 : i32
    %c0_i32_0 = arith.constant 0 : i32
    return %arg0, %c0_i32 : i32, i32
  }
}

module attributes {stable_mosaic.version = 11 : i64} {
  func.func @_gap_kernel(%arg0: i32, %arg1: memref<2x64x16xf32, #tpu.memory_space<vmem>>, %arg2: memref<1x1x16xf32, #tpu.memory_space<vmem>>, %arg3: memref<1x1x16xf32, #tpu.memory_space<vmem>>, %arg4: memref<2x1x16xf32, #tpu.memory_space<vmem>>, %arg5: memref<2x1x16xf32, #tpu.memory_space<vmem>>) attributes {dimension_semantics = [#tpu.dimension_semantics<arbitrary>], iteration_bounds = array<i64: 1>, scalar_prefetch = 0 : i64, scratch_operands = 1 : i64, tpu.core_type = #tpu.core_type<tc>, window_params = [{transform_indices = @transform_0, window_bounds = array<i64: 2, 64, 16>}, {pipeline_mode = #tpu.pipeline_mode<synchronous>, transform_indices = @transform_1, window_bounds = array<i64: 1, 1, 16>}, {pipeline_mode = #tpu.pipeline_mode<synchronous>, transform_indices = @transform_2, window_bounds = array<i64: 1, 1, 16>}, {pipeline_mode = #tpu.pipeline_mode<synchronous>, transform_indices = @transform_3, window_bounds = array<i64: 2, 1, 16>}]} {
    %c0_i32 = arith.constant 0 : i32
    %0 = arith.cmpi eq, %arg0, %c0_i32 : i32
    %1 = arith.extui %0 : i1 to i32
    %c0_i32_0 = arith.constant 0 : i32
    %2 = arith.cmpi ne, %1, %c0_i32_0 : i32
    scf.if %2 {
      %cst_20 = arith.constant 0.000000e+00 : f32
      %28 = vector.broadcast %cst_20 : f32 to vector<2x1x16xf32>
      %c0_21 = arith.constant 0 : index
      %c0_22 = arith.constant 0 : index
      %c0_23 = arith.constant 0 : index
      %29 = vector.load %arg5[%c0_21, %c0_22, %c0_23] : memref<2x1x16xf32, #tpu.memory_space<vmem>>, vector<2x1x16xf32>
      tpu.vector_store %arg5[%c0_21, %c0_22, %c0_23], %28 {strides = array<i32>} : memref<2x1x16xf32, #tpu.memory_space<vmem>>, vector<2x1x16xf32>,
    } else {
    }
    %c0 = arith.constant 0 : index
    %c0_1 = arith.constant 0 : index
    %c0_2 = arith.constant 0 : index
    %3 = vector.load %arg1[%c0, %c0_1, %c0_2] : memref<2x64x16xf32, #tpu.memory_space<vmem>>, vector<2x64x16xf32>
    %c0_3 = arith.constant 0 : index
    %c0_4 = arith.constant 0 : index
    %c0_5 = arith.constant 0 : index
    %4 = vector.load %arg2[%c0_3, %c0_4, %c0_5] : memref<1x1x16xf32, #tpu.memory_space<vmem>>, vector<1x1x16xf32>
    %5 = vector.broadcast %4 : vector<1x1x16xf32> to vector<2x64x16xf32>
    %6 = arith.mulf %3, %5 : vector<2x64x16xf32>
    %c0_6 = arith.constant 0 : index
    %c0_7 = arith.constant 0 : index
    %c0_8 = arith.constant 0 : index
    %7 = vector.load %arg3[%c0_6, %c0_7, %c0_8] : memref<1x1x16xf32, #tpu.memory_space<vmem>>, vector<1x1x16xf32>
    %8 = vector.broadcast %7 : vector<1x1x16xf32> to vector<2x64x16xf32>
    %9 = arith.addf %6, %8 : vector<2x64x16xf32>
    %cst = arith.constant 0.000000e+00 : f32
    %10 = vector.broadcast %cst : f32 to vector<2x64x16xf32>
    %11 = arith.maximumf %9, %10 : vector<2x64x16xf32>
    %c64_i32 = arith.constant 64 : i32
    %12 = arith.muli %arg0, %c64_i32 : i32
    %13 = tpu.iota {dimensions = array<i32: 1>} : vector<2x64x16xi32>
    %14 = vector.broadcast %12 : i32 to vector<2x64x16xi32>
    %15 = arith.addi %14, %13 : vector<2x64x16xi32>
    %c64_i32_9 = arith.constant 64 : i32
    %16 = vector.broadcast %c64_i32_9 : i32 to vector<2x64x16xi32>
    %17 = arith.cmpi slt, %15, %16 : vector<2x64x16xi32>
    %cst_10 = arith.constant 0.000000e+00 : f32
    %18 = vector.broadcast %cst_10 : f32 to vector<2x64x16xf32>
    %19 = arith.select %17, %11, %18 : vector<2x64x16xi1>, vector<2x64x16xf32>
    %c0_11 = arith.constant 0 : index
    %c0_12 = arith.constant 0 : index
    %c0_13 = arith.constant 0 : index
    %20 = vector.load %arg5[%c0_11, %c0_12, %c0_13] : memref<2x1x16xf32, #tpu.memory_space<vmem>>, vector<2x1x16xf32>
    %cst_14 = arith.constant dense<0.000000e+00> : vector<2x16xf32>
    %21 = vector.multi_reduction <add>, %19, %cst_14 [1] : vector<2x64x16xf32> to vector<2x16xf32>
    %22 = vector.shape_cast %21 : vector<2x16xf32> to vector<2x1x16xf32>
    %23 = arith.addf %20, %22 : vector<2x1x16xf32>
    %c0_15 = arith.constant 0 : index
    %c0_16 = arith.constant 0 : index
    %c0_17 = arith.constant 0 : index
    %24 = vector.load %arg5[%c0_15, %c0_16, %c0_17] : memref<2x1x16xf32, #tpu.memory_space<vmem>>, vector<2x1x16xf32>
    tpu.vector_store %arg5[%c0_15, %c0_16, %c0_17], %23 {strides = array<i32>} : memref<2x1x16xf32, #tpu.memory_space<vmem>>, vector<2x1x16xf32>,
    %c0_i32_18 = arith.constant 0 : i32
    %25 = arith.cmpi eq, %arg0, %c0_i32_18 : i32
    %26 = arith.extui %25 : i1 to i32
    %c0_i32_19 = arith.constant 0 : i32
    %27 = arith.cmpi ne, %26, %c0_i32_19 : i32
    scf.if %27 {
      %c0_20 = arith.constant 0 : index
      %c0_21 = arith.constant 0 : index
      %c0_22 = arith.constant 0 : index
      %28 = vector.load %arg5[%c0_20, %c0_21, %c0_22] : memref<2x1x16xf32, #tpu.memory_space<vmem>>, vector<2x1x16xf32>
      %cst_23 = arith.constant 1.562500e-02 : f32
      %29 = vector.broadcast %cst_23 : f32 to vector<2x1x16xf32>
      %30 = arith.mulf %28, %29 : vector<2x1x16xf32>
      %c0_24 = arith.constant 0 : index
      %c0_25 = arith.constant 0 : index
      %c0_26 = arith.constant 0 : index
      %31 = vector.load %arg4[%c0_24, %c0_25, %c0_26] : memref<2x1x16xf32, #tpu.memory_space<vmem>>, vector<2x1x16xf32>
      tpu.vector_store %arg4[%c0_24, %c0_25, %c0_26], %30 {strides = array<i32>} : memref<2x1x16xf32, #tpu.memory_space<vmem>>, vector<2x1x16xf32>,
    } else {
    }
    return
  }
  func.func @transform_0(%arg0: i32) -> (i32, i32, i32) {
    %c0_i32 = arith.constant 0 : i32
    %c0_i32_0 = arith.constant 0 : i32
    %c0_i32_1 = arith.constant 0 : i32
    return %c0_i32, %arg0, %c0_i32_0 : i32, i32, i32
  }
  func.func @transform_1(%arg0: i32) -> (i32, i32, i32) {
    %c0_i32 = arith.constant 0 : i32
    %c0_i32_0 = arith.constant 0 : i32
    %c0_i32_1 = arith.constant 0 : i32
    %c0_i32_2 = arith.constant 0 : i32
    return %c0_i32, %c0_i32_0, %c0_i32_1 : i32, i32, i32
  }
  func.func @transform_2(%arg0: i32) -> (i32, i32, i32) {
    %c0_i32 = arith.constant 0 : i32
    %c0_i32_0 = arith.constant 0 : i32
    %c0_i32_1 = arith.constant 0 : i32
    %c0_i32_2 = arith.constant 0 : i32
    return %c0_i32, %c0_i32_0, %c0_i32_1 : i32, i32, i32
  }
  func.func @transform_3(%arg0: i32) -> (i32, i32, i32) {
    %c0_i32 = arith.constant 0 : i32
    %c0_i32_0 = arith.constant 0 : i32
    %c0_i32_1 = arith.constant 0 : i32
    %c0_i32_2 = arith.constant 0 : i32
    return %c0_i32, %c0_i32_0, %c0_i32_1 : i32, i32, i32
  }
}

</mosaic_0001>

<bundles_post_ra>
// kernel: _lambda_.9
= control target key start
LH: loop header
LB: loop body
LE: loop exit
PB: predicated region body
PF: predicated region fallthrough
CT: control target
= control target key end

     0   :  { %s735_s9 = smov 0   ;;  %s862_s0 = inlined_call_operand.vmem [shape: bf16[512,27], index: 0, kind: input, shape index: {}]   ;;  %s863_s1 = inlined_call_operand.vmem [shape: bf16[27,8], index: 1, kind: input, shape index: {}]   ;;  %s864_s2 = inlined_call_operand.vmem [shape: f32[512,8], index: 2, kind: output, shape index: {}]  }
   0x1 LB: > { %s581_s10 = sadd.s32 4294967295, %s717_s9   ;;  %p585_p0 = scmp.ge.s32.totalorder %s717_s9, 1  ;;  %s717_s9 = sphi %s735_s9, %s12_s9  }
   0x2   : > { %p113_p1 = scmp.lt.s32.totalorder %s717_s9, 3 }
   0x4   : > { %p114_p2 = pnand %p585_p0, %p113_p1 }
   0x5   : > { %v693_v0 = vld [vmem:[%s863_s1] sm:$0xff] (!%p114_p2)   ;;  %vm324_vm0 = vcmask (!%p114_p2), 1044480   ;;  %v694_v1 = vld [vmem:[%s863_s1 + $0x8] sm:$0x3f] (!%p114_p2)   ;;  %vm325_vm1 = vcmask (!%p114_p2), 1045504   ;;  %s586_s15 = sshll.u32 (!%p114_p2), %s581_s10, 5 }
   0x6   : > { %117 = sbr.rel (%p114_p2) target bundleno = 259 (0x103), region = 28  ;;  %644 = vmatprep.subr.bf16.mxu0 (!%p114_p2), %v693_v0  ;;  %680 = vmatprep.subr.bf16.mxu1 (!%p114_p2), %v693_v0  ;;  %v719_v2 = vmov (!%p114_p2), 65535   ;;  %p136_p3 = scmp.lt.s32.totalorder (!%p114_p2), %s586_s15, 63  ;;  %vm275_vm2 = vcmask (!%p114_p2), 220160   ;;  %vm492_vm3 = vcmask (!%p114_p2), 64512  }
   0x7   : > { %645 = vmatpush3.bf16.msra.mxu0 (!%p114_p2), %v693_v0  ;;  %682 = vmatpush3.bf16.msra.mxu1 (!%p114_p2), %v693_v0  ;;  %v326_v3 = vsel (!%p114_p2), %vm324_vm0, 4294967295, %v719_v2 }
   0x8   : > { %v327_v4 = vsel (!%p114_p2), %vm325_vm1, %v326_v3, 0 }
   0x9   : > { %v329_v5 = vand.u32 (!%p114_p2), %v694_v1, %v327_v4 }
   0xb   : > { %646 = vmatprep.subr.bf16.mxu0 (!%p114_p2), %v329_v5  ;;  %681 = vmatprep.subr.bf16.mxu1 (!%p114_p2), %v329_v5 }
   0xc   : > { %647 = vmatpush3.bf16.msra.mxu0 (!%p114_p2), %v329_v5  ;;  %683 = vmatpush3.bf16.msra.mxu1 (!%p114_p2), %v329_v5 }
   0xd   : > { %s866_s15 = smov (!%p136_p3, %s586_s15), 63 }
   0xe   : > { %s587_s16 = sshll.u32 %s866_s15, 2  ;;  %s589_s20 = sshll.u32 %s866_s15, 3 }
   0xf   : > { %s755_s19 = scalar_lea.vmem %s862_s0, %s587_s16  ;;  %s793_s23 = scalar_lea.vmem %s864_s2, %s589_s20 }
  0x10   : > { %v695_v6 = vld [vmem:[%s755_s19] sm:$0xff]   ;;  %v697_v8 = vld [vmem:[%s755_s19 + $0x8] sm:$0xff]   ;;  %v699_v10 = vld [vmem:[%s755_s19 + $0x10] sm:$0xff]  }
  0x11   : > { %v696_v7 = vld [vmem:[%s755_s19 + $0x40] sm:$0xff]   ;;  %648 = vmatprep.mubr.msk.bf16.mxu0 %vm275_vm2, %v695_v6  ;;  %v698_v9 = vld [vmem:[%s755_s19 + $0x48] sm:$0xff]   ;;  %v700_v11 = vld [vmem:[%s755_s19 + $0x50] sm:$0xff]  }
  0x12   : > { %664 = vmatprep.mubr.msk.bf16.mxu1 %vm275_vm2, %v696_v7  ;;  %649 = vmatmul.mubr.msk.bf16.vlgmr.msra.gmra.mrb[0].mxu0 %vm275_vm2, %v697_v8  ;;  %v701_v12 = vld [vmem:[%s755_s19 + $0x18] sm:$0xff]   ;;  %v703_v14 = vld [vmem:[%s755_s19 + $0x20] sm:$0xff]   ;;  %v705_v16 = vld [vmem:[%s755_s19 + $0x28] sm:$0xff]  }
  0x13   : > { %665 = vmatmul.mubr.msk.bf16.vlgmr.msra.gmra.mrb[0].mxu1 %vm275_vm2, %v698_v9  ;;  %652 = vmatprep.mubr.msk.bf16.mxu0 %vm275_vm2, %v699_v10  ;;  %v702_v13 = vld [vmem:[%s755_s19 + $0x58] sm:$0xff]   ;;  %v704_v15 = vld [vmem:[%s755_s19 + $0x60] sm:$0xff]   ;;  %v706_v17 = vld [vmem:[%s755_s19 + $0x68] sm:$0xff]  }
  0x14   : > { %668 = vmatprep.mubr.msk.bf16.mxu1 %vm275_vm2, %v700_v11  ;;  %v707_v18 = vld [vmem:[%s755_s19 + $0x30] sm:$0xff]   ;;  %v709_v20 = vld [vmem:[%s755_s19 + $0x38] sm:$0xff]  }
  0x15   : > { %v708_v19 = vld [vmem:[%s755_s19 + $0x70] sm:$0xff]   ;;  %v710_v21 = vld [vmem:[%s755_s19 + $0x78] sm:$0xff]  }
  0x1a   : > { %653 = vmatmul.mubr.msk.bf16.gmra.mrb[4].mxu0 %vm275_vm2, %v701_v12 }
  0x1b   : > { %669 = vmatmul.mubr.msk.bf16.gmra.mrb[4].mxu1 %vm275_vm2, %v702_v13  ;;  %656 = vmatprep.mubr.msk.bf16.mxu0 %vm275_vm2, %v703_v14 }
  0x1c   : > { %672 = vmatprep.mubr.msk.bf16.mxu1 %vm275_vm2, %v704_v15 }
  0x22   : > { %657 = vmatmul.mubr.msk.bf16.gmra.mrb[8].mxu0 %vm275_vm2, %v705_v16 }
  0x23   : > { %673 = vmatmul.mubr.msk.bf16.gmra.mrb[8].mxu1 %vm275_vm2, %v706_v17  ;;  %660 = vmatprep.mubr.msk.bf16.mxu0 %vm275_vm2, %v707_v18 }
  0x24   : > { %676 = vmatprep.mubr.msk.bf16.mxu1 %vm275_vm2, %v708_v19 }
  0x2a   : > { %661 = vmatmul.mubr.msk.bf16.gmra.mrb[12].mxu0 %vm275_vm2, %v709_v20 }
  0x2b   : > { %677 = vmatmul.mubr.msk.bf16.gmra.mrb[12].mxu1 %vm275_vm2, %v710_v21 }
  0xe5   : > { %v650_v22 = vpop.f32.mrb[0].mxu0 }
  0xe6   : > { %495 = vst.msk [vmem:[%s793_s23 + $0x10] sm:$0xff] %vm492_vm3, %v650_v22  ;;  %v666_v23 = vpop.f32.mrb[0].mxu1  ;;  %v365_v24 = vpop.f32.mrb[1].mxu0 }
  0xe7   : > { %511 = vst.msk [vmem:[%s793_s23 + $0x90] sm:$0xff] %vm492_vm3, %v666_v23  ;;  %493 = vst.msk [vmem:[%s793_s23] sm:$0xff] %vm492_vm3, %v365_v24  ;;  %v429_v25 = vpop.f32.mrb[1].mxu1  ;;  %v651_v26 = vpop.f32.mrb[2].mxu0 }
  0xe8   : > { %509 = vst.msk [vmem:[%s793_s23 + $0x80] sm:$0xff] %vm492_vm3, %v429_v25  ;;  %496 = vst.msk [vmem:[%s793_s23 + $0x18] sm:$0xff] %vm492_vm3, %v651_v26  ;;  %v667_v27 = vpop.f32.mrb[2].mxu1  ;;  %v368_v28 = vpop.f32.mrb[3].mxu0 }
  0xe9   : > { %512 = vst.msk [vmem:[%s793_s23 + $0x98] sm:$0xff] %vm492_vm3, %v667_v27  ;;  %494 = vst.msk [vmem:[%s793_s23 + $0x8] sm:$0xff] %vm492_vm3, %v368_v28  ;;  %v432_v29 = vpop.f32.mrb[3].mxu1 }
  0xea   : > { %510 = vst.msk [vmem:[%s793_s23 + $0x88] sm:$0xff] %vm492_vm3, %v432_v29 }
  0xed   : > { %v654_v30 = vpop.f32.mrb[4].mxu0 }
  0xee   : > { %499 = vst.msk [vmem:[%s793_s23 + $0x30] sm:$0xff] %vm492_vm3, %v654_v30  ;;  %v670_v31 = vpop.f32.mrb[4].mxu1  ;;  %v381_v32 = vpop.f32.mrb[5].mxu0 }
  0xef   : > { %515 = vst.msk [vmem:[%s793_s23 + $0xb0] sm:$0xff] %vm492_vm3, %v670_v31  ;;  %497 = vst.msk [vmem:[%s793_s23 + $0x20] sm:$0xff] %vm492_vm3, %v381_v32  ;;  %v445_v33 = vpop.f32.mrb[5].mxu1  ;;  %v655_v34 = vpop.f32.mrb[6].mxu0 }
  0xf0   : > { %513 = vst.msk [vmem:[%s793_s23 + $0xa0] sm:$0xff] %vm492_vm3, %v445_v33  ;;  %500 = vst.msk [vmem:[%s793_s23 + $0x38] sm:$0xff] %vm492_vm3, %v655_v34  ;;  %v671_v35 = vpop.f32.mrb[6].mxu1  ;;  %v384_v36 = vpop.f32.mrb[7].mxu0 }
  0xf1   : > { %516 = vst.msk [vmem:[%s793_s23 + $0xb8] sm:$0xff] %vm492_vm3, %v671_v35  ;;  %498 = vst.msk [vmem:[%s793_s23 + $0x28] sm:$0xff] %vm492_vm3, %v384_v36  ;;  %v448_v37 = vpop.f32.mrb[7].mxu1 }
  0xf2   : > { %514 = vst.msk [vmem:[%s793_s23 + $0xa8] sm:$0xff] %vm492_vm3, %v448_v37 }
  0xf5   : > { %v658_v38 = vpop.f32.mrb[8].mxu0 }
  0xf6   : > { %503 = vst.msk [vmem:[%s793_s23 + $0x50] sm:$0xff] %vm492_vm3, %v658_v38  ;;  %v674_v39 = vpop.f32.mrb[8].mxu1  ;;  %v397_v40 = vpop.f32.mrb[9].mxu0 }
  0xf7   : > { %519 = vst.msk [vmem:[%s793_s23 + $0xd0] sm:$0xff] %vm492_vm3, %v674_v39  ;;  %501 = vst.msk [vmem:[%s793_s23 + $0x40] sm:$0xff] %vm492_vm3, %v397_v40  ;;  %v461_v41 = vpop.f32.mrb[9].mxu1  ;;  %v659_v42 = vpop.f32.mrb[10].mxu0 }
  0xf8   : > { %517 = vst.msk [vmem:[%s793_s23 + $0xc0] sm:$0xff] %vm492_vm3, %v461_v41  ;;  %504 = vst.msk [vmem:[%s793_s23 + $0x58] sm:$0xff] %vm492_vm3, %v659_v42  ;;  %v675_v43 = vpop.f32.mrb[10].mxu1  ;;  %v400_v44 = vpop.f32.mrb[11].mxu0 }
  0xf9   : > { %520 = vst.msk [vmem:[%s793_s23 + $0xd8] sm:$0xff] %vm492_vm3, %v675_v43  ;;  %502 = vst.msk [vmem:[%s793_s23 + $0x48] sm:$0xff] %vm492_vm3, %v400_v44  ;;  %v464_v45 = vpop.f32.mrb[11].mxu1 }
  0xfa   : > { %518 = vst.msk [vmem:[%s793_s23 + $0xc8] sm:$0xff] %vm492_vm3, %v464_v45 }
  0xfd   : > { %v662_v46 = vpop.f32.mrb[12].mxu0 }
  0xfe   : > { %507 = vst.msk [vmem:[%s793_s23 + $0x70] sm:$0xff] %vm492_vm3, %v662_v46  ;;  %v678_v47 = vpop.f32.mrb[12].mxu1  ;;  %v413_v48 = vpop.f32.mrb[13].mxu0 }
  0xff   : > { %523 = vst.msk [vmem:[%s793_s23 + $0xf0] sm:$0xff] %vm492_vm3, %v678_v47  ;;  %505 = vst.msk [vmem:[%s793_s23 + $0x60] sm:$0xff] %vm492_vm3, %v413_v48  ;;  %v477_v49 = vpop.f32.mrb[13].mxu1  ;;  %v663_v50 = vpop.f32.mrb[14].mxu0 }
 0x100   : > { %521 = vst.msk [vmem:[%s793_s23 + $0xe0] sm:$0xff] %vm492_vm3, %v477_v49  ;;  %508 = vst.msk [vmem:[%s793_s23 + $0x78] sm:$0xff] %vm492_vm3, %v663_v50  ;;  %v679_v51 = vpop.f32.mrb[14].mxu1  ;;  %v416_v52 = vpop.f32.mrb[15].mxu0 }
 0x101   : > { %524 = vst.msk [vmem:[%s793_s23 + $0xf8] sm:$0xff] %vm492_vm3, %v679_v51  ;;  %506 = vst.msk [vmem:[%s793_s23 + $0x68] sm:$0xff] %vm492_vm3, %v416_v52  ;;  %v480_v53 = vpop.f32.mrb[15].mxu1 }
 0x102   : > { %522 = vst.msk [vmem:[%s793_s23 + $0xe8] sm:$0xff] %vm492_vm3, %v480_v53 }
 0x103 PF: > { %s12_s9 = sadd.s32 1, %s717_s9  }
 0x104   : > { %p9_p4 = scmp.ge.s32.totalorder %s12_s9, 4  }
 0x106   :  { %11 = sbr.rel (!%p9_p4) target bundleno = 1 (0x1), region = 58 }

// kernel: _lambda_.10
= control target key start
LH: loop header
LB: loop body
LE: loop exit
PB: predicated region body
PF: predicated region fallthrough
CT: control target
= control target key end

     0   :  { %s965_s21 = smov 0   ;;  %s1256_s0 = inlined_call_operand.vmem [shape: f32[512,8], index: 0, kind: input, shape index: {}]   ;;  %s1257_s1 = inlined_call_operand.vmem [shape: f32[1,8], index: 1, kind: input, shape index: {}]   ;;  %s1258_s2 = inlined_call_operand.vmem [shape: f32[1,8], index: 2, kind: input, shape index: {}]   ;;  %s1259_s3 = inlined_call_operand.vmem [shape: bf16[8,16], index: 3, kind: input, shape index: {}]   ;;  %s1260_s4 = inlined_call_operand.vmem [shape: f32[1,16], index: 4, kind: input, shape index: {}]   ;;  %s1261_s5 = inlined_call_operand.vmem [shape: f32[1,16], index: 5, kind: input, shape index: {}]   ;;  %s1262_s6 = inlined_call_operand.vmem [shape: f32[512,16], index: 6, kind: output, shape index: {}]  }
   0x1 LB: > { %s828_s22 = sadd.s32 4294967295, %s928_s21   ;;  %p832_p0 = scmp.ge.s32.totalorder %s928_s21, 1  ;;  %s928_s21 = sphi %s965_s21, %s16_s21  }
   0x2   : > { %p213_p1 = scmp.lt.s32.totalorder %s928_s21, 3 }
   0x4   : > { %p214_p2 = pnand %p832_p0, %p213_p1 }
   0x5   : > { %v414_v0 = vld [vmem:[%s1259_s3] sm:$0xf] (!%p214_p2)  ;;  %vm464_vm0 = vcmask (!%p214_p2), 1043456   ;;  %s833_s25 = sshll.u32 (!%p214_p2), %s828_s22, 5  ;;  %vm415_vm1 = vcmask (!%p214_p2), 64512   ;;  %vm739_vm2 = vcmask (!%p214_p2), 130048  }
   0x6   : > { %217 = sbr.rel (%p214_p2) target bundleno = 274 (0x112), region = 44  ;;  %912 = vmatprep.subr.msk.bf16.mxu0 (!%p214_p2), %vm464_vm0, %v414_v0  ;;  %913 = vmatprep.subr.msk.bf16.mxu1 (!%p214_p2), %vm464_vm0, %v414_v0  ;;  %v466_v1 = vsel (!%p214_p2), %vm464_vm0, %v414_v0, 0  ;;  %p244_p3 = scmp.lt.s32.totalorder (!%p214_p2), %s833_s25, 63  ;;  %v982_v2 = vld [vmem:[%s1257_s1] ss:$0 sm:$0xff] (!%p214_p2) }
   0x7   : > { %877 = vmatpush3.bf16.msra.mxu0 (!%p214_p2), %v466_v1  ;;  %911 = vmatpush3.bf16.msra.mxu1 (!%p214_p2), %v466_v1  ;;  %v994_v3 = vld [vmem:[%s1258_s2] ss:$0 sm:$0xff] (!%p214_p2) }
   0xd   : > { %s1264_s25 = smov (!%p244_p3, %s833_s25), 63 }
   0xe   : > { %s834_s26 = sshll.u32 %s1264_s25, 3 }
   0xf   : > { %s989_s7 = scalar_lea.vmem %s1256_s0, %s834_s26  ;;  %s1128_s16 = scalar_lea.vmem %s1262_s6, %s834_s26 }
  0x10   : > { %v256_v4 = vld [vmem:[%s989_s7] sm:$0xff]  ;;  %v257_v5 = vld [vmem:[%s989_s7 + $0x8] sm:$0xff]  ;;  %v258_v11 = vld [vmem:[%s989_s7 + $0x10] sm:$0xff] }
  0x11   : > { %v272_v6 = vld [vmem:[%s989_s7 + $0x80] sm:$0xff]  ;;  %v295_v7 = vmul.f32 %v982_v2, %v256_v4  ;;  %v296_v8 = vmul.f32 %v982_v2, %v257_v5  ;;  %v273_v9 = vld [vmem:[%s989_s7 + $0x88] sm:$0xff]  ;;  %v259_v12 = vld [vmem:[%s989_s7 + $0x18] sm:$0xff]  ;;  %v297_v14 = vmul.f32 %v982_v2, %v258_v11 }
  0x12   : > { %v311_v10 = vmul.f32 %v982_v2, %v272_v6  ;;  %v312_v13 = vmul.f32 %v982_v2, %v273_v9  ;;  %v298_v15 = vmul.f32 %v982_v2, %v259_v12  ;;  %v274_v16 = vld [vmem:[%s989_s7 + $0x90] sm:$0xff]  ;;  %v275_v17 = vld [vmem:[%s989_s7 + $0x98] sm:$0xff]  ;;  %v260_v26 = vld [vmem:[%s989_s7 + $0x20] sm:$0xff] }
  0x13   : > { %v334_v18 = vadd.f32 %v994_v3, %v295_v7  ;;  %v335_v19 = vadd.f32 %v994_v3, %v296_v8  ;;  %v313_v21 = vmul.f32 %v982_v2, %v274_v16  ;;  %v336_v23 = vadd.f32 %v994_v3, %v297_v14  ;;  %v261_v27 = vld [vmem:[%s989_s7 + $0x28] sm:$0xff]  ;;  %v276_v32 = vld [vmem:[%s989_s7 + $0xa0] sm:$0xff]  ;;  %v262_v38 = vld [vmem:[%s989_s7 + $0x30] sm:$0xff] }
  0x14   : > { %v350_v20 = vadd.f32 %v994_v3, %v311_v10  ;;  %v351_v22 = vadd.f32 %v994_v3, %v312_v13  ;;  %v337_v24 = vadd.f32 %v994_v3, %v298_v15  ;;  %v314_v25 = vmul.f32 %v982_v2, %v275_v17  ;;  %v277_v37 = vld [vmem:[%s989_s7 + $0xa8] sm:$0xff]  ;;  %v263_v43 = vld [vmem:[%s989_s7 + $0x38] sm:$0xff]  ;;  %v278_v52 = vld [vmem:[%s989_s7 + $0xb0] sm:$0xff] }
  0x15   : > { %v366_v28 = vmax.f32 %v334_v18, 0.0  ;;  %v367_v29 = vmax.f32 %v335_v19, 0.0  ;;  %v352_v31 = vadd.f32 %v994_v3, %v313_v21  ;;  %v368_v34 = vmax.f32 %v336_v23, 0.0  ;;  %v279_v53 = vld [vmem:[%s989_s7 + $0xb8] sm:$0xff]  ;;  %v264_v57 = vld [vmem:[%s989_s7 + $0x40] sm:$0xff]  ;;  %v265_v62 = vld [vmem:[%s989_s7 + $0x48] sm:$0xff] }
  0x16   : > { %v382_v30 = vmax.f32 %v350_v20, 0.0  ;;  %v383_v33 = vmax.f32 %v351_v22, 0.0  ;;  %v369_v35 = vmax.f32 %v337_v24, 0.0  ;;  %v353_v36 = vadd.f32 %v994_v3, %v314_v25  ;;  %v280_v5 = vld [vmem:[%s989_s7 + $0xc0] sm:$0xff]  ;;  %v281_v6 = vld [vmem:[%s989_s7 + $0xc8] sm:$0xff]  ;;  %v266_v15 = vld [vmem:[%s989_s7 + $0x50] sm:$0xff] }
  0x17   : > { %v398_v39 = vpack.c.bf16 %v367_v29, %v366_v28  ;;  %v384_v40 = vmax.f32 %v352_v31, 0.0  ;;  %v299_v41 = vmul.f32 %v982_v2, %v260_v26  ;;  %v300_v42 = vmul.f32 %v982_v2, %v261_v27  ;;  %v267_v20 = vld [vmem:[%s989_s7 + $0x58] sm:$0xff]  ;;  %v282_v21 = vld [vmem:[%s989_s7 + $0xd0] sm:$0xff]  ;;  %v268_v31 = vld [vmem:[%s989_s7 + $0x60] sm:$0xff] }
  0x18   : > { %v406_v44 = vpack.c.bf16 %v383_v33, %v382_v30  ;;  %v399_v45 = vpack.c.bf16 %v369_v35, %v368_v34  ;;  %v385_v46 = vmax.f32 %v353_v36, 0.0  ;;  %v315_v47 = vmul.f32 %v982_v2, %v276_v32  ;;  %v283_v26 = vld [vmem:[%s989_s7 + $0xd8] sm:$0xff]  ;;  %v269_v36 = vld [vmem:[%s989_s7 + $0x68] sm:$0xff] }
  0x19   : > { %878 = vmatprep.mubr.msk.bf16.mxu0 %vm415_vm1, %v398_v39  ;;  %v338_v48 = vadd.f32 %v994_v3, %v299_v41  ;;  %v339_v49 = vadd.f32 %v994_v3, %v300_v42  ;;  %v316_v50 = vmul.f32 %v982_v2, %v277_v37  ;;  %v301_v51 = vmul.f32 %v982_v2, %v262_v38  ;;  %v284_v41 = vld [vmem:[%s989_s7 + $0xe0] sm:$0xff] }
  0x1a   : > { %894 = vmatprep.mubr.msk.bf16.mxu1 %vm415_vm1, %v406_v44  ;;  %879 = vmatmul.mubr.msk.bf16.vlgmr.msra.gmra.mrb[0].mxu0 %vm415_vm1, %v399_v45  ;;  %v407_v54 = vpack.c.bf16 %v385_v46, %v384_v40  ;;  %v354_v55 = vadd.f32 %v994_v3, %v315_v47  ;;  %v302_v56 = vmul.f32 %v982_v2, %v263_v43  ;;  %v285_v46 = vld [vmem:[%s989_s7 + $0xe8] sm:$0xff]  ;;  %v270_v47 = vld [vmem:[%s989_s7 + $0x70] sm:$0xff] }
  0x1b   : > { %v370_v58 = vmax.f32 %v338_v48, 0.0  ;;  %v371_v59 = vmax.f32 %v339_v49, 0.0  ;;  %v355_v60 = vadd.f32 %v994_v3, %v316_v50  ;;  %v340_v61 = vadd.f32 %v994_v3, %v301_v51 }
  0x1c   : > { %895 = vmatmul.mubr.msk.bf16.vlgmr.msra.gmra.mrb[0].mxu1 %vm415_vm1, %v407_v54  ;;  %v386_v63 = vmax.f32 %v354_v55, 0.0  ;;  %v341_v0 = vadd.f32 %v994_v3, %v302_v56  ;;  %v317_v1 = vmul.f32 %v982_v2, %v278_v52  ;;  %v318_v4 = vmul.f32 %v982_v2, %v279_v53  ;;  %v271_v52 = vld [vmem:[%s989_s7 + $0x78] sm:$0xff] }
  0x1d   : > { %v400_v7 = vpack.c.bf16 %v371_v59, %v370_v58  ;;  %v387_v8 = vmax.f32 %v355_v60, 0.0  ;;  %v372_v9 = vmax.f32 %v340_v61, 0.0  ;;  %v303_v10 = vmul.f32 %v982_v2, %v264_v57  ;;  %v286_v61 = vld [vmem:[%s989_s7 + $0xf0] sm:$0xff] }
  0x1e   : > { %v373_v11 = vmax.f32 %v341_v0, 0.0  ;;  %v356_v12 = vadd.f32 %v994_v3, %v317_v1  ;;  %v357_v13 = vadd.f32 %v994_v3, %v318_v4  ;;  %v304_v14 = vmul.f32 %v982_v2, %v265_v62  ;;  %v287_v62 = vld [vmem:[%s989_s7 + $0xf8] sm:$0xff] }
  0x1f   : > { %882 = vmatprep.mubr.msk.bf16.mxu0 %vm415_vm1, %v400_v7  ;;  %v408_v16 = vpack.c.bf16 %v387_v8, %v386_v63  ;;  %v342_v17 = vadd.f32 %v994_v3, %v303_v10  ;;  %v319_v18 = vmul.f32 %v982_v2, %v280_v5  ;;  %v320_v19 = vmul.f32 %v982_v2, %v281_v6 }
  0x20   : > { %v401_v22 = vpack.c.bf16 %v373_v11, %v372_v9  ;;  %v388_v23 = vmax.f32 %v356_v12, 0.0  ;;  %v389_v24 = vmax.f32 %v357_v13, 0.0  ;;  %v343_v25 = vadd.f32 %v994_v3, %v304_v14 }
  0x21   : > { %898 = vmatprep.mubr.msk.bf16.mxu1 %vm415_vm1, %v408_v16  ;;  %v374_v27 = vmax.f32 %v342_v17, 0.0  ;;  %v358_v28 = vadd.f32 %v994_v3, %v319_v18  ;;  %v359_v29 = vadd.f32 %v994_v3, %v320_v19  ;;  %v305_v30 = vmul.f32 %v982_v2, %v266_v15 }
  0x22   : > { %883 = vmatmul.mubr.msk.bf16.gmra.mrb[4].mxu0 %vm415_vm1, %v401_v22  ;;  %v409_v32 = vpack.c.bf16 %v389_v24, %v388_v23  ;;  %v375_v33 = vmax.f32 %v343_v25, 0.0  ;;  %v306_v34 = vmul.f32 %v982_v2, %v267_v20  ;;  %v321_v35 = vmul.f32 %v982_v2, %v282_v21  ;;  %v1116_v24 = vld [vmem:[%s1261_s5] ss:$0 sm:$0xff] }
  0x23   : > { %v390_v37 = vmax.f32 %v358_v28, 0.0  ;;  %v391_v38 = vmax.f32 %v359_v29, 0.0  ;;  %v344_v39 = vadd.f32 %v994_v3, %v305_v30  ;;  %v322_v40 = vmul.f32 %v982_v2, %v283_v26 }
  0x24   : > { %899 = vmatmul.mubr.msk.bf16.gmra.mrb[4].mxu1 %vm415_vm1, %v409_v32  ;;  %v402_v42 = vpack.c.bf16 %v375_v33, %v374_v27  ;;  %v345_v43 = vadd.f32 %v994_v3, %v306_v34  ;;  %v360_v44 = vadd.f32 %v994_v3, %v321_v35  ;;  %v307_v45 = vmul.f32 %v982_v2, %v268_v31 }
  0x25   : > { %v410_v48 = vpack.c.bf16 %v391_v38, %v390_v37  ;;  %v376_v49 = vmax.f32 %v344_v39, 0.0  ;;  %v361_v50 = vadd.f32 %v994_v3, %v322_v40  ;;  %v308_v51 = vmul.f32 %v982_v2, %v269_v36 }
  0x26   : > { %886 = vmatprep.mubr.msk.bf16.mxu0 %vm415_vm1, %v402_v42  ;;  %v377_v53 = vmax.f32 %v345_v43, 0.0  ;;  %v392_v54 = vmax.f32 %v360_v44, 0.0  ;;  %v346_v55 = vadd.f32 %v994_v3, %v307_v45  ;;  %v323_v56 = vmul.f32 %v982_v2, %v284_v41 }
  0x27   : > { %902 = vmatprep.mubr.msk.bf16.mxu1 %vm415_vm1, %v410_v48  ;;  %v393_v57 = vmax.f32 %v361_v50, 0.0  ;;  %v347_v58 = vadd.f32 %v994_v3, %v308_v51  ;;  %v324_v59 = vmul.f32 %v982_v2, %v285_v46  ;;  %v309_v60 = vmul.f32 %v982_v2, %v270_v47 }
  0x28   : > { %v403_v63 = vpack.c.bf16 %v377_v53, %v376_v49  ;;  %v378_v0 = vmax.f32 %v346_v55, 0.0  ;;  %v362_v1 = vadd.f32 %v994_v3, %v323_v56  ;;  %v310_v4 = vmul.f32 %v982_v2, %v271_v52 }
  0x29   : > { %v411_v5 = vpack.c.bf16 %v393_v57, %v392_v54  ;;  %v379_v6 = vmax.f32 %v347_v58, 0.0  ;;  %v363_v7 = vadd.f32 %v994_v3, %v324_v59  ;;  %v348_v8 = vadd.f32 %v994_v3, %v309_v60 }
  0x2a   : > { %887 = vmatmul.mubr.msk.bf16.gmra.mrb[8].mxu0 %vm415_vm1, %v403_v63  ;;  %v394_v9 = vmax.f32 %v362_v1, 0.0  ;;  %v349_v10 = vadd.f32 %v994_v3, %v310_v4  ;;  %v325_v11 = vmul.f32 %v982_v2, %v286_v61  ;;  %v326_v12 = vmul.f32 %v982_v2, %v287_v62  ;;  %v1111_v2 = vld [vmem:[%s1260_s4] ss:$0 sm:$0xff] }
  0x2b   : > { %v404_v13 = vpack.c.bf16 %v379_v6, %v378_v0  ;;  %v395_v14 = vmax.f32 %v363_v7, 0.0  ;;  %v380_v15 = vmax.f32 %v348_v8, 0.0 }
  0x2c   : > { %903 = vmatmul.mubr.msk.bf16.gmra.mrb[8].mxu1 %vm415_vm1, %v411_v5  ;;  %v381_v16 = vmax.f32 %v349_v10, 0.0  ;;  %v364_v17 = vadd.f32 %v994_v3, %v325_v11  ;;  %v365_v18 = vadd.f32 %v994_v3, %v326_v12 }
  0x2d   : > { %890 = vmatprep.mubr.msk.bf16.mxu0 %vm415_vm1, %v404_v13  ;;  %v412_v19 = vpack.c.bf16 %v395_v14, %v394_v9 }
  0x2e   : > { %v405_v20 = vpack.c.bf16 %v381_v16, %v380_v15  ;;  %v396_v21 = vmax.f32 %v364_v17, 0.0  ;;  %v397_v22 = vmax.f32 %v365_v18, 0.0 }
  0x2f   : > { %906 = vmatprep.mubr.msk.bf16.mxu1 %vm415_vm1, %v412_v19 }
  0x30   : > { %v413_v23 = vpack.c.bf16 %v397_v22, %v396_v21 }
  0x32   : > { %891 = vmatmul.mubr.msk.bf16.gmra.mrb[12].mxu0 %vm415_vm1, %v405_v20 }
  0x34   : > { %907 = vmatmul.mubr.msk.bf16.gmra.mrb[12].mxu1 %vm415_vm1, %v413_v23 }
  0xed   : > { %v880_v3 = vpop.f32.mrb[0].mxu0 }
  0xee   : > { %v638_v25 = vmul.f32 %v880_v3, %v1111_v2  ;;  %v502_v26 = vpop.f32.mrb[1].mxu0 }
  0xef   : > { %v896_v27 = vpop.f32.mrb[0].mxu1  ;;  %v636_v28 = vmul.f32 %v1111_v2, %v502_v26  ;;  %v881_v29 = vpop.f32.mrb[2].mxu0 }
  0xf0   : > { %v677_v30 = vadd.f32 %v1116_v24, %v638_v25  ;;  %v654_v31 = vmul.f32 %v896_v27, %v1111_v2  ;;  %v566_v32 = vpop.f32.mrb[1].mxu1  ;;  %v639_v33 = vmul.f32 %v881_v29, %v1111_v2  ;;  %v505_v34 = vpop.f32.mrb[3].mxu0 }
  0xf1   : > { %v675_v35 = vadd.f32 %v1116_v24, %v636_v28  ;;  %v652_v36 = vmul.f32 %v1111_v2, %v566_v32  ;;  %v897_v37 = vpop.f32.mrb[2].mxu1  ;;  %v637_v38 = vmul.f32 %v1111_v2, %v505_v34 }
  0xf2   : > { %v709_v39 = vmax.f32 %v677_v30, 0.0  ;;  %v693_v40 = vadd.f32 %v1116_v24, %v654_v31  ;;  %v678_v41 = vadd.f32 %v1116_v24, %v639_v33  ;;  %v655_v42 = vmul.f32 %v897_v37, %v1111_v2  ;;  %v569_v43 = vpop.f32.mrb[3].mxu1 }
  0xf3   : > { %v707_v44 = vmax.f32 %v675_v35, 0.0  ;;  %v691_v45 = vadd.f32 %v1116_v24, %v652_v36  ;;  %v676_v46 = vadd.f32 %v1116_v24, %v637_v38  ;;  %v653_v47 = vmul.f32 %v1111_v2, %v569_v43 }
  0xf4   : > { %742 = vst.msk [vmem:[%s1128_s16 + $0x10] sm:$0xff] %vm739_vm2, %v709_v39  ;;  %v725_v48 = vmax.f32 %v693_v40, 0.0  ;;  %v710_v49 = vmax.f32 %v678_v41, 0.0  ;;  %v694_v50 = vadd.f32 %v1116_v24, %v655_v42 }
  0xf5   : > { %740 = vst.msk [vmem:[%s1128_s16] sm:$0xff] %vm739_vm2, %v707_v44  ;;  %v723_v51 = vmax.f32 %v691_v45, 0.0  ;;  %v708_v52 = vmax.f32 %v676_v46, 0.0  ;;  %v692_v53 = vadd.f32 %v1116_v24, %v653_v47  ;;  %v884_v54 = vpop.f32.mrb[4].mxu0 }
  0xf6   : > { %758 = vst.msk [vmem:[%s1128_s16 + $0x90] sm:$0xff] %vm739_vm2, %v725_v48  ;;  %743 = vst.msk [vmem:[%s1128_s16 + $0x18] sm:$0xff] %vm739_vm2, %v710_v49  ;;  %v726_v55 = vmax.f32 %v694_v50, 0.0  ;;  %v642_v56 = vmul.f32 %v884_v54, %v1111_v2  ;;  %v518_v57 = vpop.f32.mrb[5].mxu0 }
  0xf7   : > { %756 = vst.msk [vmem:[%s1128_s16 + $0x80] sm:$0xff] %vm739_vm2, %v723_v51  ;;  %741 = vst.msk [vmem:[%s1128_s16 + $0x8] sm:$0xff] %vm739_vm2, %v708_v52  ;;  %v724_v58 = vmax.f32 %v692_v53, 0.0  ;;  %v900_v59 = vpop.f32.mrb[4].mxu1  ;;  %v640_v60 = vmul.f32 %v1111_v2, %v518_v57  ;;  %v885_v61 = vpop.f32.mrb[6].mxu0 }
  0xf8   : > { %759 = vst.msk [vmem:[%s1128_s16 + $0x98] sm:$0xff] %vm739_vm2, %v726_v55  ;;  %v681_v62 = vadd.f32 %v1116_v24, %v642_v56  ;;  %v658_v63 = vmul.f32 %v900_v59, %v1111_v2  ;;  %v582_v0 = vpop.f32.mrb[5].mxu1  ;;  %v643_v1 = vmul.f32 %v885_v61, %v1111_v2  ;;  %v521_v4 = vpop.f32.mrb[7].mxu0 }
  0xf9   : > { %757 = vst.msk [vmem:[%s1128_s16 + $0x88] sm:$0xff] %vm739_vm2, %v724_v58  ;;  %v679_v5 = vadd.f32 %v1116_v24, %v640_v60  ;;  %v656_v6 = vmul.f32 %v1111_v2, %v582_v0  ;;  %v901_v7 = vpop.f32.mrb[6].mxu1  ;;  %v641_v8 = vmul.f32 %v1111_v2, %v521_v4 }
  0xfa   : > { %v713_v9 = vmax.f32 %v681_v62, 0.0  ;;  %v697_v10 = vadd.f32 %v1116_v24, %v658_v63  ;;  %v682_v11 = vadd.f32 %v1116_v24, %v643_v1  ;;  %v659_v12 = vmul.f32 %v901_v7, %v1111_v2  ;;  %v585_v13 = vpop.f32.mrb[7].mxu1 }
  0xfb   : > { %v711_v14 = vmax.f32 %v679_v5, 0.0  ;;  %v695_v15 = vadd.f32 %v1116_v24, %v656_v6  ;;  %v680_v16 = vadd.f32 %v1116_v24, %v641_v8  ;;  %v657_v17 = vmul.f32 %v1111_v2, %v585_v13 }
  0xfc   : > { %746 = vst.msk [vmem:[%s1128_s16 + $0x30] sm:$0xff] %vm739_vm2, %v713_v9  ;;  %v729_v18 = vmax.f32 %v697_v10, 0.0  ;;  %v714_v19 = vmax.f32 %v682_v11, 0.0  ;;  %v698_v20 = vadd.f32 %v1116_v24, %v659_v12 }
  0xfd   : > { %744 = vst.msk [vmem:[%s1128_s16 + $0x20] sm:$0xff] %vm739_vm2, %v711_v14  ;;  %v727_v21 = vmax.f32 %v695_v15, 0.0  ;;  %v712_v22 = vmax.f32 %v680_v16, 0.0  ;;  %v696_v23 = vadd.f32 %v1116_v24, %v657_v17  ;;  %v888_v3 = vpop.f32.mrb[8].mxu0 }
  0xfe   : > { %762 = vst.msk [vmem:[%s1128_s16 + $0xb0] sm:$0xff] %vm739_vm2, %v729_v18  ;;  %747 = vst.msk [vmem:[%s1128_s16 + $0x38] sm:$0xff] %vm739_vm2, %v714_v19  ;;  %v730_v25 = vmax.f32 %v698_v20, 0.0  ;;  %v646_v26 = vmul.f32 %v888_v3, %v1111_v2  ;;  %v534_v27 = vpop.f32.mrb[9].mxu0 }
  0xff   : > { %760 = vst.msk [vmem:[%s1128_s16 + $0xa0] sm:$0xff] %vm739_vm2, %v727_v21  ;;  %745 = vst.msk [vmem:[%s1128_s16 + $0x28] sm:$0xff] %vm739_vm2, %v712_v22  ;;  %v728_v28 = vmax.f32 %v696_v23, 0.0  ;;  %v904_v29 = vpop.f32.mrb[8].mxu1  ;;  %v644_v30 = vmul.f32 %v1111_v2, %v534_v27  ;;  %v889_v31 = vpop.f32.mrb[10].mxu0 }
 0x100   : > { %763 = vst.msk [vmem:[%s1128_s16 + $0xb8] sm:$0xff] %vm739_vm2, %v730_v25  ;;  %v685_v32 = vadd.f32 %v1116_v24, %v646_v26  ;;  %v662_v33 = vmul.f32 %v904_v29, %v1111_v2  ;;  %v598_v34 = vpop.f32.mrb[9].mxu1  ;;  %v647_v35 = vmul.f32 %v889_v31, %v1111_v2  ;;  %v537_v36 = vpop.f32.mrb[11].mxu0 }
 0x101   : > { %761 = vst.msk [vmem:[%s1128_s16 + $0xa8] sm:$0xff] %vm739_vm2, %v728_v28  ;;  %v683_v37 = vadd.f32 %v1116_v24, %v644_v30  ;;  %v660_v38 = vmul.f32 %v1111_v2, %v598_v34  ;;  %v905_v39 = vpop.f32.mrb[10].mxu1  ;;  %v645_v40 = vmul.f32 %v1111_v2, %v537_v36 }
 0x102   : > { %v717_v41 = vmax.f32 %v685_v32, 0.0  ;;  %v701_v42 = vadd.f32 %v1116_v24, %v662_v33  ;;  %v686_v43 = vadd.f32 %v1116_v24, %v647_v35  ;;  %v663_v44 = vmul.f32 %v905_v39, %v1111_v2  ;;  %v601_v45 = vpop.f32.mrb[11].mxu1 }
 0x103   : > { %v715_v46 = vmax.f32 %v683_v37, 0.0  ;;  %v699_v47 = vadd.f32 %v1116_v24, %v660_v38  ;;  %v684_v48 = vadd.f32 %v1116_v24, %v645_v40  ;;  %v661_v49 = vmul.f32 %v1111_v2, %v601_v45 }
 0x104   : > { %750 = vst.msk [vmem:[%s1128_s16 + $0x50] sm:$0xff] %vm739_vm2, %v717_v41  ;;  %v733_v50 = vmax.f32 %v701_v42, 0.0  ;;  %v718_v51 = vmax.f32 %v686_v43, 0.0  ;;  %v702_v52 = vadd.f32 %v1116_v24, %v663_v44 }
 0x105   : > { %748 = vst.msk [vmem:[%s1128_s16 + $0x40] sm:$0xff] %vm739_vm2, %v715_v46  ;;  %v731_v53 = vmax.f32 %v699_v47, 0.0  ;;  %v716_v54 = vmax.f32 %v684_v48, 0.0  ;;  %v700_v55 = vadd.f32 %v1116_v24, %v661_v49  ;;  %v892_v56 = vpop.f32.mrb[12].mxu0 }
 0x106   : > { %766 = vst.msk [vmem:[%s1128_s16 + $0xd0] sm:$0xff] %vm739_vm2, %v733_v50  ;;  %751 = vst.msk [vmem:[%s1128_s16 + $0x58] sm:$0xff] %vm739_vm2, %v718_v51  ;;  %v734_v57 = vmax.f32 %v702_v52, 0.0  ;;  %v650_v58 = vmul.f32 %v892_v56, %v1111_v2  ;;  %v550_v59 = vpop.f32.mrb[13].mxu0 }
 0x107   : > { %764 = vst.msk [vmem:[%s1128_s16 + $0xc0] sm:$0xff] %vm739_vm2, %v731_v53  ;;  %749 = vst.msk [vmem:[%s1128_s16 + $0x48] sm:$0xff] %vm739_vm2, %v716_v54  ;;  %v732_v60 = vmax.f32 %v700_v55, 0.0  ;;  %v908_v61 = vpop.f32.mrb[12].mxu1  ;;  %v648_v62 = vmul.f32 %v1111_v2, %v550_v59  ;;  %v893_v63 = vpop.f32.mrb[14].mxu0 }
 0x108   : > { %767 = vst.msk [vmem:[%s1128_s16 + $0xd8] sm:$0xff] %vm739_vm2, %v734_v57  ;;  %v689_v0 = vadd.f32 %v1116_v24, %v650_v58  ;;  %v666_v1 = vmul.f32 %v908_v61, %v1111_v2  ;;  %v614_v4 = vpop.f32.mrb[13].mxu1  ;;  %v651_v5 = vmul.f32 %v893_v63, %v1111_v2  ;;  %v553_v6 = vpop.f32.mrb[15].mxu0 }
 0x109   : > { %765 = vst.msk [vmem:[%s1128_s16 + $0xc8] sm:$0xff] %vm739_vm2, %v732_v60  ;;  %v687_v7 = vadd.f32 %v1116_v24, %v648_v62  ;;  %v664_v8 = vmul.f32 %v1111_v2, %v614_v4  ;;  %v909_v9 = vpop.f32.mrb[14].mxu1  ;;  %v649_v10 = vmul.f32 %v1111_v2, %v553_v6 }
 0x10a   : > { %v721_v11 = vmax.f32 %v689_v0, 0.0  ;;  %v705_v12 = vadd.f32 %v1116_v24, %v666_v1  ;;  %v690_v13 = vadd.f32 %v1116_v24, %v651_v5  ;;  %v667_v14 = vmul.f32 %v909_v9, %v1111_v2  ;;  %v617_v15 = vpop.f32.mrb[15].mxu1 }
 0x10b   : > { %v719_v16 = vmax.f32 %v687_v7, 0.0  ;;  %v703_v17 = vadd.f32 %v1116_v24, %v664_v8  ;;  %v688_v18 = vadd.f32 %v1116_v24, %v649_v10  ;;  %v665_v19 = vmul.f32 %v1111_v2, %v617_v15 }
 0x10c   : > { %754 = vst.msk [vmem:[%s1128_s16 + $0x70] sm:$0xff] %vm739_vm2, %v721_v11  ;;  %v737_v20 = vmax.f32 %v705_v12, 0.0  ;;  %v722_v21 = vmax.f32 %v690_v13, 0.0  ;;  %v706_v22 = vadd.f32 %v1116_v24, %v667_v14 }
 0x10d   : > { %752 = vst.msk [vmem:[%s1128_s16 + $0x60] sm:$0xff] %vm739_vm2, %v719_v16  ;;  %v735_v23 = vmax.f32 %v703_v17, 0.0  ;;  %v720_v3 = vmax.f32 %v688_v18, 0.0  ;;  %v704_v25 = vadd.f32 %v1116_v24, %v665_v19 }
 0x10e   : > { %770 = vst.msk [vmem:[%s1128_s16 + $0xf0] sm:$0xff] %vm739_vm2, %v737_v20  ;;  %755 = vst.msk [vmem:[%s1128_s16 + $0x78] sm:$0xff] %vm739_vm2, %v722_v21  ;;  %v738_v26 = vmax.f32 %v706_v22, 0.0 }
 0x10f   : > { %768 = vst.msk [vmem:[%s1128_s16 + $0xe0] sm:$0xff] %vm739_vm2, %v735_v23  ;;  %753 = vst.msk [vmem:[%s1128_s16 + $0x68] sm:$0xff] %vm739_vm2, %v720_v3  ;;  %v736_v2 = vmax.f32 %v704_v25, 0.0 }
 0x110   : > { %771 = vst.msk [vmem:[%s1128_s16 + $0xf8] sm:$0xff] %vm739_vm2, %v738_v26 }
 0x111   : > { %769 = vst.msk [vmem:[%s1128_s16 + $0xe8] sm:$0xff] %vm739_vm2, %v736_v2 }
 0x112 PF: > { %s16_s21 = sadd.s32 1, %s928_s21  }
 0x113   : > { %p13_p4 = scmp.ge.s32.totalorder %s16_s21, 4  }
 0x115   :  { %15 = sbr.rel (!%p13_p4) target bundleno = 1 (0x1), region = 74 }

// kernel: _lambda_.11
= control target key start
LH: loop header
LB: loop body
LE: loop exit
PB: predicated region body
PF: predicated region fallthrough
CT: control target
= control target key end

     0   :  { %s876_s9 = smov 0   ;;  %s1043_s0 = inlined_call_operand.vmem [shape: bf16[512,144], index: 0, kind: input, shape index: {}]   ;;  %s1044_s1 = inlined_call_operand.vmem [shape: bf16[144,4], index: 1, kind: input, shape index: {}]   ;;  %s1045_s2 = inlined_call_operand.vmem [shape: f32[512,4], index: 2, kind: output, shape index: {}]  }
   0x1 LB: > { %s698_s10 = sadd.s32 4294967295, %s858_s9   ;;  %p702_p0 = scmp.ge.s32.totalorder %s858_s9, 1  ;;  %s858_s9 = sphi %s876_s9, %s12_s9  }
   0x2   : > { %p114_p1 = scmp.lt.s32.totalorder %s858_s9, 3 }
   0x4   : > { %p115_p2 = pnand %p702_p0, %p114_p1 }
   0x5   : > { %v795_v0 = vld [vmem:[%s1044_s1] sm:$0xff] (!%p115_p2)   ;;  %v860_v1 = vmov (!%p115_p2), 0   ;;  %s703_s13 = sshll.u32 (!%p115_p2), %s698_s10, 5  ;;  %v796_v2 = vld [vmem:[%s1044_s1 + $0x8] sm:$0xff] (!%p115_p2)   ;;  %v797_v3 = vld [vmem:[%s1044_s1 + $0x10] sm:$0xff] (!%p115_p2)   ;;  %vm399_vm0 = vcmask (!%p115_p2), 130048  }
   0x6   : > { %118 = sbr.rel (%p115_p2) target bundleno = 313 (0x139), region = 28  ;;  %448 = vmatprep.subr.bf16.mxu0 (!%p115_p2), %v860_v1  ;;  %768 = vmatprep.subr.bf16.mxu1 (!%p115_p2), %v860_v1  ;;  %p138_p3 = scmp.lt.s32.totalorder (!%p115_p2), %s703_s13, 63  ;;  %v798_v4 = vld [vmem:[%s1044_s1 + $0x18] sm:$0xff] (!%p115_p2)   ;;  %v799_v7 = vld [vmem:[%s1044_s1 + $0x20] sm:$0xff] (!%p115_p2)   ;;  %v800_v8 = vld [vmem:[%s1044_s1 + $0x28] sm:$0xff] (!%p115_p2)   ;;  %vm609_vm1 = vcmask (!%p115_p2), 31744  }
   0x7   : > { %449 = vmatpush1.bf16.msra.mxu0 (!%p115_p2), %v795_v0  ;;  %777 = vmatpush1.bf16.msra.mxu1 (!%p115_p2), %v795_v0  ;;  %v801_v9 = vld [vmem:[%s1044_s1 + $0x30] sm:$0xff] (!%p115_p2)   ;;  %v802_v10 = vld [vmem:[%s1044_s1 + $0x38] sm:$0xff] (!%p115_p2)   ;;  %v803_v11 = vld [vmem:[%s1044_s1 + $0x40] sm:$0xff] (!%p115_p2)  }
   0x8   : > { %450 = vmatprep.subr.bf16.mxu0 (!%p115_p2), %v860_v1  ;;  %769 = vmatprep.subr.bf16.mxu1 (!%p115_p2), %v860_v1 }
   0xb   : > { %451 = vmatpush1.bf16.msra.mxu0 (!%p115_p2), %v796_v2  ;;  %778 = vmatpush1.bf16.msra.mxu1 (!%p115_p2), %v796_v2 }
   0xc   : > { %452 = vmatprep.subr.bf16.mxu0 (!%p115_p2), %v860_v1  ;;  %770 = vmatprep.subr.bf16.mxu1 (!%p115_p2), %v860_v1 }
   0xd   : > { %s1047_s13 = smov (!%p138_p3, %s703_s13), 63 }
   0xe   : > { %s767_s18 = sshll.u32 %s1047_s13, 3 }
   0xf   : > { %s901_s21 = scalar_lea.vmem %s1043_s0, %s767_s18  ;;  %453 = vmatpush1.bf16.msra.mxu0 %v797_v3  ;;  %779 = vmatpush1.bf16.msra.mxu1 %v797_v3  ;;  %s974_s8 = scalar_lea.vmem %s1045_s2, %s767_s18 }
  0x10   : > { %v806_v5 = vld [vmem:[%s901_s21 + $0x4] ss:$8 sps:$4 sm:$0xff]   ;;  %454 = vmatprep.subr.bf16.mxu0 %v860_v1  ;;  %771 = vmatprep.subr.bf16.mxu1 %v860_v1  ;;  %v804_v12 = vld [vmem:[%s901_s21] ss:$8 sps:$4 sm:$0xff]   ;;  %v810_v14 = vld [vmem:[%s901_s21 + $0x14] ss:$8 sps:$4 sm:$0xff]  }
  0x11   : > { %v809_v6 = vld [vmem:[%s901_s21 + $0x84] ss:$8 sps:$4 sm:$0xff]   ;;  %749 = vmatprep.mubr.msk.bf16.mxu0 %vm399_vm0, %v806_v5  ;;  %v807_v13 = vld [vmem:[%s901_s21 + $0x80] ss:$8 sps:$4 sm:$0xff]   ;;  %v812_v15 = vld [vmem:[%s901_s21 + $0x94] ss:$8 sps:$4 sm:$0xff]  }
  0x12   : > { %757 = vmatprep.mubr.msk.bf16.mxu1 %vm399_vm0, %v809_v6  ;;  %v814_v16 = vld [vmem:[%s901_s21 + $0x10] ss:$8 sps:$4 sm:$0xff]   ;;  %v816_v18 = vld [vmem:[%s901_s21 + $0x24] ss:$8 sps:$4 sm:$0xff]   ;;  %v820_v20 = vld [vmem:[%s901_s21 + $0x20] ss:$8 sps:$4 sm:$0xff]  }
  0x13   : > { %455 = vmatpush1.bf16.msra.mxu0 %v798_v4  ;;  %780 = vmatpush1.bf16.msra.mxu1 %v798_v4  ;;  %v815_v17 = vld [vmem:[%s901_s21 + $0x90] ss:$8 sps:$4 sm:$0xff]   ;;  %v818_v19 = vld [vmem:[%s901_s21 + $0xa4] ss:$8 sps:$4 sm:$0xff]   ;;  %v821_v21 = vld [vmem:[%s901_s21 + $0xa0] ss:$8 sps:$4 sm:$0xff]  }
  0x14   : > { %456 = vmatprep.subr.bf16.mxu0 %v860_v1  ;;  %772 = vmatprep.subr.bf16.mxu1 %v860_v1  ;;  %v822_v22 = vld [vmem:[%s901_s21 + $0x34] ss:$8 sps:$4 sm:$0xff]   ;;  %v826_v24 = vld [vmem:[%s901_s21 + $0x30] ss:$8 sps:$4 sm:$0xff]   ;;  %v828_v26 = vld [vmem:[%s901_s21 + $0x44] ss:$8 sps:$4 sm:$0xff]  }
  0x15   : > { %v824_v23 = vld [vmem:[%s901_s21 + $0xb4] ss:$8 sps:$4 sm:$0xff]   ;;  %v827_v25 = vld [vmem:[%s901_s21 + $0xb0] ss:$8 sps:$4 sm:$0xff]   ;;  %v830_v27 = vld [vmem:[%s901_s21 + $0xc4] ss:$8 sps:$4 sm:$0xff]  }
  0x16   : > { %v832_v28 = vld [vmem:[%s901_s21 + $0x40] ss:$8 sps:$4 sm:$0xff]   ;;  %v834_v30 = vld [vmem:[%s901_s21 + $0x54] ss:$8 sps:$4 sm:$0xff]   ;;  %v838_v32 = vld [vmem:[%s901_s21 + $0x50] ss:$8 sps:$4 sm:$0xff]  }
  0x17   : > { %457 = vmatpush1.bf16.msra.mxu0 %v799_v7  ;;  %781 = vmatpush1.bf16.msra.mxu1 %v799_v7  ;;  %v833_v29 = vld [vmem:[%s901_s21 + $0xc0] ss:$8 sps:$4 sm:$0xff]   ;;  %v836_v31 = vld [vmem:[%s901_s21 + $0xd4] ss:$8 sps:$4 sm:$0xff]   ;;  %v839_v33 = vld [vmem:[%s901_s21 + $0xd0] ss:$8 sps:$4 sm:$0xff]  }
  0x18   : > { %458 = vmatprep.subr.bf16.mxu0 %v860_v1  ;;  %773 = vmatprep.subr.bf16.mxu1 %v860_v1  ;;  %v840_v34 = vld [vmem:[%s901_s21 + $0x64] ss:$8 sps:$4 sm:$0xff]   ;;  %v844_v36 = vld [vmem:[%s901_s21 + $0x60] ss:$8 sps:$4 sm:$0xff]   ;;  %v846_v38 = vld [vmem:[%s901_s21 + $0x74] ss:$8 sps:$4 sm:$0xff]  }
  0x19   : > { %v842_v35 = vld [vmem:[%s901_s21 + $0xe4] ss:$8 sps:$4 sm:$0xff]   ;;  %v845_v37 = vld [vmem:[%s901_s21 + $0xe0] ss:$8 sps:$4 sm:$0xff]   ;;  %v848_v39 = vld [vmem:[%s901_s21 + $0xf4] ss:$8 sps:$4 sm:$0xff]  }
  0x1a   : > { %v850_v40 = vld [vmem:[%s901_s21 + $0x70] ss:$8 sps:$4 sm:$0xff]  }
  0x1b   : > { %459 = vmatpush1.bf16.msra.mxu0 %v800_v8  ;;  %782 = vmatpush1.bf16.msra.mxu1 %v800_v8  ;;  %v851_v41 = vld [vmem:[%s901_s21 + $0xf0] ss:$8 sps:$4 sm:$0xff]  }
  0x1c   : > { %460 = vmatprep.subr.bf16.mxu0 %v860_v1  ;;  %774 = vmatprep.subr.bf16.mxu1 %v860_v1 }
  0x1f   : > { %461 = vmatpush1.bf16.msra.mxu0 %v801_v9  ;;  %783 = vmatpush1.bf16.msra.mxu1 %v801_v9 }
  0x20   : > { %462 = vmatprep.subr.bf16.mxu0 %v860_v1  ;;  %775 = vmatprep.subr.bf16.mxu1 %v860_v1 }
  0x23   : > { %463 = vmatpush1.bf16.msra.mxu0 %v802_v10  ;;  %784 = vmatpush1.bf16.msra.mxu1 %v802_v10 }
  0x24   : > { %464 = vmatprep.subr.bf16.mxu0 %v860_v1  ;;  %776 = vmatprep.subr.bf16.mxu1 %v860_v1 }
  0x27   : > { %465 = vmatpush1.bf16.msra.mxu0 %v803_v11  ;;  %785 = vmatpush1.bf16.msra.mxu1 %v803_v11 }
  0x2a   : > { %481 = vmatmul.mubr.bf16.vlgmr.msra.gmra.mrb[0].mxu0 %v804_v12  ;;  %545 = vmatmul.mubr.bf16.vlgmr.msra.gmra.mrb[0].mxu1 %v807_v13 }
  0x2b   : > { %750 = vmatprep.mubr.msk.bf16.mxu0 %vm399_vm0, %v810_v14  ;;  %758 = vmatprep.mubr.msk.bf16.mxu1 %vm399_vm0, %v812_v15 }
  0x32   : > { %489 = vmatmul.mubr.bf16.gmra.mrb[4].mxu0 %v814_v16  ;;  %553 = vmatmul.mubr.bf16.gmra.mrb[4].mxu1 %v815_v17 }
  0x33   : > { %751 = vmatprep.mubr.msk.bf16.mxu0 %vm399_vm0, %v816_v18  ;;  %759 = vmatprep.mubr.msk.bf16.mxu1 %vm399_vm0, %v818_v19 }
  0x3a   : > { %497 = vmatmul.mubr.bf16.gmra.mrb[8].mxu0 %v820_v20  ;;  %561 = vmatmul.mubr.bf16.gmra.mrb[8].mxu1 %v821_v21 }
  0x3b   : > { %752 = vmatprep.mubr.msk.bf16.mxu0 %vm399_vm0, %v822_v22  ;;  %760 = vmatprep.mubr.msk.bf16.mxu1 %vm399_vm0, %v824_v23 }
  0x42   : > { %505 = vmatmul.mubr.bf16.gmra.mrb[12].mxu0 %v826_v24  ;;  %569 = vmatmul.mubr.bf16.gmra.mrb[12].mxu1 %v827_v25 }
  0x43   : > { %753 = vmatprep.mubr.msk.bf16.mxu0 %vm399_vm0, %v828_v26  ;;  %761 = vmatprep.mubr.msk.bf16.mxu1 %vm399_vm0, %v830_v27 }
  0x4a   : > { %513 = vmatmul.mubr.bf16.gmra.mrb[16].mxu0 %v832_v28  ;;  %577 = vmatmul.mubr.bf16.gmra.mrb[16].mxu1 %v833_v29 }
  0x4b   : > { %754 = vmatprep.mubr.msk.bf16.mxu0 %vm399_vm0, %v834_v30  ;;  %762 = vmatprep.mubr.msk.bf16.mxu1 %vm399_vm0, %v836_v31 }
  0x52   : > { %521 = vmatmul.mubr.bf16.gmra.mrb[20].mxu0 %v838_v32  ;;  %585 = vmatmul.mubr.bf16.gmra.mrb[20].mxu1 %v839_v33 }
  0x53   : > { %755 = vmatprep.mubr.msk.bf16.mxu0 %vm399_vm0, %v840_v34  ;;  %763 = vmatprep.mubr.msk.bf16.mxu1 %vm399_vm0, %v842_v35 }
  0x5a   : > { %529 = vmatmul.mubr.bf16.gmra.mrb[24].mxu0 %v844_v36  ;;  %593 = vmatmul.mubr.bf16.gmra.mrb[24].mxu1 %v845_v37 }
  0x5b   : > { %756 = vmatprep.mubr.msk.bf16.mxu0 %vm399_vm0, %v846_v38  ;;  %764 = vmatprep.mubr.msk.bf16.mxu1 %vm399_vm0, %v848_v39 }
  0x62   : > { %537 = vmatmul.mubr.bf16.gmra.mrb[28].mxu0 %v850_v40  ;;  %601 = vmatmul.mubr.bf16.gmra.mrb[28].mxu1 %v851_v41 }
  0xfd   : > { %v482_v42 = vpop.f32.mrb[0].mxu0  ;;  %v546_v43 = vpop.f32.mrb[0].mxu1 }
  0xfe   : > { %610 = vst.msk [vmem:[%s974_s8] sm:$0xff] %vm609_vm1, %v482_v42  ;;  %626 = vst.msk [vmem:[%s974_s8 + $0x80] sm:$0xff] %vm609_vm1, %v546_v43  ;;  %v484_v44 = vpop.f32.mrb[1].mxu0  ;;  %v548_v45 = vpop.f32.mrb[1].mxu1 }
  0xff   : > { %v485_v46 = vpop.f32.mrb[2].mxu0  ;;  %v549_v47 = vpop.f32.mrb[2].mxu1 }
 0x100   : > { %611 = vst.msk [vmem:[%s974_s8 + $0x8] sm:$0xff] %vm609_vm1, %v485_v46  ;;  %627 = vst.msk [vmem:[%s974_s8 + $0x88] sm:$0xff] %vm609_vm1, %v549_v47  ;;  %v487_v48 = vpop.f32.mrb[3].mxu0  ;;  %v551_v49 = vpop.f32.mrb[3].mxu1 }
 0x105   : > { %v490_v50 = vpop.f32.mrb[4].mxu0  ;;  %v554_v51 = vpop.f32.mrb[4].mxu1 }
 0x106   : > { %612 = vst.msk [vmem:[%s974_s8 + $0x10] sm:$0xff] %vm609_vm1, %v490_v50  ;;  %628 = vst.msk [vmem:[%s974_s8 + $0x90] sm:$0xff] %vm609_vm1, %v554_v51  ;;  %v492_v52 = vpop.f32.mrb[5].mxu0  ;;  %v556_v53 = vpop.f32.mrb[5].mxu1 }
 0x107   : > { %v493_v54 = vpop.f32.mrb[6].mxu0  ;;  %v557_v55 = vpop.f32.mrb[6].mxu1 }
 0x108   : > { %613 = vst.msk [vmem:[%s974_s8 + $0x18] sm:$0xff] %vm609_vm1, %v493_v54  ;;  %629 = vst.msk [vmem:[%s974_s8 + $0x98] sm:$0xff] %vm609_vm1, %v557_v55  ;;  %v495_v56 = vpop.f32.mrb[7].mxu0  ;;  %v559_v57 = vpop.f32.mrb[7].mxu1 }
 0x10d   : > { %v498_v58 = vpop.f32.mrb[8].mxu0  ;;  %v562_v59 = vpop.f32.mrb[8].mxu1 }
 0x10e   : > { %614 = vst.msk [vmem:[%s974_s8 + $0x20] sm:$0xff] %vm609_vm1, %v498_v58  ;;  %630 = vst.msk [vmem:[%s974_s8 + $0xa0] sm:$0xff] %vm609_vm1, %v562_v59  ;;  %v500_v60 = vpop.f32.mrb[9].mxu0  ;;  %v564_v61 = vpop.f32.mrb[9].mxu1 }
 0x10f   : > { %v501_v62 = vpop.f32.mrb[10].mxu0  ;;  %v565_v63 = vpop.f32.mrb[10].mxu1 }
 0x110   : > { %615 = vst.msk [vmem:[%s974_s8 + $0x28] sm:$0xff] %vm609_vm1, %v501_v62  ;;  %631 = vst.msk [vmem:[%s974_s8 + $0xa8] sm:$0xff] %vm609_vm1, %v565_v63  ;;  %v503_v0 = vpop.f32.mrb[11].mxu0  ;;  %v567_v1 = vpop.f32.mrb[11].mxu1 }
 0x115   : > { %v506_v2 = vpop.f32.mrb[12].mxu0  ;;  %v570_v3 = vpop.f32.mrb[12].mxu1 }
 0x116   : > { %616 = vst.msk [vmem:[%s974_s8 + $0x30] sm:$0xff] %vm609_vm1, %v506_v2  ;;  %632 = vst.msk [vmem:[%s974_s8 + $0xb0] sm:$0xff] %vm609_vm1, %v570_v3  ;;  %v508_v4 = vpop.f32.mrb[13].mxu0  ;;  %v572_v5 = vpop.f32.mrb[13].mxu1 }
 0x117   : > { %v509_v6 = vpop.f32.mrb[14].mxu0  ;;  %v573_v7 = vpop.f32.mrb[14].mxu1 }
 0x118   : > { %617 = vst.msk [vmem:[%s974_s8 + $0x38] sm:$0xff] %vm609_vm1, %v509_v6  ;;  %633 = vst.msk [vmem:[%s974_s8 + $0xb8] sm:$0xff] %vm609_vm1, %v573_v7  ;;  %v511_v8 = vpop.f32.mrb[15].mxu0  ;;  %v575_v9 = vpop.f32.mrb[15].mxu1 }
 0x11d   : > { %v514_v10 = vpop.f32.mrb[16].mxu0  ;;  %v578_v11 = vpop.f32.mrb[16].mxu1 }
 0x11e   : > { %618 = vst.msk [vmem:[%s974_s8 + $0x40] sm:$0xff] %vm609_vm1, %v514_v10  ;;  %634 = vst.msk [vmem:[%s974_s8 + $0xc0] sm:$0xff] %vm609_vm1, %v578_v11  ;;  %v516_v12 = vpop.f32.mrb[17].mxu0  ;;  %v580_v13 = vpop.f32.mrb[17].mxu1 }
 0x11f   : > { %v517_v14 = vpop.f32.mrb[18].mxu0  ;;  %v581_v15 = vpop.f32.mrb[18].mxu1 }
 0x120   : > { %619 = vst.msk [vmem:[%s974_s8 + $0x48] sm:$0xff] %vm609_vm1, %v517_v14  ;;  %635 = vst.msk [vmem:[%s974_s8 + $0xc8] sm:$0xff] %vm609_vm1, %v581_v15  ;;  %v519_v16 = vpop.f32.mrb[19].mxu0  ;;  %v583_v17 = vpop.f32.mrb[19].mxu1 }
 0x125   : > { %v522_v18 = vpop.f32.mrb[20].mxu0  ;;  %v586_v19 = vpop.f32.mrb[20].mxu1 }
 0x126   : > { %620 = vst.msk [vmem:[%s974_s8 + $0x50] sm:$0xff] %vm609_vm1, %v522_v18  ;;  %636 = vst.msk [vmem:[%s974_s8 + $0xd0] sm:$0xff] %vm609_vm1, %v586_v19  ;;  %v524_v20 = vpop.f32.mrb[21].mxu0  ;;  %v588_v21 = vpop.f32.mrb[21].mxu1 }
 0x127   : > { %v525_v22 = vpop.f32.mrb[22].mxu0  ;;  %v589_v23 = vpop.f32.mrb[22].mxu1 }
 0x128   : > { %621 = vst.msk [vmem:[%s974_s8 + $0x58] sm:$0xff] %vm609_vm1, %v525_v22  ;;  %637 = vst.msk [vmem:[%s974_s8 + $0xd8] sm:$0xff] %vm609_vm1, %v589_v23  ;;  %v527_v24 = vpop.f32.mrb[23].mxu0  ;;  %v591_v25 = vpop.f32.mrb[23].mxu1 }
 0x12d   : > { %v530_v26 = vpop.f32.mrb[24].mxu0  ;;  %v594_v27 = vpop.f32.mrb[24].mxu1 }
 0x12e   : > { %622 = vst.msk [vmem:[%s974_s8 + $0x60] sm:$0xff] %vm609_vm1, %v530_v26  ;;  %638 = vst.msk [vmem:[%s974_s8 + $0xe0] sm:$0xff] %vm609_vm1, %v594_v27  ;;  %v532_v28 = vpop.f32.mrb[25].mxu0  ;;  %v596_v29 = vpop.f32.mrb[25].mxu1 }
 0x12f   : > { %v533_v30 = vpop.f32.mrb[26].mxu0  ;;  %v597_v31 = vpop.f32.mrb[26].mxu1 }
 0x130   : > { %623 = vst.msk [vmem:[%s974_s8 + $0x68] sm:$0xff] %vm609_vm1, %v533_v30  ;;  %639 = vst.msk [vmem:[%s974_s8 + $0xe8] sm:$0xff] %vm609_vm1, %v597_v31  ;;  %v535_v32 = vpop.f32.mrb[27].mxu0  ;;  %v599_v33 = vpop.f32.mrb[27].mxu1 }
 0x135   : > { %v538_v34 = vpop.f32.mrb[28].mxu0  ;;  %v602_v35 = vpop.f32.mrb[28].mxu1 }
 0x136   : > { %624 = vst.msk [vmem:[%s974_s8 + $0x70] sm:$0xff] %vm609_vm1, %v538_v34  ;;  %640 = vst.msk [vmem:[%s974_s8 + $0xf0] sm:$0xff] %vm609_vm1, %v602_v35  ;;  %v540_v36 = vpop.f32.mrb[29].mxu0  ;;  %v604_v37 = vpop.f32.mrb[29].mxu1 }
 0x137   : > { %v541_v38 = vpop.f32.mrb[30].mxu0  ;;  %v605_v39 = vpop.f32.mrb[30].mxu1 }
 0x138   : > { %625 = vst.msk [vmem:[%s974_s8 + $0x78] sm:$0xff] %vm609_vm1, %v541_v38  ;;  %641 = vst.msk [vmem:[%s974_s8 + $0xf8] sm:$0xff] %vm609_vm1, %v605_v39  ;;  %v543_v40 = vpop.f32.mrb[31].mxu0  ;;  %v607_v41 = vpop.f32.mrb[31].mxu1 }
 0x139 PF: > { %s12_s9 = sadd.s32 1, %s858_s9  }
 0x13a   : > { %p9_p4 = scmp.ge.s32.totalorder %s12_s9, 4  }
 0x13c   :  { %11 = sbr.rel (!%p9_p4) target bundleno = 1 (0x1), region = 58 }

// kernel: _lambda_.12
= control target key start
LH: loop header
LB: loop body
LE: loop exit
PB: predicated region body
PF: predicated region fallthrough
CT: control target
= control target key end

     0   :  { %s1216_s21 = smov 0   ;;  %s1487_s0 = inlined_call_operand.vmem [shape: f32[512,4], index: 0, kind: input, shape index: {}]   ;;  %s1488_s1 = inlined_call_operand.vmem [shape: f32[1,4], index: 1, kind: input, shape index: {}]   ;;  %s1489_s2 = inlined_call_operand.vmem [shape: f32[1,4], index: 2, kind: input, shape index: {}]   ;;  %s1490_s3 = inlined_call_operand.vmem [shape: bf16[4,8], index: 3, kind: input, shape index: {}]   ;;  %s1491_s4 = inlined_call_operand.vmem [shape: bf16[8,8], index: 4, kind: input, shape index: {}]   ;;  %s1492_s5 = inlined_call_operand.vmem [shape: f32[512,8], index: 5, kind: input, shape index: {}]   ;;  %s1493_s6 = inlined_call_operand.vmem [shape: f32[512,8], index: 6, kind: output, shape index: {}]  }
   0x1 LB: > { %s1014_s22 = sadd.s32 4294967295, %s1179_s21   ;;  %p1018_p0 = scmp.ge.s32.totalorder %s1179_s21, 1  ;;  %s1179_s21 = sphi %s1216_s21, %s16_s21  }
   0x2   : > { %p224_p1 = scmp.lt.s32.totalorder %s1179_s21, 3 }
   0x4   : > { %p225_p2 = pnand %p1018_p0, %p224_p1 }
   0x5   : > { %v436_v0 = vld [vmem:[%s1490_s3] sm:$0x3] (!%p225_p2)  ;;  %vm486_vm0 = vcmask (!%p225_p2), 1041408   ;;  %s1019_s25 = sshll.u32 (!%p225_p2), %s1014_s22, 5  ;;  %vm437_vm1 = vcmask (!%p225_p2), 31744   ;;  %vm749_vm2 = vcmask (!%p225_p2), 1043456  }
   0x6   : > { %228 = sbr.rel (%p225_p2) target bundleno = 518 (0x206), region = 44  ;;  %1163 = vmatprep.subr.msk.bf16.mxu0 (!%p225_p2), %vm486_vm0, %v436_v0  ;;  %v488_v1 = vsel (!%p225_p2), %vm486_vm0, %v436_v0, 0  ;;  %p260_p3 = scmp.lt.s32.totalorder (!%p225_p2), %s1019_s25, 63  ;;  %v1232_v2 = vld [vmem:[%s1488_s1] ss:$0 sm:$0xff] (!%p225_p2)  ;;  %vm700_vm3 = vcmask (!%p225_p2), 64512  }
   0x7   : > { %1096 = vmatpush3.bf16.msra.mxu0 (!%p225_p2), %v488_v1  ;;  %v1243_v3 = vld [vmem:[%s1489_s2] ss:$0 sm:$0xff] (!%p225_p2) }
   0xd   : > { %s1495_s25 = smov (!%p260_p3, %s1019_s25), 63 }
   0xe   : > { %s1227_s26 = sshll.u32 %s1495_s25, 3 }
   0xf   : > { %s1238_s7 = scalar_lea.vmem %s1487_s0, %s1227_s26  ;;  %s1380_s14 = scalar_lea.vmem %s1492_s5, %s1227_s26 }
  0x10   : > { %v278_v4 = vld [vmem:[%s1238_s7] sm:$0xff]  ;;  %v279_v5 = vld [vmem:[%s1238_s7 + $0x8] sm:$0xff]  ;;  %v280_v6 = vld [vmem:[%s1238_s7 + $0x10] sm:$0xff]  ;;  %s1388_s17 = scalar_lea.vmem %s1493_s6, %s1227_s26 }
  0x11   : > { %v317_v7 = vmul.f32 %v1232_v2, %v278_v4  ;;  %v318_v8 = vmul.f32 %v1232_v2, %v279_v5  ;;  %v281_v9 = vld [vmem:[%s1238_s7 + $0x18] sm:$0xff]  ;;  %v319_v10 = vmul.f32 %v1232_v2, %v280_v6  ;;  %v282_v11 = vld [vmem:[%s1238_s7 + $0x20] sm:$0xff]  ;;  %v283_v12 = vld [vmem:[%s1238_s7 + $0x28] sm:$0xff] }
  0x12   : > { %v320_v13 = vmul.f32 %v1232_v2, %v281_v9  ;;  %v321_v14 = vmul.f32 %v1232_v2, %v282_v11  ;;  %v322_v15 = vmul.f32 %v1232_v2, %v283_v12  ;;  %v284_v16 = vld [vmem:[%s1238_s7 + $0x30] sm:$0xff]  ;;  %v285_v17 = vld [vmem:[%s1238_s7 + $0x38] sm:$0xff]  ;;  %v286_v26 = vld [vmem:[%s1238_s7 + $0x40] sm:$0xff] }
  0x13   : > { %v356_v18 = vadd.f32 %v1243_v3, %v317_v7  ;;  %v357_v19 = vadd.f32 %v1243_v3, %v318_v8  ;;  %v358_v20 = vadd.f32 %v1243_v3, %v319_v10  ;;  %v323_v21 = vmul.f32 %v1232_v2, %v284_v16  ;;  %v287_v27 = vld [vmem:[%s1238_s7 + $0x48] sm:$0xff]  ;;  %v288_v39 = vld [vmem:[%s1238_s7 + $0x50] sm:$0xff]  ;;  %v289_v40 = vld [vmem:[%s1238_s7 + $0x58] sm:$0xff] }
  0x14   : > { %v359_v22 = vadd.f32 %v1243_v3, %v320_v13  ;;  %v360_v23 = vadd.f32 %v1243_v3, %v321_v14  ;;  %v361_v24 = vadd.f32 %v1243_v3, %v322_v15  ;;  %v324_v25 = vmul.f32 %v1232_v2, %v285_v17  ;;  %v290_v43 = vld [vmem:[%s1238_s7 + $0x60] sm:$0xff]  ;;  %v291_v44 = vld [vmem:[%s1238_s7 + $0x68] sm:$0xff]  ;;  %v292_v61 = vld [vmem:[%s1238_s7 + $0x70] sm:$0xff] }
  0x15   : > { %v388_v28 = vmax.f32 %v356_v18, 0.0  ;;  %v389_v29 = vmax.f32 %v357_v19, 0.0  ;;  %v390_v30 = vmax.f32 %v358_v20, 0.0  ;;  %v362_v31 = vadd.f32 %v1243_v3, %v323_v21  ;;  %v293_v62 = vld [vmem:[%s1238_s7 + $0x78] sm:$0xff]  ;;  %v294_v63 = vld [vmem:[%s1238_s7 + $0x80] sm:$0xff]  ;;  %v295_v0 = vld [vmem:[%s1238_s7 + $0x88] sm:$0xff] }
  0x16   : > { %v391_v32 = vmax.f32 %v359_v22, 0.0  ;;  %v392_v33 = vmax.f32 %v360_v23, 0.0  ;;  %v393_v34 = vmax.f32 %v361_v24, 0.0  ;;  %v363_v35 = vadd.f32 %v1243_v3, %v324_v25  ;;  %v296_v17 = vld [vmem:[%s1238_s7 + $0x90] sm:$0xff]  ;;  %v297_v18 = vld [vmem:[%s1238_s7 + $0x98] sm:$0xff]  ;;  %v298_v19 = vld [vmem:[%s1238_s7 + $0xa0] sm:$0xff] }
  0x17   : > { %v420_v36 = vpack.c.bf16 %v389_v29, %v388_v28  ;;  %v325_v37 = vmul.f32 %v1232_v2, %v286_v26  ;;  %v326_v38 = vmul.f32 %v1232_v2, %v287_v27  ;;  %v394_v47 = vmax.f32 %v362_v31, 0.0  ;;  %v299_v20 = vld [vmem:[%s1238_s7 + $0xa8] sm:$0xff] }
  0x18   : > { %v421_v41 = vpack.c.bf16 %v391_v32, %v390_v30  ;;  %v422_v42 = vpack.c.bf16 %v393_v34, %v392_v33  ;;  %v395_v48 = vmax.f32 %v363_v35, 0.0  ;;  %v327_v49 = vmul.f32 %v1232_v2, %v288_v39  ;;  %v300_v35 = vld [vmem:[%s1238_s7 + $0xb0] sm:$0xff] }
  0x19   : > { %1097 = vmatprep.mubr.msk.bf16.mxu0 %vm437_vm1, %v420_v36  ;;  %v364_v45 = vadd.f32 %v1243_v3, %v325_v37  ;;  %v365_v46 = vadd.f32 %v1243_v3, %v326_v38  ;;  %v328_v50 = vmul.f32 %v1232_v2, %v289_v40  ;;  %v329_v53 = vmul.f32 %v1232_v2, %v290_v43  ;;  %v301_v36 = vld [vmem:[%s1238_s7 + $0xb8] sm:$0xff]  ;;  %v302_v37 = vld [vmem:[%s1238_s7 + $0xc0] sm:$0xff]  ;;  %v303_v38 = vld [vmem:[%s1238_s7 + $0xc8] sm:$0xff] }
  0x1a   : > { %1098 = vmatmul.mubr.msk.bf16.vlgmr.msra.gmra.mrb[0].mxu0 %vm437_vm1, %v421_v41  ;;  %v330_v54 = vmul.f32 %v1232_v2, %v291_v44  ;;  %v423_v55 = vpack.c.bf16 %v395_v48, %v394_v47  ;;  %v366_v56 = vadd.f32 %v1243_v3, %v327_v49  ;;  %v331_v5 = vmul.f32 %v1232_v2, %v292_v61 }
  0x1b   : > { %1101 = vmatprep.mubr.msk.bf16.mxu0 %vm437_vm1, %v422_v42  ;;  %v396_v51 = vmax.f32 %v364_v45, 0.0  ;;  %v397_v52 = vmax.f32 %v365_v46, 0.0  ;;  %v367_v57 = vadd.f32 %v1243_v3, %v328_v50  ;;  %v368_v59 = vadd.f32 %v1243_v3, %v329_v53  ;;  %v304_v53 = vld [vmem:[%s1238_s7 + $0xd0] sm:$0xff] }
  0x1c   : > { %v369_v60 = vadd.f32 %v1243_v3, %v330_v54  ;;  %v398_v1 = vmax.f32 %v366_v56, 0.0  ;;  %v332_v6 = vmul.f32 %v1232_v2, %v293_v62  ;;  %v333_v9 = vmul.f32 %v1232_v2, %v294_v63  ;;  %v305_v54 = vld [vmem:[%s1238_s7 + $0xd8] sm:$0xff]  ;;  %v307_v56 = vld [vmem:[%s1238_s7 + $0xe8] sm:$0xff] }
  0x1d   : > { %v424_v58 = vpack.c.bf16 %v397_v52, %v396_v51  ;;  %v399_v4 = vmax.f32 %v367_v57, 0.0  ;;  %v400_v7 = vmax.f32 %v368_v59, 0.0  ;;  %v334_v10 = vmul.f32 %v1232_v2, %v295_v0 }
  0x1e   : > { %v401_v8 = vmax.f32 %v369_v60, 0.0  ;;  %v370_v12 = vadd.f32 %v1243_v3, %v331_v5  ;;  %v371_v13 = vadd.f32 %v1243_v3, %v332_v6  ;;  %v372_v15 = vadd.f32 %v1243_v3, %v333_v9  ;;  %v308_v9 = vld [vmem:[%s1238_s7 + $0xf0] sm:$0xff] }
  0x1f   : > { %v425_v11 = vpack.c.bf16 %v399_v4, %v398_v1  ;;  %v373_v16 = vadd.f32 %v1243_v3, %v334_v10  ;;  %v335_v23 = vmul.f32 %v1232_v2, %v296_v17  ;;  %v336_v24 = vmul.f32 %v1232_v2, %v297_v18  ;;  %v309_v10 = vld [vmem:[%s1238_s7 + $0xf8] sm:$0xff] }
  0x20   : > { %v426_v14 = vpack.c.bf16 %v401_v8, %v400_v7  ;;  %v402_v21 = vmax.f32 %v370_v12, 0.0  ;;  %v403_v22 = vmax.f32 %v371_v13, 0.0  ;;  %v404_v25 = vmax.f32 %v372_v15, 0.0 }
  0x21   : > { %v405_v26 = vmax.f32 %v373_v16, 0.0  ;;  %v337_v27 = vmul.f32 %v1232_v2, %v298_v19  ;;  %v338_v28 = vmul.f32 %v1232_v2, %v299_v20  ;;  %v374_v30 = vadd.f32 %v1243_v3, %v335_v23 }
  0x22   : > { %1102 = vmatmul.mubr.msk.bf16.gmra.mrb[4].mxu0 %vm437_vm1, %v423_v55  ;;  %v427_v29 = vpack.c.bf16 %v403_v22, %v402_v21  ;;  %v375_v31 = vadd.f32 %v1243_v3, %v336_v24  ;;  %v339_v41 = vmul.f32 %v1232_v2, %v300_v35  ;;  %v340_v42 = vmul.f32 %v1232_v2, %v301_v36  ;;  %v306_v55 = vld [vmem:[%s1238_s7 + $0xe0] sm:$0xff] }
  0x23   : > { %1105 = vmatprep.mubr.msk.bf16.mxu0 %vm437_vm1, %v424_v58  ;;  %v428_v32 = vpack.c.bf16 %v405_v26, %v404_v25  ;;  %v376_v33 = vadd.f32 %v1243_v3, %v337_v27  ;;  %v377_v34 = vadd.f32 %v1243_v3, %v338_v28  ;;  %v406_v39 = vmax.f32 %v374_v30, 0.0 }
  0x24   : > { %v407_v40 = vmax.f32 %v375_v31, 0.0  ;;  %v341_v45 = vmul.f32 %v1232_v2, %v302_v37  ;;  %v342_v46 = vmul.f32 %v1232_v2, %v303_v38  ;;  %v378_v48 = vadd.f32 %v1243_v3, %v339_v41 }
  0x25   : > { %v408_v43 = vmax.f32 %v376_v33, 0.0  ;;  %v409_v44 = vmax.f32 %v377_v34, 0.0  ;;  %v379_v49 = vadd.f32 %v1243_v3, %v340_v42  ;;  %v343_v59 = vmul.f32 %v1232_v2, %v304_v53 }
  0x26   : > { %v429_v47 = vpack.c.bf16 %v407_v40, %v406_v39  ;;  %v380_v51 = vadd.f32 %v1243_v3, %v341_v45  ;;  %v381_v52 = vadd.f32 %v1243_v3, %v342_v46  ;;  %v410_v57 = vmax.f32 %v378_v48, 0.0 }
  0x27   : > { %v430_v50 = vpack.c.bf16 %v409_v44, %v408_v43  ;;  %v411_v58 = vmax.f32 %v379_v49, 0.0  ;;  %v344_v60 = vmul.f32 %v1232_v2, %v305_v54  ;;  %v345_v63 = vmul.f32 %v1232_v2, %v306_v55 }
  0x28   : > { %v412_v61 = vmax.f32 %v380_v51, 0.0  ;;  %v413_v62 = vmax.f32 %v381_v52, 0.0  ;;  %v346_v0 = vmul.f32 %v1232_v2, %v307_v56  ;;  %v382_v4 = vadd.f32 %v1243_v3, %v343_v59 }
  0x29   : > { %v431_v1 = vpack.c.bf16 %v411_v58, %v410_v57  ;;  %v383_v5 = vadd.f32 %v1243_v3, %v344_v60  ;;  %v384_v7 = vadd.f32 %v1243_v3, %v345_v63  ;;  %v347_v13 = vmul.f32 %v1232_v2, %v308_v9 }
  0x2a   : > { %1106 = vmatmul.mubr.msk.bf16.gmra.mrb[8].mxu0 %vm437_vm1, %v425_v11  ;;  %v432_v6 = vpack.c.bf16 %v413_v62, %v412_v61  ;;  %v385_v8 = vadd.f32 %v1243_v3, %v346_v0  ;;  %v414_v11 = vmax.f32 %v382_v4, 0.0 }
  0x2b   : > { %1109 = vmatprep.mubr.msk.bf16.mxu0 %vm437_vm1, %v426_v14  ;;  %v415_v12 = vmax.f32 %v383_v5, 0.0  ;;  %v348_v14 = vmul.f32 %v1232_v2, %v309_v10  ;;  %v416_v15 = vmax.f32 %v384_v7, 0.0  ;;  %v386_v18 = vadd.f32 %v1243_v3, %v347_v13  ;;  %v667_v2 = vld [vmem:[%s1491_s4] sm:$0xf]  ;;  %v670_v10 = vld [vmem:[%s1380_s14 + $0x10] sm:$0xff]  ;;  %v671_v13 = vld [vmem:[%s1380_s14 + $0x18] sm:$0xff] }
  0x2c   : > { %v417_v16 = vmax.f32 %v385_v8, 0.0  ;;  %1164 = vmatprep.subr.msk.bf16.mxu1 %vm749_vm2, %v667_v2  ;;  %v751_v24 = vsel %vm749_vm2, %v667_v2, 0 }
  0x2d   : > { %v433_v17 = vpack.c.bf16 %v415_v12, %v414_v11  ;;  %v387_v19 = vadd.f32 %v1243_v3, %v348_v14  ;;  %v418_v21 = vmax.f32 %v386_v18, 0.0  ;;  %1130 = vmatpush3.bf16.msra.mxu1 %v751_v24  ;;  %v668_v11 = vld [vmem:[%s1380_s14] sm:$0xff]  ;;  %v675_v24 = vld [vmem:[%s1380_s14 + $0x38] sm:$0xff] }
  0x2e   : > { %v434_v20 = vpack.c.bf16 %v417_v16, %v416_v15  ;;  %v669_v16 = vld [vmem:[%s1380_s14 + $0x8] sm:$0xff] }
  0x2f   : > { %v419_v22 = vmax.f32 %v387_v19, 0.0 }
  0x31   : > { %v435_v23 = vpack.c.bf16 %v419_v22, %v418_v21  ;;  %v674_v22 = vld [vmem:[%s1380_s14 + $0x30] sm:$0xff] }
  0x32   : > { %1110 = vmatmul.mubr.msk.bf16.gmra.mrb[12].mxu0 %vm437_vm1, %v427_v29 }
  0x33   : > { %1113 = vmatprep.mubr.msk.bf16.mxu0 %vm437_vm1, %v428_v32 }
  0x3a   : > { %1114 = vmatmul.mubr.msk.bf16.gmra.mrb[16].mxu0 %vm437_vm1, %v429_v47 }
  0x3b   : > { %1117 = vmatprep.mubr.msk.bf16.mxu0 %vm437_vm1, %v430_v50 }
  0x42   : > { %1118 = vmatmul.mubr.msk.bf16.gmra.mrb[20].mxu0 %vm437_vm1, %v431_v1 }
  0x43   : > { %1121 = vmatprep.mubr.msk.bf16.mxu0 %vm437_vm1, %v432_v6 }
  0x4a   : > { %1122 = vmatmul.mubr.msk.bf16.gmra.mrb[24].mxu0 %vm437_vm1, %v433_v17 }
  0x4b   : > { %1125 = vmatprep.mubr.msk.bf16.mxu0 %vm437_vm1, %v434_v20 }
  0x52   : > { %1126 = vmatmul.mubr.msk.bf16.gmra.mrb[28].mxu0 %vm437_vm1, %v435_v23  ;;  %v672_v23 = vld [vmem:[%s1380_s14 + $0x20] sm:$0xff] }
  0xed   : > { %v1099_v25 = vpop.f32.mrb[0].mxu0 }
  0xee   : > { %v524_v3 = vpop.f32.mrb[1].mxu0 }
  0xef   : > { %v1100_v26 = vpop.f32.mrb[2].mxu0 }
  0xf0   : > { %v652_v27 = vpack.c.bf16 %v1100_v26, %v1099_v25  ;;  %v527_v28 = vpop.f32.mrb[3].mxu0  ;;  %v673_v26 = vld [vmem:[%s1380_s14 + $0x28] sm:$0xff] }
  0xf1   : > { %v651_v29 = vpack.c.bf16 %v527_v28, %v524_v3 }
  0xf3   : > { %1131 = vmatprep.mubr.msk.bf16.mxu1 %vm700_vm3, %v651_v29 }
  0xf4   : > { %1132 = vmatmul.mubr.msk.bf16.vlgmr.msra.gmra.mrb[0].mxu1 %vm700_vm3, %v652_v27 }
  0xf5   : > { %v1103_v30 = vpop.f32.mrb[4].mxu0 }
  0xf6   : > { %v540_v31 = vpop.f32.mrb[5].mxu0 }
  0xf7   : > { %v1104_v32 = vpop.f32.mrb[6].mxu0 }
  0xf8   : > { %v654_v33 = vpack.c.bf16 %v1104_v32, %v1103_v30  ;;  %v543_v34 = vpop.f32.mrb[7].mxu0  ;;  %v678_v32 = vld [vmem:[%s1380_s14 + $0x50] sm:$0xff] }
  0xf9   : > { %v653_v35 = vpack.c.bf16 %v543_v34, %v540_v31 }
  0xfb   : > { %1135 = vmatprep.mubr.msk.bf16.mxu1 %vm700_vm3, %v653_v35  ;;  %v679_v35 = vld [vmem:[%s1380_s14 + $0x58] sm:$0xff] }
  0xfc   : > { %1136 = vmatmul.mubr.msk.bf16.gmra.mrb[4].mxu1 %vm700_vm3, %v654_v33  ;;  %v676_v33 = vld [vmem:[%s1380_s14 + $0x40] sm:$0xff] }
  0xfd   : > { %v1107_v36 = vpop.f32.mrb[8].mxu0 }
  0xfe   : > { %v556_v37 = vpop.f32.mrb[9].mxu0 }
  0xff   : > { %v1108_v38 = vpop.f32.mrb[10].mxu0 }
 0x100   : > { %v656_v39 = vpack.c.bf16 %v1108_v38, %v1107_v36  ;;  %v559_v40 = vpop.f32.mrb[11].mxu0  ;;  %v677_v38 = vld [vmem:[%s1380_s14 + $0x48] sm:$0xff] }
 0x101   : > { %v655_v41 = vpack.c.bf16 %v559_v40, %v556_v37 }
 0x103   : > { %1139 = vmatprep.mubr.msk.bf16.mxu1 %vm700_vm3, %v655_v41 }
 0x104   : > { %1140 = vmatmul.mubr.msk.bf16.gmra.mrb[8].mxu1 %vm700_vm3, %v656_v39 }
 0x105   : > { %v1111_v42 = vpop.f32.mrb[12].mxu0 }
 0x106   : > { %v572_v43 = vpop.f32.mrb[13].mxu0 }
 0x107   : > { %v1112_v44 = vpop.f32.mrb[14].mxu0 }
 0x108   : > { %v658_v45 = vpack.c.bf16 %v1112_v44, %v1111_v42  ;;  %v575_v46 = vpop.f32.mrb[15].mxu0  ;;  %v682_v44 = vld [vmem:[%s1380_s14 + $0x70] sm:$0xff] }
 0x109   : > { %v657_v47 = vpack.c.bf16 %v575_v46, %v572_v43 }
 0x10b   : > { %1143 = vmatprep.mubr.msk.bf16.mxu1 %vm700_vm3, %v657_v47  ;;  %v683_v47 = vld [vmem:[%s1380_s14 + $0x78] sm:$0xff] }
 0x10c   : > { %1144 = vmatmul.mubr.msk.bf16.gmra.mrb[12].mxu1 %vm700_vm3, %v658_v45  ;;  %v680_v45 = vld [vmem:[%s1380_s14 + $0x60] sm:$0xff] }
 0x10d   : > { %v1115_v48 = vpop.f32.mrb[16].mxu0 }
 0x10e   : > { %v588_v49 = vpop.f32.mrb[17].mxu0 }
 0x10f   : > { %v1116_v50 = vpop.f32.mrb[18].mxu0 }
 0x110   : > { %v660_v51 = vpack.c.bf16 %v1116_v50, %v1115_v48  ;;  %v591_v52 = vpop.f32.mrb[19].mxu0  ;;  %v681_v50 = vld [vmem:[%s1380_s14 + $0x68] sm:$0xff] }
 0x111   : > { %v659_v53 = vpack.c.bf16 %v591_v52, %v588_v49 }
 0x113   : > { %1147 = vmatprep.mubr.msk.bf16.mxu1 %vm700_vm3, %v659_v53 }
 0x114   : > { %1148 = vmatmul.mubr.msk.bf16.gmra.mrb[16].mxu1 %vm700_vm3, %v660_v51 }
 0x115   : > { %v1119_v54 = vpop.f32.mrb[20].mxu0 }
 0x116   : > { %v604_v55 = vpop.f32.mrb[21].mxu0 }
 0x117   : > { %v1120_v56 = vpop.f32.mrb[22].mxu0 }
 0x118   : > { %v662_v57 = vpack.c.bf16 %v1120_v56, %v1119_v54  ;;  %v607_v58 = vpop.f32.mrb[23].mxu0  ;;  %v686_v56 = vld [vmem:[%s1380_s14 + $0x90] sm:$0xff] }
 0x119   : > { %v661_v59 = vpack.c.bf16 %v607_v58, %v604_v55 }
 0x11b   : > { %1151 = vmatprep.mubr.msk.bf16.mxu1 %vm700_vm3, %v661_v59  ;;  %v687_v59 = vld [vmem:[%s1380_s14 + $0x98] sm:$0xff] }
 0x11c   : > { %1152 = vmatmul.mubr.msk.bf16.gmra.mrb[20].mxu1 %vm700_vm3, %v662_v57  ;;  %v684_v57 = vld [vmem:[%s1380_s14 + $0x80] sm:$0xff] }
 0x11d   : > { %v1123_v60 = vpop.f32.mrb[24].mxu0 }
 0x11e   : > { %v620_v61 = vpop.f32.mrb[25].mxu0 }
 0x11f   : > { %v1124_v62 = vpop.f32.mrb[26].mxu0 }
 0x120   : > { %v664_v63 = vpack.c.bf16 %v1124_v62, %v1123_v60  ;;  %v623_v0 = vpop.f32.mrb[27].mxu0  ;;  %v685_v62 = vld [vmem:[%s1380_s14 + $0x88] sm:$0xff] }
 0x121   : > { %v663_v1 = vpack.c.bf16 %v623_v0, %v620_v61 }
 0x123   : > { %1155 = vmatprep.mubr.msk.bf16.mxu1 %vm700_vm3, %v663_v1 }
 0x124   : > { %1156 = vmatmul.mubr.msk.bf16.gmra.mrb[24].mxu1 %vm700_vm3, %v664_v63 }
 0x125   : > { %v1127_v4 = vpop.f32.mrb[28].mxu0 }
 0x126   : > { %v636_v5 = vpop.f32.mrb[29].mxu0 }
 0x127   : > { %v1128_v6 = vpop.f32.mrb[30].mxu0 }
 0x128   : > { %v666_v7 = vpack.c.bf16 %v1128_v6, %v1127_v4  ;;  %v639_v8 = vpop.f32.mrb[31].mxu0  ;;  %v690_v6 = vld [vmem:[%s1380_s14 + $0xb0] sm:$0xff] }
 0x129   : > { %v665_v9 = vpack.c.bf16 %v639_v8, %v636_v5 }
 0x12b   : > { %1159 = vmatprep.mubr.msk.bf16.mxu1 %vm700_vm3, %v665_v9  ;;  %v691_v9 = vld [vmem:[%s1380_s14 + $0xb8] sm:$0xff] }
 0x12c   : > { %1160 = vmatmul.mubr.msk.bf16.gmra.mrb[28].mxu1 %vm700_vm3, %v666_v7  ;;  %v688_v7 = vld [vmem:[%s1380_s14 + $0xa0] sm:$0xff] }
 0x1c7   : > { %v1133_v12 = vpop.f32.mrb[0].mxu1 }
 0x1c8   : > { %v796_v14 = vadd.f32 %v1133_v12, %v670_v10  ;;  %v787_v15 = vpop.f32.mrb[1].mxu1  ;;  %v689_v12 = vld [vmem:[%s1380_s14 + $0xa8] sm:$0xff] }
 0x1c9   : > { %v788_v17 = vadd.f32 %v787_v15, %v668_v11  ;;  %v1134_v18 = vpop.f32.mrb[2].mxu1 }
 0x1ca   : > { %916 = vst.msk [vmem:[%s1388_s17 + $0x10] sm:$0xff] %vm700_vm3, %v796_v14  ;;  %v799_v19 = vadd.f32 %v1134_v18, %v671_v13  ;;  %v790_v20 = vpop.f32.mrb[3].mxu1  ;;  %v694_v18 = vld [vmem:[%s1380_s14 + $0xd0] sm:$0xff] }
 0x1cb   : > { %914 = vst.msk [vmem:[%s1388_s17] sm:$0xff] %vm700_vm3, %v788_v17  ;;  %v791_v21 = vadd.f32 %v790_v20, %v669_v16 }
 0x1cc   : > { %917 = vst.msk [vmem:[%s1388_s17 + $0x18] sm:$0xff] %vm700_vm3, %v799_v19  ;;  %v692_v19 = vld [vmem:[%s1380_s14 + $0xc0] sm:$0xff] }
 0x1cd   : > { %915 = vst.msk [vmem:[%s1388_s17 + $0x8] sm:$0xff] %vm700_vm3, %v791_v21  ;;  %v695_v21 = vld [vmem:[%s1380_s14 + $0xd8] sm:$0xff] }
 0x1cf   : > { %v1137_v2 = vpop.f32.mrb[4].mxu1 }
 0x1d0   : > { %v812_v25 = vadd.f32 %v1137_v2, %v674_v22  ;;  %v803_v3 = vpop.f32.mrb[5].mxu1  ;;  %v693_v2 = vld [vmem:[%s1380_s14 + $0xc8] sm:$0xff] }
 0x1d1   : > { %v804_v27 = vadd.f32 %v803_v3, %v672_v23  ;;  %v1138_v28 = vpop.f32.mrb[6].mxu1 }
 0x1d2   : > { %920 = vst.msk [vmem:[%s1388_s17 + $0x30] sm:$0xff] %vm700_vm3, %v812_v25  ;;  %v815_v29 = vadd.f32 %v1138_v28, %v675_v24  ;;  %v806_v30 = vpop.f32.mrb[7].mxu1  ;;  %v698_v28 = vld [vmem:[%s1380_s14 + $0xf0] sm:$0xff] }
 0x1d3   : > { %918 = vst.msk [vmem:[%s1388_s17 + $0x20] sm:$0xff] %vm700_vm3, %v804_v27  ;;  %v807_v31 = vadd.f32 %v806_v30, %v673_v26 }
 0x1d4   : > { %921 = vst.msk [vmem:[%s1388_s17 + $0x38] sm:$0xff] %vm700_vm3, %v815_v29  ;;  %v696_v29 = vld [vmem:[%s1380_s14 + $0xe0] sm:$0xff] }
 0x1d5   : > { %919 = vst.msk [vmem:[%s1388_s17 + $0x28] sm:$0xff] %vm700_vm3, %v807_v31  ;;  %v699_v31 = vld [vmem:[%s1380_s14 + $0xf8] sm:$0xff] }
 0x1d7   : > { %v1141_v34 = vpop.f32.mrb[8].mxu1 }
 0x1d8   : > { %v828_v36 = vadd.f32 %v1141_v34, %v678_v32  ;;  %v819_v37 = vpop.f32.mrb[9].mxu1  ;;  %v697_v34 = vld [vmem:[%s1380_s14 + $0xe8] sm:$0xff] }
 0x1d9   : > { %v820_v39 = vadd.f32 %v819_v37, %v676_v33  ;;  %v1142_v40 = vpop.f32.mrb[10].mxu1 }
 0x1da   : > { %924 = vst.msk [vmem:[%s1388_s17 + $0x50] sm:$0xff] %vm700_vm3, %v828_v36  ;;  %v831_v41 = vadd.f32 %v1142_v40, %v679_v35  ;;  %v822_v42 = vpop.f32.mrb[11].mxu1 }
 0x1db   : > { %922 = vst.msk [vmem:[%s1388_s17 + $0x40] sm:$0xff] %vm700_vm3, %v820_v39  ;;  %v823_v43 = vadd.f32 %v822_v42, %v677_v38 }
 0x1dc   : > { %925 = vst.msk [vmem:[%s1388_s17 + $0x58] sm:$0xff] %vm700_vm3, %v831_v41 }
 0x1dd   : > { %923 = vst.msk [vmem:[%s1388_s17 + $0x48] sm:$0xff] %vm700_vm3, %v823_v43 }
 0x1df   : > { %v1145_v46 = vpop.f32.mrb[12].mxu1 }
 0x1e0   : > { %v844_v48 = vadd.f32 %v1145_v46, %v682_v44  ;;  %v835_v49 = vpop.f32.mrb[13].mxu1 }
 0x1e1   : > { %v836_v51 = vadd.f32 %v835_v49, %v680_v45  ;;  %v1146_v52 = vpop.f32.mrb[14].mxu1 }
 0x1e2   : > { %928 = vst.msk [vmem:[%s1388_s17 + $0x70] sm:$0xff] %vm700_vm3, %v844_v48  ;;  %v847_v53 = vadd.f32 %v1146_v52, %v683_v47  ;;  %v838_v54 = vpop.f32.mrb[15].mxu1 }
 0x1e3   : > { %926 = vst.msk [vmem:[%s1388_s17 + $0x60] sm:$0xff] %vm700_vm3, %v836_v51  ;;  %v839_v55 = vadd.f32 %v838_v54, %v681_v50 }
 0x1e4   : > { %929 = vst.msk [vmem:[%s1388_s17 + $0x78] sm:$0xff] %vm700_vm3, %v847_v53 }
 0x1e5   : > { %927 = vst.msk [vmem:[%s1388_s17 + $0x68] sm:$0xff] %vm700_vm3, %v839_v55 }
 0x1e7   : > { %v1149_v58 = vpop.f32.mrb[16].mxu1 }
 0x1e8   : > { %v860_v60 = vadd.f32 %v1149_v58, %v686_v56  ;;  %v851_v61 = vpop.f32.mrb[17].mxu1 }
 0x1e9   : > { %v852_v63 = vadd.f32 %v851_v61, %v684_v57  ;;  %v1150_v0 = vpop.f32.mrb[18].mxu1 }
 0x1ea   : > { %932 = vst.msk [vmem:[%s1388_s17 + $0x90] sm:$0xff] %vm700_vm3, %v860_v60  ;;  %v863_v1 = vadd.f32 %v1150_v0, %v687_v59  ;;  %v854_v4 = vpop.f32.mrb[19].mxu1 }
 0x1eb   : > { %930 = vst.msk [vmem:[%s1388_s17 + $0x80] sm:$0xff] %vm700_vm3, %v852_v63  ;;  %v855_v5 = vadd.f32 %v854_v4, %v685_v62 }
 0x1ec   : > { %933 = vst.msk [vmem:[%s1388_s17 + $0x98] sm:$0xff] %vm700_vm3, %v863_v1 }
 0x1ed   : > { %931 = vst.msk [vmem:[%s1388_s17 + $0x88] sm:$0xff] %vm700_vm3, %v855_v5 }
 0x1ef   : > { %v1153_v8 = vpop.f32.mrb[20].mxu1 }
 0x1f0   : > { %v876_v10 = vadd.f32 %v1153_v8, %v690_v6  ;;  %v867_v11 = vpop.f32.mrb[21].mxu1 }
 0x1f1   : > { %v868_v13 = vadd.f32 %v867_v11, %v688_v7  ;;  %v1154_v14 = vpop.f32.mrb[22].mxu1 }
 0x1f2   : > { %936 = vst.msk [vmem:[%s1388_s17 + $0xb0] sm:$0xff] %vm700_vm3, %v876_v10  ;;  %v879_v15 = vadd.f32 %v1154_v14, %v691_v9  ;;  %v870_v16 = vpop.f32.mrb[23].mxu1 }
 0x1f3   : > { %934 = vst.msk [vmem:[%s1388_s17 + $0xa0] sm:$0xff] %vm700_vm3, %v868_v13  ;;  %v871_v17 = vadd.f32 %v870_v16, %v689_v12 }
 0x1f4   : > { %937 = vst.msk [vmem:[%s1388_s17 + $0xb8] sm:$0xff] %vm700_vm3, %v879_v15 }
 0x1f5   : > { %935 = vst.msk [vmem:[%s1388_s17 + $0xa8] sm:$0xff] %vm700_vm3, %v871_v17 }
 0x1f7   : > { %v1157_v20 = vpop.f32.mrb[24].mxu1 }
 0x1f8   : > { %v892_v22 = vadd.f32 %v1157_v20, %v694_v18  ;;  %v883_v23 = vpop.f32.mrb[25].mxu1 }
 0x1f9   : > { %v884_v24 = vadd.f32 %v883_v23, %v692_v19  ;;  %v1158_v25 = vpop.f32.mrb[26].mxu1 }
 0x1fa   : > { %940 = vst.msk [vmem:[%s1388_s17 + $0xd0] sm:$0xff] %vm700_vm3, %v892_v22  ;;  %v895_v3 = vadd.f32 %v1158_v25, %v695_v21  ;;  %v886_v26 = vpop.f32.mrb[27].mxu1 }
 0x1fb   : > { %938 = vst.msk [vmem:[%s1388_s17 + $0xc0] sm:$0xff] %vm700_vm3, %v884_v24  ;;  %v887_v27 = vadd.f32 %v886_v26, %v693_v2 }
 0x1fc   : > { %941 = vst.msk [vmem:[%s1388_s17 + $0xd8] sm:$0xff] %vm700_vm3, %v895_v3 }
 0x1fd   : > { %939 = vst.msk [vmem:[%s1388_s17 + $0xc8] sm:$0xff] %vm700_vm3, %v887_v27 }
 0x1ff   : > { %v1161_v30 = vpop.f32.mrb[28].mxu1 }
 0x200   : > { %v908_v32 = vadd.f32 %v1161_v30, %v698_v28  ;;  %v899_v33 = vpop.f32.mrb[29].mxu1 }
 0x201   : > { %v900_v35 = vadd.f32 %v899_v33, %v696_v29  ;;  %v1162_v36 = vpop.f32.mrb[30].mxu1 }
 0x202   : > { %944 = vst.msk [vmem:[%s1388_s17 + $0xf0] sm:$0xff] %vm700_vm3, %v908_v32  ;;  %v911_v37 = vadd.f32 %v1162_v36, %v699_v31  ;;  %v902_v38 = vpop.f32.mrb[31].mxu1 }
 0x203   : > { %942 = vst.msk [vmem:[%s1388_s17 + $0xe0] sm:$0xff] %vm700_vm3, %v900_v35  ;;  %v903_v39 = vadd.f32 %v902_v38, %v697_v34 }
 0x204   : > { %945 = vst.msk [vmem:[%s1388_s17 + $0xf8] sm:$0xff] %vm700_vm3, %v911_v37 }
 0x205   : > { %943 = vst.msk [vmem:[%s1388_s17 + $0xe8] sm:$0xff] %vm700_vm3, %v903_v39 }
 0x206 PF: > { %s16_s21 = sadd.s32 1, %s1179_s21  }
 0x207   : > { %p13_p4 = scmp.ge.s32.totalorder %s16_s21, 4  }
 0x209   :  { %15 = sbr.rel (!%p13_p4) target bundleno = 1 (0x1), region = 77 }

// kernel: _lambda_.13
= control target key start
LH: loop header
LB: loop body
LE: loop exit
PB: predicated region body
PF: predicated region fallthrough
CT: control target
= control target key end

     0   :  { %vm206_vm0 = vcmask 1045504   ;;  %vm181_vm1 = vcmask 97280   ;;  %vm433_vm2 = vcmask 130048   ;;  %s741_s3 = inlined_call_operand.vmem [shape: bf16[12,16], index: 3, kind: input, shape index: {}]   ;;  %s742_s0 = inlined_call_operand.vmem [shape: f32[128,12], index: 0, kind: input, shape index: {}]   ;;  %s743_s1 = inlined_call_operand.vmem [shape: f32[1,12], index: 1, kind: input, shape index: {}]   ;;  %s744_s2 = inlined_call_operand.vmem [shape: f32[1,12], index: 2, kind: input, shape index: {}]   ;;  %s745_s4 = inlined_call_operand.vmem [shape: f32[1,16], index: 4, kind: input, shape index: {}]   ;;  %s746_s5 = inlined_call_operand.vmem [shape: f32[1,16], index: 5, kind: input, shape index: {}]   ;;  %s747_s6 = inlined_call_operand.vmem [shape: f32[128,16], index: 6, kind: output, shape index: {}]  }
   0x1   :  { %v498_v0 = vld [vmem:[%s741_s3] sm:$0x3f]   ;;  %v25_v2 = vld [vmem:[%s742_s0 + $0x8] sm:$0xff]  ;;  %v26_v12 = vld [vmem:[%s742_s0 + $0x10] sm:$0xff] }
   0x2   :  { %v24_v1 = vld [vmem:[%s742_s0] sm:$0xff]  ;;  %496 = vmatprep.subr.msk.bf16.mxu0 %vm206_vm0, %v498_v0  ;;  %497 = vmatprep.subr.msk.bf16.mxu1 %vm206_vm0, %v498_v0  ;;  %v208_v4 = vsel %vm206_vm0, %v498_v0, 0  ;;  %v33_v9 = vld [vmem:[%s742_s0 + $0x48] sm:$0xff]  ;;  %v27_v13 = vld [vmem:[%s742_s0 + $0x18] sm:$0xff] }
   0x3   :  { %v546_v3 = vld [vmem:[%s743_s1] ss:$0 sm:$0xff]  ;;  %477 = vmatpush3.bf16.msra.mxu0 %v208_v4  ;;  %495 = vmatpush3.bf16.msra.mxu1 %v208_v4  ;;  %v34_v14 = vld [vmem:[%s742_s0 + $0x50] sm:$0xff]  ;;  %v35_v19 = vld [vmem:[%s742_s0 + $0x58] sm:$0xff] }
   0x4   :  { %v47_v5 = vmul.f32 %v546_v3, %v24_v1  ;;  %v48_v6 = vmul.f32 %v546_v3, %v25_v2  ;;  %v553_v7 = vld [vmem:[%s744_s2] ss:$0 sm:$0xff]  ;;  %v56_v11 = vmul.f32 %v546_v3, %v33_v9  ;;  %v49_v17 = vmul.f32 %v546_v3, %v26_v12  ;;  %v29_v61 = vld [vmem:[%s742_s0 + $0x28] sm:$0xff] }
   0x5   :  { %v32_v8 = vld [vmem:[%s742_s0 + $0x40] sm:$0xff]  ;;  %v50_v18 = vmul.f32 %v546_v3, %v27_v13  ;;  %v57_v22 = vmul.f32 %v546_v3, %v34_v14  ;;  %v58_v23 = vmul.f32 %v546_v3, %v35_v19  ;;  %v37_v4 = vld [vmem:[%s742_s0 + $0x68] sm:$0xff] }
   0x6   :  { %v55_v10 = vmul.f32 %v546_v3, %v32_v8  ;;  %v70_v15 = vadd.f32 %v553_v7, %v47_v5  ;;  %v71_v16 = vadd.f32 %v553_v7, %v48_v6  ;;  %v79_v21 = vadd.f32 %v553_v7, %v56_v11  ;;  %v28_v56 = vld [vmem:[%s742_s0 + $0x20] sm:$0xff]  ;;  %v31_v11 = vld [vmem:[%s742_s0 + $0x38] sm:$0xff] }
   0x7   :  { %v72_v26 = vadd.f32 %v553_v7, %v49_v17  ;;  %v73_v27 = vadd.f32 %v553_v7, %v50_v18  ;;  %v80_v30 = vadd.f32 %v553_v7, %v57_v22  ;;  %v81_v31 = vadd.f32 %v553_v7, %v58_v23  ;;  %v36_v2 = vld [vmem:[%s742_s0 + $0x60] sm:$0xff] }
   0x8   :  { %v78_v20 = vadd.f32 %v553_v7, %v55_v10  ;;  %v86_v24 = vadd.f32 3.0, %v70_v15  ;;  %v87_v25 = vadd.f32 3.0, %v71_v16  ;;  %v95_v29 = vadd.f32 3.0, %v79_v21  ;;  %v30_v10 = vld [vmem:[%s742_s0 + $0x30] sm:$0xff] }
   0x9   :  { %v88_v34 = vadd.f32 3.0, %v72_v26  ;;  %v89_v35 = vadd.f32 3.0, %v73_v27  ;;  %v96_v38 = vadd.f32 3.0, %v80_v30  ;;  %v97_v39 = vadd.f32 3.0, %v81_v31 }
   0xa   :  { %v94_v28 = vadd.f32 3.0, %v78_v20  ;;  %v102_v32 = vmax.f32 %v86_v24, 0.0  ;;  %v103_v33 = vmax.f32 %v87_v25, 0.0  ;;  %v111_v37 = vmax.f32 %v95_v29, 0.0 }
   0xb   :  { %v104_v42 = vmax.f32 %v88_v34, 0.0  ;;  %v105_v43 = vmax.f32 %v89_v35, 0.0  ;;  %v112_v46 = vmax.f32 %v96_v38, 0.0  ;;  %v113_v47 = vmax.f32 %v97_v39, 0.0 }
   0xc   :  { %v110_v36 = vmax.f32 %v94_v28, 0.0  ;;  %v118_v40 = vmin.f32 %v102_v32, 6.0  ;;  %v119_v41 = vmin.f32 %v103_v33, 6.0  ;;  %v127_v45 = vmin.f32 %v111_v37, 6.0 }
   0xd   :  { %v120_v50 = vmin.f32 %v104_v42, 6.0  ;;  %v121_v51 = vmin.f32 %v105_v43, 6.0  ;;  %v128_v54 = vmin.f32 %v112_v46, 6.0  ;;  %v129_v55 = vmin.f32 %v113_v47, 6.0 }
   0xe   :  { %v126_v44 = vmin.f32 %v110_v36, 6.0  ;;  %v134_v48 = vmul.f32 %v118_v40, %v70_v15  ;;  %v135_v49 = vmul.f32 %v119_v41, %v71_v16  ;;  %v143_v53 = vmul.f32 %v127_v45, %v79_v21  ;;  %v38_v16 = vld [vmem:[%s742_s0 + $0x70] sm:$0xff]  ;;  %v39_v21 = vld [vmem:[%s742_s0 + $0x78] sm:$0xff] }
   0xf   :  { %v136_v59 = vmul.f32 %v120_v50, %v72_v26  ;;  %v137_v60 = vmul.f32 %v121_v51, %v73_v27  ;;  %v144_v0 = vmul.f32 %v128_v54, %v80_v30  ;;  %v145_v1 = vmul.f32 %v129_v55, %v81_v31 }
  0x10   :  { %v142_v52 = vmul.f32 %v126_v44, %v78_v20  ;;  %v150_v57 = vmul.f32 0.16666667, %v134_v48  ;;  %v151_v58 = vmul.f32 0.16666667, %v135_v49  ;;  %v159_v63 = vmul.f32 0.16666667, %v143_v53 }
  0x11   :  { %v152_v6 = vmul.f32 0.16666667, %v136_v59  ;;  %v153_v8 = vmul.f32 0.16666667, %v137_v60  ;;  %v51_v9 = vmul.f32 %v546_v3, %v28_v56  ;;  %v160_v13 = vmul.f32 0.16666667, %v144_v0 }
  0x12   :  { %v158_v62 = vmul.f32 0.16666667, %v142_v52  ;;  %v166_v5 = vpack.c.bf16 %v151_v58, %v150_v57  ;;  %v161_v14 = vmul.f32 0.16666667, %v145_v1  ;;  %v52_v15 = vmul.f32 %v546_v3, %v29_v61 }
  0x13   :  { %v167_v17 = vpack.c.bf16 %v153_v8, %v152_v6  ;;  %v74_v18 = vadd.f32 %v553_v7, %v51_v9  ;;  %v59_v19 = vmul.f32 %v546_v3, %v36_v2  ;;  %v60_v20 = vmul.f32 %v546_v3, %v37_v4 }
  0x14   :  { %v170_v12 = vpack.c.bf16 %v159_v63, %v158_v62  ;;  %478 = vmatprep.mubr.msk.bf16.mxu0 %vm181_vm1, %v166_v5  ;;  %v171_v22 = vpack.c.bf16 %v161_v14, %v160_v13  ;;  %v75_v23 = vadd.f32 %v553_v7, %v52_v15  ;;  %v53_v24 = vmul.f32 %v546_v3, %v30_v10  ;;  %v638_v14 = vld [vmem:[%s745_s4] ss:$0 sm:$0xff] }
  0x15   :  { %v54_v25 = vmul.f32 %v546_v3, %v31_v11  ;;  %479 = vmatmul.mubr.msk.bf16.vlgmr.msra.gmra.mrb[0].mxu0 %vm181_vm1, %v167_v17  ;;  %v90_v26 = vadd.f32 3.0, %v74_v18  ;;  %v82_v27 = vadd.f32 %v553_v7, %v59_v19  ;;  %v83_v28 = vadd.f32 %v553_v7, %v60_v20 }
  0x16   :  { %486 = vmatprep.mubr.msk.bf16.mxu1 %vm181_vm1, %v170_v12  ;;  %v61_v29 = vmul.f32 %v546_v3, %v38_v16  ;;  %v91_v30 = vadd.f32 3.0, %v75_v23  ;;  %v76_v31 = vadd.f32 %v553_v7, %v53_v24  ;;  %v62_v33 = vmul.f32 %v546_v3, %v39_v21  ;;  %v643_v16 = vld [vmem:[%s746_s5] ss:$0 sm:$0xff] }
  0x17   :  { %487 = vmatmul.mubr.msk.bf16.vlgmr.msra.gmra.mrb[0].mxu1 %vm181_vm1, %v171_v22  ;;  %v77_v32 = vadd.f32 %v553_v7, %v54_v25  ;;  %v106_v34 = vmax.f32 %v90_v26, 0.0  ;;  %v98_v35 = vadd.f32 3.0, %v82_v27  ;;  %v99_v36 = vadd.f32 3.0, %v83_v28 }
  0x18   :  { %v84_v37 = vadd.f32 %v553_v7, %v61_v29  ;;  %v107_v38 = vmax.f32 %v91_v30, 0.0  ;;  %v92_v39 = vadd.f32 3.0, %v76_v31  ;;  %v85_v41 = vadd.f32 %v553_v7, %v62_v33 }
  0x19   :  { %v93_v40 = vadd.f32 3.0, %v77_v32  ;;  %v122_v42 = vmin.f32 %v106_v34, 6.0  ;;  %v114_v43 = vmax.f32 %v98_v35, 0.0  ;;  %v115_v44 = vmax.f32 %v99_v36, 0.0 }
  0x1a   :  { %v100_v45 = vadd.f32 3.0, %v84_v37  ;;  %v123_v46 = vmin.f32 %v107_v38, 6.0  ;;  %v108_v47 = vmax.f32 %v92_v39, 0.0  ;;  %v101_v49 = vadd.f32 3.0, %v85_v41 }
  0x1b   :  { %v109_v48 = vmax.f32 %v93_v40, 0.0  ;;  %v138_v50 = vmul.f32 %v122_v42, %v74_v18  ;;  %v130_v3 = vmin.f32 %v114_v43, 6.0  ;;  %v131_v51 = vmin.f32 %v115_v44, 6.0 }
  0x1c   :  { %v116_v52 = vmax.f32 %v100_v45, 0.0  ;;  %v139_v53 = vmul.f32 %v123_v46, %v75_v23  ;;  %v124_v54 = vmin.f32 %v108_v47, 6.0  ;;  %v117_v56 = vmax.f32 %v101_v49, 0.0 }
  0x1d   :  { %v125_v55 = vmin.f32 %v109_v48, 6.0  ;;  %v154_v57 = vmul.f32 0.16666667, %v138_v50  ;;  %v146_v58 = vmul.f32 %v130_v3, %v82_v27  ;;  %v147_v59 = vmul.f32 %v131_v51, %v83_v28 }
  0x1e   :  { %v132_v7 = vmin.f32 %v116_v52, 6.0  ;;  %v155_v60 = vmul.f32 0.16666667, %v139_v53  ;;  %v140_v61 = vmul.f32 %v124_v54, %v76_v31  ;;  %v133_v63 = vmin.f32 %v117_v56, 6.0 }
  0x1f   :  { %v141_v62 = vmul.f32 %v125_v55, %v77_v32  ;;  %v162_v0 = vmul.f32 0.16666667, %v146_v58  ;;  %v163_v1 = vmul.f32 0.16666667, %v147_v59 }
  0x20   :  { %v148_v2 = vmul.f32 %v132_v7, %v84_v37  ;;  %v168_v4 = vpack.c.bf16 %v155_v60, %v154_v57  ;;  %v156_v5 = vmul.f32 0.16666667, %v140_v61  ;;  %v149_v8 = vmul.f32 %v133_v63, %v85_v41 }
  0x21   :  { %v157_v6 = vmul.f32 0.16666667, %v141_v62  ;;  %v172_v9 = vpack.c.bf16 %v163_v1, %v162_v0 }
  0x22   :  { %v164_v10 = vmul.f32 0.16666667, %v148_v2  ;;  %482 = vmatprep.mubr.msk.bf16.mxu0 %vm181_vm1, %v168_v4  ;;  %v165_v12 = vmul.f32 0.16666667, %v149_v8 }
  0x23   :  { %v169_v11 = vpack.c.bf16 %v157_v6, %v156_v5  ;;  %490 = vmatprep.mubr.msk.bf16.mxu1 %vm181_vm1, %v172_v9 }
  0x24   :  { %v173_v13 = vpack.c.bf16 %v165_v12, %v164_v10 }
  0x25   :  { %483 = vmatmul.mubr.msk.bf16.gmra.mrb[4].mxu0 %vm181_vm1, %v169_v11 }
  0x26   :  { %491 = vmatmul.mubr.msk.bf16.gmra.mrb[4].mxu1 %vm181_vm1, %v173_v13 }
  0xe8   :  { %v480_v15 = vpop.f32.mrb[0].mxu0 }
  0xe9   :  { %v316_v17 = vmul.f32 %v480_v15, %v638_v14  ;;  %v244_v19 = vpop.f32.mrb[1].mxu0 }
  0xea   :  { %v488_v18 = vpop.f32.mrb[0].mxu1  ;;  %v314_v21 = vmul.f32 %v638_v14, %v244_v19  ;;  %v481_v23 = vpop.f32.mrb[2].mxu0 }
  0xeb   :  { %v324_v20 = vmul.f32 %v488_v18, %v638_v14  ;;  %v276_v22 = vpop.f32.mrb[1].mxu1  ;;  %v339_v24 = vadd.f32 %v643_v16, %v316_v17  ;;  %v317_v26 = vmul.f32 %v481_v23, %v638_v14  ;;  %v247_v28 = vpop.f32.mrb[3].mxu0 }
  0xec   :  { %v322_v25 = vmul.f32 %v638_v14, %v276_v22  ;;  %v489_v27 = vpop.f32.mrb[2].mxu1  ;;  %v337_v30 = vadd.f32 %v643_v16, %v314_v21  ;;  %v315_v32 = vmul.f32 %v638_v14, %v247_v28 }
  0xed   :  { %v347_v29 = vadd.f32 %v643_v16, %v324_v20  ;;  %v325_v31 = vmul.f32 %v489_v27, %v638_v14  ;;  %v279_v33 = vpop.f32.mrb[3].mxu1  ;;  %v355_v34 = vadd.f32 3.0, %v339_v24  ;;  %v340_v36 = vadd.f32 %v643_v16, %v317_v26 }
  0xee   :  { %v345_v35 = vadd.f32 %v643_v16, %v322_v25  ;;  %v323_v37 = vmul.f32 %v638_v14, %v279_v33  ;;  %v353_v39 = vadd.f32 3.0, %v337_v30  ;;  %v338_v41 = vadd.f32 %v643_v16, %v315_v32 }
  0xef   :  { %v363_v38 = vadd.f32 3.0, %v347_v29  ;;  %v348_v40 = vadd.f32 %v643_v16, %v325_v31  ;;  %v371_v42 = vmax.f32 %v355_v34, 0.0  ;;  %v356_v44 = vadd.f32 3.0, %v340_v36 }
  0xf0   :  { %v361_v43 = vadd.f32 3.0, %v345_v35  ;;  %v346_v45 = vadd.f32 %v643_v16, %v323_v37  ;;  %v369_v47 = vmax.f32 %v353_v39, 0.0  ;;  %v354_v49 = vadd.f32 3.0, %v338_v41 }
  0xf1   :  { %v379_v46 = vmax.f32 %v363_v38, 0.0  ;;  %v364_v48 = vadd.f32 3.0, %v348_v40  ;;  %v387_v50 = vmin.f32 %v371_v42, 6.0  ;;  %v372_v51 = vmax.f32 %v356_v44, 0.0 }
  0xf2   :  { %v377_v3 = vmax.f32 %v361_v43, 0.0  ;;  %v362_v52 = vadd.f32 3.0, %v346_v45  ;;  %v385_v54 = vmin.f32 %v369_v47, 6.0  ;;  %v370_v56 = vmax.f32 %v354_v49, 0.0 }
  0xf3   :  { %v395_v53 = vmin.f32 %v379_v46, 6.0  ;;  %v380_v55 = vmax.f32 %v364_v48, 0.0  ;;  %v403_v57 = vmul.f32 %v387_v50, %v339_v24  ;;  %v388_v59 = vmin.f32 %v372_v51, 6.0 }
  0xf4   :  { %v393_v58 = vmin.f32 %v377_v3, 6.0  ;;  %v378_v7 = vmax.f32 %v362_v52, 0.0  ;;  %v401_v61 = vmul.f32 %v385_v54, %v337_v30  ;;  %v386_v63 = vmin.f32 %v370_v56, 6.0 }
  0xf5   :  { %v411_v60 = vmul.f32 %v395_v53, %v347_v29  ;;  %v396_v62 = vmin.f32 %v380_v55, 6.0  ;;  %v419_v0 = vmul.f32 0.16666667, %v403_v57  ;;  %v404_v2 = vmul.f32 %v388_v59, %v340_v36 }
  0xf6   :  { %v409_v1 = vmul.f32 %v393_v58, %v345_v35  ;;  %v394_v4 = vmin.f32 %v378_v7, 6.0  ;;  %v417_v6 = vmul.f32 0.16666667, %v401_v61  ;;  %v402_v9 = vmul.f32 %v386_v63, %v338_v41 }
  0xf7   :  { %v427_v5 = vmul.f32 0.16666667, %v411_v60  ;;  %v412_v8 = vmul.f32 %v396_v62, %v348_v40  ;;  %436 = vst.msk [vmem:[%s747_s6 + $0x10] sm:$0xff] %vm433_vm2, %v419_v0  ;;  %v420_v11 = vmul.f32 0.16666667, %v404_v2 }
  0xf8   :  { %v425_v10 = vmul.f32 0.16666667, %v409_v1  ;;  %v410_v12 = vmul.f32 %v394_v4, %v346_v45  ;;  %v484_v13 = vpop.f32.mrb[4].mxu0  ;;  %434 = vst.msk [vmem:[%s747_s6] sm:$0xff] %vm433_vm2, %v417_v6  ;;  %v418_v17 = vmul.f32 0.16666667, %v402_v9 }
  0xf9   :  { %444 = vst.msk [vmem:[%s747_s6 + $0x50] sm:$0xff] %vm433_vm2, %v427_v5  ;;  %v428_v15 = vmul.f32 0.16666667, %v412_v8  ;;  %v320_v18 = vmul.f32 %v484_v13, %v638_v14  ;;  %v260_v19 = vpop.f32.mrb[5].mxu0  ;;  %437 = vst.msk [vmem:[%s747_s6 + $0x18] sm:$0xff] %vm433_vm2, %v420_v11  ;;  %v492_v21 = vpop.f32.mrb[4].mxu1 }
  0xfa   :  { %442 = vst.msk [vmem:[%s747_s6 + $0x40] sm:$0xff] %vm433_vm2, %v425_v10  ;;  %v426_v20 = vmul.f32 0.16666667, %v410_v12  ;;  %v318_v22 = vmul.f32 %v638_v14, %v260_v19  ;;  %v485_v23 = vpop.f32.mrb[6].mxu0  ;;  %435 = vst.msk [vmem:[%s747_s6 + $0x8] sm:$0xff] %vm433_vm2, %v418_v17  ;;  %v328_v25 = vmul.f32 %v492_v21, %v638_v14  ;;  %v292_v26 = vpop.f32.mrb[5].mxu1 }
  0xfb   :  { %445 = vst.msk [vmem:[%s747_s6 + $0x58] sm:$0xff] %vm433_vm2, %v428_v15  ;;  %v343_v24 = vadd.f32 %v643_v16, %v320_v18  ;;  %v321_v27 = vmul.f32 %v485_v23, %v638_v14  ;;  %v263_v28 = vpop.f32.mrb[7].mxu0  ;;  %v326_v30 = vmul.f32 %v638_v14, %v292_v26  ;;  %v493_v31 = vpop.f32.mrb[6].mxu1 }
  0xfc   :  { %443 = vst.msk [vmem:[%s747_s6 + $0x48] sm:$0xff] %vm433_vm2, %v426_v20  ;;  %v341_v29 = vadd.f32 %v643_v16, %v318_v22  ;;  %v319_v32 = vmul.f32 %v638_v14, %v263_v28  ;;  %v351_v34 = vadd.f32 %v643_v16, %v328_v25  ;;  %v329_v36 = vmul.f32 %v493_v31, %v638_v14  ;;  %v295_v37 = vpop.f32.mrb[7].mxu1 }
  0xfd   :  { %v359_v33 = vadd.f32 3.0, %v343_v24  ;;  %v344_v35 = vadd.f32 %v643_v16, %v321_v27  ;;  %v349_v39 = vadd.f32 %v643_v16, %v326_v30  ;;  %v327_v41 = vmul.f32 %v638_v14, %v295_v37 }
  0xfe   :  { %v357_v38 = vadd.f32 3.0, %v341_v29  ;;  %v342_v40 = vadd.f32 %v643_v16, %v319_v32  ;;  %v367_v43 = vadd.f32 3.0, %v351_v34  ;;  %v352_v45 = vadd.f32 %v643_v16, %v329_v36 }
  0xff   :  { %v375_v42 = vmax.f32 %v359_v33, 0.0  ;;  %v360_v44 = vadd.f32 3.0, %v344_v35  ;;  %v365_v47 = vadd.f32 3.0, %v349_v39  ;;  %v350_v49 = vadd.f32 %v643_v16, %v327_v41 }
 0x100   :  { %v373_v46 = vmax.f32 %v357_v38, 0.0  ;;  %v358_v48 = vadd.f32 3.0, %v342_v40  ;;  %v383_v3 = vmax.f32 %v367_v43, 0.0  ;;  %v368_v52 = vadd.f32 3.0, %v352_v45 }
 0x101   :  { %v391_v50 = vmin.f32 %v375_v42, 6.0  ;;  %v376_v51 = vmax.f32 %v360_v44, 0.0  ;;  %v381_v54 = vmax.f32 %v365_v47, 0.0  ;;  %v366_v56 = vadd.f32 3.0, %v350_v49 }
 0x102   :  { %v389_v53 = vmin.f32 %v373_v46, 6.0  ;;  %v374_v55 = vmax.f32 %v358_v48, 0.0  ;;  %v399_v14 = vmin.f32 %v383_v3, 6.0  ;;  %v384_v59 = vmax.f32 %v368_v52, 0.0 }
 0x103   :  { %v407_v57 = vmul.f32 %v391_v50, %v343_v24  ;;  %v392_v58 = vmin.f32 %v376_v51, 6.0  ;;  %v397_v60 = vmin.f32 %v381_v54, 6.0  ;;  %v382_v62 = vmax.f32 %v366_v56, 0.0 }
 0x104   :  { %v405_v7 = vmul.f32 %v389_v53, %v341_v29  ;;  %v390_v61 = vmin.f32 %v374_v55, 6.0  ;;  %v415_v0 = vmul.f32 %v399_v14, %v351_v34  ;;  %v400_v16 = vmin.f32 %v384_v59, 6.0 }
 0x105   :  { %v423_v63 = vmul.f32 0.16666667, %v407_v57  ;;  %v408_v1 = vmul.f32 %v392_v58, %v344_v35  ;;  %v413_v4 = vmul.f32 %v397_v60, %v349_v39  ;;  %v398_v6 = vmin.f32 %v382_v62, 6.0 }
 0x106   :  { %v421_v2 = vmul.f32 0.16666667, %v405_v7  ;;  %v406_v5 = vmul.f32 %v390_v61, %v342_v40  ;;  %v431_v8 = vmul.f32 0.16666667, %v415_v0  ;;  %v416_v10 = vmul.f32 %v400_v16, %v352_v45 }
 0x107   :  { %440 = vst.msk [vmem:[%s747_s6 + $0x30] sm:$0xff] %vm433_vm2, %v423_v63  ;;  %v424_v9 = vmul.f32 0.16666667, %v408_v1  ;;  %v429_v11 = vmul.f32 0.16666667, %v413_v4  ;;  %v414_v13 = vmul.f32 %v398_v6, %v350_v49 }
 0x108   :  { %438 = vst.msk [vmem:[%s747_s6 + $0x20] sm:$0xff] %vm433_vm2, %v421_v2  ;;  %v422_v12 = vmul.f32 0.16666667, %v406_v5  ;;  %448 = vst.msk [vmem:[%s747_s6 + $0x70] sm:$0xff] %vm433_vm2, %v431_v8  ;;  %v432_v15 = vmul.f32 0.16666667, %v416_v10 }
 0x109   :  { %441 = vst.msk [vmem:[%s747_s6 + $0x38] sm:$0xff] %vm433_vm2, %v424_v9  ;;  %446 = vst.msk [vmem:[%s747_s6 + $0x60] sm:$0xff] %vm433_vm2, %v429_v11  ;;  %v430_v17 = vmul.f32 0.16666667, %v414_v13 }
 0x10a   :  { %439 = vst.msk [vmem:[%s747_s6 + $0x28] sm:$0xff] %vm433_vm2, %v422_v12  ;;  %449 = vst.msk [vmem:[%s747_s6 + $0x78] sm:$0xff] %vm433_vm2, %v432_v15 }
 0x10b   :  { %447 = vst.msk [vmem:[%s747_s6 + $0x68] sm:$0xff] %vm433_vm2, %v430_v17 }

// kernel: _lambda_.14
= control target key start
LH: loop header
LB: loop body
LE: loop exit
PB: predicated region body
PF: predicated region fallthrough
CT: control target
= control target key end

     0   :  { %v400_v0 = vmov 0   ;;  %vm172_vm0 = vcmask 130048   ;;  %vm294_vm1 = vcmask 31744   ;;  %s563_s1 = inlined_call_operand.vmem [shape: bf16[144,4], index: 1, kind: input, shape index: {}]   ;;  %s564_s0 = inlined_call_operand.vmem [shape: bf16[128,144], index: 0, kind: input, shape index: {}]   ;;  %s565_s2 = inlined_call_operand.vmem [shape: f32[128,4], index: 2, kind: output, shape index: {}]  }
   0x1   :  { %197 = vmatprep.subr.bf16.mxu0 %v400_v0  ;;  %348 = vmatprep.subr.bf16.mxu1 %v400_v0  ;;  %v367_v1 = vld [vmem:[%s563_s1] sm:$0xff]   ;;  %v368_v2 = vld [vmem:[%s563_s1 + $0x8] sm:$0xff]   ;;  %v369_v3 = vld [vmem:[%s563_s1 + $0x10] sm:$0xff]  }
   0x2   :  { %198 = vmatpush1.bf16.msra.mxu0 %v367_v1  ;;  %357 = vmatpush1.bf16.msra.mxu1 %v367_v1  ;;  %v370_v4 = vld [vmem:[%s563_s1 + $0x18] sm:$0xff]   ;;  %v378_v5 = vld [vmem:[%s564_s0 + $0x4] ss:$8 sps:$4 sm:$0xff]   ;;  %v373_v9 = vld [vmem:[%s563_s1 + $0x30] sm:$0xff]  }
   0x3   :  { %199 = vmatprep.subr.bf16.mxu0 %v400_v0  ;;  %349 = vmatprep.subr.bf16.mxu1 %v400_v0  ;;  %v381_v6 = vld [vmem:[%s564_s0 + $0x44] ss:$8 sps:$4 sm:$0xff]   ;;  %v374_v10 = vld [vmem:[%s563_s1 + $0x38] sm:$0xff]   ;;  %v376_v12 = vld [vmem:[%s564_s0] ss:$8 sps:$4 sm:$0xff]  }
   0x4   :  { %340 = vmatprep.mubr.msk.bf16.mxu0 %vm172_vm0, %v378_v5  ;;  %344 = vmatprep.mubr.msk.bf16.mxu1 %vm172_vm0, %v381_v6  ;;  %v371_v7 = vld [vmem:[%s563_s1 + $0x20] sm:$0xff]   ;;  %v372_v8 = vld [vmem:[%s563_s1 + $0x28] sm:$0xff]   ;;  %v382_v14 = vld [vmem:[%s564_s0 + $0x14] ss:$8 sps:$4 sm:$0xff]  }
   0x5   :  { %v375_v11 = vld [vmem:[%s563_s1 + $0x40] sm:$0xff]   ;;  %v384_v15 = vld [vmem:[%s564_s0 + $0x54] ss:$8 sps:$4 sm:$0xff]   ;;  %v386_v16 = vld [vmem:[%s564_s0 + $0x10] ss:$8 sps:$4 sm:$0xff]  }
   0x6   :  { %200 = vmatpush1.bf16.msra.mxu0 %v368_v2  ;;  %358 = vmatpush1.bf16.msra.mxu1 %v368_v2  ;;  %v379_v13 = vld [vmem:[%s564_s0 + $0x40] ss:$8 sps:$4 sm:$0xff]   ;;  %v387_v17 = vld [vmem:[%s564_s0 + $0x50] ss:$8 sps:$4 sm:$0xff]   ;;  %v388_v18 = vld [vmem:[%s564_s0 + $0x24] ss:$8 sps:$4 sm:$0xff]  }
   0x7   :  { %201 = vmatprep.subr.bf16.mxu0 %v400_v0  ;;  %350 = vmatprep.subr.bf16.mxu1 %v400_v0  ;;  %v390_v19 = vld [vmem:[%s564_s0 + $0x64] ss:$8 sps:$4 sm:$0xff]   ;;  %v392_v20 = vld [vmem:[%s564_s0 + $0x20] ss:$8 sps:$4 sm:$0xff]   ;;  %v394_v22 = vld [vmem:[%s564_s0 + $0x34] ss:$8 sps:$4 sm:$0xff]  }
   0x8   :  { %v393_v21 = vld [vmem:[%s564_s0 + $0x60] ss:$8 sps:$4 sm:$0xff]   ;;  %v396_v23 = vld [vmem:[%s564_s0 + $0x74] ss:$8 sps:$4 sm:$0xff]   ;;  %v398_v24 = vld [vmem:[%s564_s0 + $0x30] ss:$8 sps:$4 sm:$0xff]  }
   0x9   :  { %v399_v25 = vld [vmem:[%s564_s0 + $0x70] ss:$8 sps:$4 sm:$0xff]  }
   0xa   :  { %202 = vmatpush1.bf16.msra.mxu0 %v369_v3  ;;  %359 = vmatpush1.bf16.msra.mxu1 %v369_v3 }
   0xb   :  { %203 = vmatprep.subr.bf16.mxu0 %v400_v0  ;;  %351 = vmatprep.subr.bf16.mxu1 %v400_v0 }
   0xe   :  { %204 = vmatpush1.bf16.msra.mxu0 %v370_v4  ;;  %360 = vmatpush1.bf16.msra.mxu1 %v370_v4 }
   0xf   :  { %205 = vmatprep.subr.bf16.mxu0 %v400_v0  ;;  %352 = vmatprep.subr.bf16.mxu1 %v400_v0 }
  0x12   :  { %206 = vmatpush1.bf16.msra.mxu0 %v371_v7  ;;  %361 = vmatpush1.bf16.msra.mxu1 %v371_v7 }
  0x13   :  { %207 = vmatprep.subr.bf16.mxu0 %v400_v0  ;;  %353 = vmatprep.subr.bf16.mxu1 %v400_v0 }
  0x16   :  { %208 = vmatpush1.bf16.msra.mxu0 %v372_v8  ;;  %362 = vmatpush1.bf16.msra.mxu1 %v372_v8 }
  0x17   :  { %209 = vmatprep.subr.bf16.mxu0 %v400_v0  ;;  %354 = vmatprep.subr.bf16.mxu1 %v400_v0 }
  0x1a   :  { %210 = vmatpush1.bf16.msra.mxu0 %v373_v9  ;;  %363 = vmatpush1.bf16.msra.mxu1 %v373_v9 }
  0x1b   :  { %211 = vmatprep.subr.bf16.mxu0 %v400_v0  ;;  %355 = vmatprep.subr.bf16.mxu1 %v400_v0 }
  0x1e   :  { %212 = vmatpush1.bf16.msra.mxu0 %v374_v10  ;;  %364 = vmatpush1.bf16.msra.mxu1 %v374_v10 }
  0x1f   :  { %213 = vmatprep.subr.bf16.mxu0 %v400_v0  ;;  %356 = vmatprep.subr.bf16.mxu1 %v400_v0 }
  0x22   :  { %214 = vmatpush1.bf16.msra.mxu0 %v375_v11  ;;  %365 = vmatpush1.bf16.msra.mxu1 %v375_v11 }
  0x25   :  { %230 = vmatmul.mubr.bf16.vlgmr.msra.gmra.mrb[0].mxu0 %v376_v12  ;;  %262 = vmatmul.mubr.bf16.vlgmr.msra.gmra.mrb[0].mxu1 %v379_v13 }
  0x26   :  { %341 = vmatprep.mubr.msk.bf16.mxu0 %vm172_vm0, %v382_v14  ;;  %345 = vmatprep.mubr.msk.bf16.mxu1 %vm172_vm0, %v384_v15 }
  0x2d   :  { %238 = vmatmul.mubr.bf16.gmra.mrb[4].mxu0 %v386_v16  ;;  %270 = vmatmul.mubr.bf16.gmra.mrb[4].mxu1 %v387_v17 }
  0x2e   :  { %342 = vmatprep.mubr.msk.bf16.mxu0 %vm172_vm0, %v388_v18  ;;  %346 = vmatprep.mubr.msk.bf16.mxu1 %vm172_vm0, %v390_v19 }
  0x35   :  { %246 = vmatmul.mubr.bf16.gmra.mrb[8].mxu0 %v392_v20  ;;  %278 = vmatmul.mubr.bf16.gmra.mrb[8].mxu1 %v393_v21 }
  0x36   :  { %343 = vmatprep.mubr.msk.bf16.mxu0 %vm172_vm0, %v394_v22  ;;  %347 = vmatprep.mubr.msk.bf16.mxu1 %vm172_vm0, %v396_v23 }
  0x3d   :  { %254 = vmatmul.mubr.bf16.gmra.mrb[12].mxu0 %v398_v24  ;;  %286 = vmatmul.mubr.bf16.gmra.mrb[12].mxu1 %v399_v25 }
  0xf8   :  { %v231_v26 = vpop.f32.mrb[0].mxu0  ;;  %v263_v27 = vpop.f32.mrb[0].mxu1 }
  0xf9   :  { %295 = vst.msk [vmem:[%s565_s2] sm:$0xff] %vm294_vm1, %v231_v26  ;;  %303 = vst.msk [vmem:[%s565_s2 + $0x40] sm:$0xff] %vm294_vm1, %v263_v27  ;;  %v233_v28 = vpop.f32.mrb[1].mxu0  ;;  %v265_v29 = vpop.f32.mrb[1].mxu1 }
  0xfa   :  { %v234_v30 = vpop.f32.mrb[2].mxu0  ;;  %v266_v31 = vpop.f32.mrb[2].mxu1 }
  0xfb   :  { %296 = vst.msk [vmem:[%s565_s2 + $0x8] sm:$0xff] %vm294_vm1, %v234_v30  ;;  %304 = vst.msk [vmem:[%s565_s2 + $0x48] sm:$0xff] %vm294_vm1, %v266_v31  ;;  %v236_v32 = vpop.f32.mrb[3].mxu0  ;;  %v268_v33 = vpop.f32.mrb[3].mxu1 }
 0x100   :  { %v239_v34 = vpop.f32.mrb[4].mxu0  ;;  %v271_v35 = vpop.f32.mrb[4].mxu1 }
 0x101   :  { %297 = vst.msk [vmem:[%s565_s2 + $0x10] sm:$0xff] %vm294_vm1, %v239_v34  ;;  %305 = vst.msk [vmem:[%s565_s2 + $0x50] sm:$0xff] %vm294_vm1, %v271_v35  ;;  %v241_v36 = vpop.f32.mrb[5].mxu0  ;;  %v273_v37 = vpop.f32.mrb[5].mxu1 }
 0x102   :  { %v242_v38 = vpop.f32.mrb[6].mxu0  ;;  %v274_v39 = vpop.f32.mrb[6].mxu1 }
 0x103   :  { %298 = vst.msk [vmem:[%s565_s2 + $0x18] sm:$0xff] %vm294_vm1, %v242_v38  ;;  %306 = vst.msk [vmem:[%s565_s2 + $0x58] sm:$0xff] %vm294_vm1, %v274_v39  ;;  %v244_v40 = vpop.f32.mrb[7].mxu0  ;;  %v276_v41 = vpop.f32.mrb[7].mxu1 }
 0x108   :  { %v247_v42 = vpop.f32.mrb[8].mxu0  ;;  %v279_v43 = vpop.f32.mrb[8].mxu1 }
 0x109   :  { %299 = vst.msk [vmem:[%s565_s2 + $0x20] sm:$0xff] %vm294_vm1, %v247_v42  ;;  %307 = vst.msk [vmem:[%s565_s2 + $0x60] sm:$0xff] %vm294_vm1, %v279_v43  ;;  %v249_v44 = vpop.f32.mrb[9].mxu0  ;;  %v281_v45 = vpop.f32.mrb[9].mxu1 }
 0x10a   :  { %v250_v46 = vpop.f32.mrb[10].mxu0  ;;  %v282_v47 = vpop.f32.mrb[10].mxu1 }
 0x10b   :  { %300 = vst.msk [vmem:[%s565_s2 + $0x28] sm:$0xff] %vm294_vm1, %v250_v46  ;;  %308 = vst.msk [vmem:[%s565_s2 + $0x68] sm:$0xff] %vm294_vm1, %v282_v47  ;;  %v252_v48 = vpop.f32.mrb[11].mxu0  ;;  %v284_v49 = vpop.f32.mrb[11].mxu1 }
 0x110   :  { %v255_v50 = vpop.f32.mrb[12].mxu0  ;;  %v287_v51 = vpop.f32.mrb[12].mxu1 }
 0x111   :  { %301 = vst.msk [vmem:[%s565_s2 + $0x30] sm:$0xff] %vm294_vm1, %v255_v50  ;;  %309 = vst.msk [vmem:[%s565_s2 + $0x70] sm:$0xff] %vm294_vm1, %v287_v51  ;;  %v257_v52 = vpop.f32.mrb[13].mxu0  ;;  %v289_v53 = vpop.f32.mrb[13].mxu1 }
 0x112   :  { %v258_v54 = vpop.f32.mrb[14].mxu0  ;;  %v290_v55 = vpop.f32.mrb[14].mxu1 }
 0x113   :  { %302 = vst.msk [vmem:[%s565_s2 + $0x38] sm:$0xff] %vm294_vm1, %v258_v54  ;;  %310 = vst.msk [vmem:[%s565_s2 + $0x78] sm:$0xff] %vm294_vm1, %v290_v55  ;;  %v260_v56 = vpop.f32.mrb[15].mxu0  ;;  %v292_v57 = vpop.f32.mrb[15].mxu1 }

// kernel: _lambda_.15
= control target key start
LH: loop header
LB: loop body
LE: loop exit
PB: predicated region body
PF: predicated region fallthrough
CT: control target
= control target key end

     0   :  { %vm12_vm0 = vcmask 24576   ;;  %vm76_vm1 = vcmask 31744   ;;  %v138_v0 = vmov 0.0   ;;  %s225_s0 = inlined_call_operand.vmem [shape: f32[2,64,4], index: 0, kind: input, shape index: {}]   ;;  %s226_s1 = inlined_call_operand.vmem [shape: f32[2,1,4], index: 1, kind: output, shape index: {}]  }
   0x1   :  { %13 = vst.msk [vmem:[#allocation2] sm:$0x1] %vm12_vm0, %v138_v0  ;;  %14 = vst.msk [vmem:[#allocation2 + $0x1] sm:$0x1] %vm12_vm0, %v138_v0  ;;  %v15_v1 = vld [vmem:[%s225_s0] sm:$0xff]  ;;  %v16_v2 = vld [vmem:[%s225_s0 + $0x8] sm:$0xff] }
   0x2   :  { %v17_v3 = vld [vmem:[%s225_s0 + $0x10] sm:$0xff]  ;;  %v18_v4 = vld [vmem:[%s225_s0 + $0x18] sm:$0xff]  ;;  %v77_v5 = vsel %vm76_vm1, %v15_v1, 0.0  ;;  %v78_v6 = vsel %vm76_vm1, %v16_v2, 0.0  ;;  %v19_v8 = vld [vmem:[%s225_s0 + $0x20] sm:$0xff] }
   0x3   :  { %v80_v7 = vsel %vm76_vm1, %v17_v3, 0.0  ;;  %v79_v9 = vadd.f32 %v78_v6, %v77_v5  ;;  %v23_v10 = vld [vmem:[%s225_s0 + $0x40] sm:$0xff]  ;;  %v82_v11 = vsel %vm76_vm1, %v18_v4, 0.0  ;;  %v24_v12 = vld [vmem:[%s225_s0 + $0x48] sm:$0xff]  ;;  %v25_v13 = vld [vmem:[%s225_s0 + $0x50] sm:$0xff]  ;;  %v84_v20 = vsel %vm76_vm1, %v19_v8, 0.0 }
   0x4   :  { %v26_v14 = vld [vmem:[%s225_s0 + $0x58] sm:$0xff]  ;;  %v98_v15 = vsel %vm76_vm1, %v23_v10, 0.0  ;;  %v20_v16 = vld [vmem:[%s225_s0 + $0x28] sm:$0xff]  ;;  %v99_v18 = vsel %vm76_vm1, %v24_v12, 0.0  ;;  %v101_v19 = vsel %vm76_vm1, %v25_v13, 0.0  ;;  %v27_v21 = vld [vmem:[%s225_s0 + $0x60] sm:$0xff] }
   0x5   :  { %v81_v17 = vadd.f32 %v80_v7, %v79_v9  ;;  %v100_v22 = vadd.f32 %v99_v18, %v98_v15  ;;  %v21_v23 = vld [vmem:[%s225_s0 + $0x30] sm:$0xff]  ;;  %v103_v25 = vsel %vm76_vm1, %v26_v14, 0.0  ;;  %v86_v26 = vsel %vm76_vm1, %v20_v16, 0.0  ;;  %v28_v27 = vld [vmem:[%s225_s0 + $0x68] sm:$0xff]  ;;  %v22_v29 = vld [vmem:[%s225_s0 + $0x38] sm:$0xff] }
   0x6   :  { %v105_v31 = vsel %vm76_vm1, %v27_v21, 0.0  ;;  %v88_v32 = vsel %vm76_vm1, %v21_v23, 0.0  ;;  %v29_v33 = vld [vmem:[%s225_s0 + $0x70] sm:$0xff]  ;;  %v107_v36 = vsel %vm76_vm1, %v28_v27, 0.0  ;;  %v90_v37 = vsel %vm76_vm1, %v22_v29, 0.0  ;;  %v30_v38 = vld [vmem:[%s225_s0 + $0x78] sm:$0xff] }
   0x7   :  { %v83_v24 = vadd.f32 %v82_v11, %v81_v17  ;;  %v102_v28 = vadd.f32 %v101_v19, %v100_v22  ;;  %v109_v41 = vsel %vm76_vm1, %v29_v33, 0.0  ;;  %v111_v44 = vsel %vm76_vm1, %v30_v38, 0.0 }
   0x8   :  { %v74_v55 = vld [vmem:[#allocation2] sm:$0x1]  ;;  %v75_v60 = vld [vmem:[#allocation2 + $0x1] sm:$0x1] }
   0x9   :  { %v85_v30 = vadd.f32 %v84_v20, %v83_v24  ;;  %v104_v34 = vadd.f32 %v103_v25, %v102_v28 }
   0xb   :  { %v87_v35 = vadd.f32 %v86_v26, %v85_v30  ;;  %v106_v39 = vadd.f32 %v105_v31, %v104_v34 }
   0xd   :  { %v89_v40 = vadd.f32 %v88_v32, %v87_v35  ;;  %v108_v42 = vadd.f32 %v107_v36, %v106_v39 }
   0xf   :  { %v91_v43 = vadd.f32 %v90_v37, %v89_v40  ;;  %v110_v45 = vadd.f32 %v109_v41, %v108_v42 }
  0x11   :  { %v92_v46 = vrot.slane %v91_v43, 4  ;;  %v112_v47 = vadd.f32 %v111_v44, %v110_v45 }
  0x13   :  { %v93_v48 = vadd.f32 %v92_v46, %v91_v43  ;;  %v113_v49 = vrot.slane %v112_v47, 4 }
  0x15   :  { %v94_v50 = vrot.slane %v93_v48, 2  ;;  %v114_v51 = vadd.f32 %v113_v49, %v112_v47 }
  0x17   :  { %v95_v52 = vadd.f32 %v94_v50, %v93_v48  ;;  %v115_v53 = vrot.slane %v114_v51, 2 }
  0x19   :  { %v96_v54 = vrot.slane %v95_v52, 1  ;;  %v116_v56 = vadd.f32 %v115_v53, %v114_v51 }
  0x1b   :  { %v97_v57 = vadd.f32 %v96_v54, %v95_v52  ;;  %v117_v58 = vrot.slane %v116_v56, 1 }
  0x1d   :  { %v119_v59 = vadd.f32 %v97_v57, %v74_v55  ;;  %v118_v61 = vadd.f32 %v117_v58, %v116_v56 }
  0x1f   :  { %122 = vst.msk [vmem:[#allocation2] sm:$0x1] %vm12_vm0, %v119_v59  ;;  %v120_v62 = vadd.f32 %v118_v61, %v75_v60 }
  0x21   :  { %123 = vst.msk [vmem:[#allocation2 + $0x1] sm:$0x1] %vm12_vm0, %v120_v62 }
  0x26   :  { %v127_v63 = vld [vmem:[#allocation2] sm:$0x1] }
  0x27   :  { %v129_v0 = vmul.f32 0.015625, %v127_v63 }
  0x28   :  { %v128_v1 = vld [vmem:[#allocation2 + $0x1] sm:$0x1] }
  0x29   :  { %131 = vst.msk [vmem:[%s226_s1] sm:$0x1] %vm12_vm0, %v129_v0  ;;  %v130_v2 = vmul.f32 0.015625, %v128_v1 }
  0x2b   :  { %132 = vst.msk [vmem:[%s226_s1 + $0x1] sm:$0x1] %vm12_vm0, %v130_v2 }

// kernel: mul.0
= control target key start
LH: loop header
LB: loop body
LE: loop exit
PB: predicated region body
PF: predicated region fallthrough
CT: control target
= control target key end

     0   :  { %s364_s0 = inlined_call_operand.vmem [shape: f32[128,4], index: 0, kind: input, shape index: {}]   ;;  %s365_s1 = inlined_call_operand.vmem [shape: f32[128,4], index: 1, kind: input, shape index: {}]   ;;  %s366_s2 = inlined_call_operand.vmem [shape: f32[128,4], index: 2, kind: output, shape index: {}]  }
   0x1   :  { %v3_v0 = vld [vmem:[%s364_s0] sm:$0xff]  ;;  %v160_v2 = vld [vmem:[%s364_s0 + $0x8] sm:$0xff]  ;;  %v163_v5 = vld [vmem:[%s364_s0 + $0x10] sm:$0xff] }
   0x2   :  { %v4_v1 = vld [vmem:[%s365_s1] sm:$0xff]  ;;  %v161_v4 = vld [vmem:[%s365_s1 + $0x8] sm:$0xff]  ;;  %v164_v6 = vld [vmem:[%s365_s1 + $0x10] sm:$0xff] }
   0x3   :  { %v7_v3 = vmul.f32 %v4_v1, %v3_v0  ;;  %v16_v7 = vmul.f32 %v161_v4, %v160_v2  ;;  %v26_v8 = vmul.f32 %v164_v6, %v163_v5  ;;  %v166_v9 = vld [vmem:[%s364_s0 + $0x18] sm:$0xff]  ;;  %v169_v11 = vld [vmem:[%s364_s0 + $0x20] sm:$0xff]  ;;  %v172_v14 = vld [vmem:[%s364_s0 + $0x28] sm:$0xff] }
   0x4   :  { %v167_v10 = vld [vmem:[%s365_s1 + $0x18] sm:$0xff]  ;;  %v170_v13 = vld [vmem:[%s365_s1 + $0x20] sm:$0xff]  ;;  %v173_v15 = vld [vmem:[%s365_s1 + $0x28] sm:$0xff] }
   0x5   :  { %9 = vst [vmem:[%s366_s2] sm:$0xff] %v7_v3  ;;  %v36_v12 = vmul.f32 %v167_v10, %v166_v9  ;;  %162 = vst [vmem:[%s366_s2 + $0x8] sm:$0xff] %v16_v7  ;;  %v46_v16 = vmul.f32 %v170_v13, %v169_v11  ;;  %v56_v17 = vmul.f32 %v173_v15, %v172_v14  ;;  %v175_v18 = vld [vmem:[%s364_s0 + $0x30] sm:$0xff]  ;;  %v178_v20 = vld [vmem:[%s364_s0 + $0x38] sm:$0xff] }
   0x6   :  { %165 = vst [vmem:[%s366_s2 + $0x10] sm:$0xff] %v26_v8  ;;  %v176_v19 = vld [vmem:[%s365_s1 + $0x30] sm:$0xff]  ;;  %v179_v22 = vld [vmem:[%s365_s1 + $0x38] sm:$0xff]  ;;  %v181_v23 = vld [vmem:[%s364_s0 + $0x40] sm:$0xff] }
   0x7   :  { %168 = vst [vmem:[%s366_s2 + $0x18] sm:$0xff] %v36_v12  ;;  %v66_v21 = vmul.f32 %v176_v19, %v175_v18  ;;  %v182_v24 = vld [vmem:[%s365_s1 + $0x40] sm:$0xff]  ;;  %171 = vst [vmem:[%s366_s2 + $0x20] sm:$0xff] %v46_v16  ;;  %v76_v25 = vmul.f32 %v179_v22, %v178_v20  ;;  %v184_v27 = vld [vmem:[%s364_s0 + $0x48] sm:$0xff] }
   0x8   :  { %174 = vst [vmem:[%s366_s2 + $0x28] sm:$0xff] %v56_v17  ;;  %v86_v26 = vmul.f32 %v182_v24, %v181_v23  ;;  %v185_v28 = vld [vmem:[%s365_s1 + $0x48] sm:$0xff]  ;;  %v187_v29 = vld [vmem:[%s364_s0 + $0x50] sm:$0xff]  ;;  %v190_v32 = vld [vmem:[%s364_s0 + $0x58] sm:$0xff] }
   0x9   :  { %177 = vst [vmem:[%s366_s2 + $0x30] sm:$0xff] %v66_v21  ;;  %v96_v30 = vmul.f32 %v185_v28, %v184_v27  ;;  %v188_v31 = vld [vmem:[%s365_s1 + $0x50] sm:$0xff]  ;;  %v191_v33 = vld [vmem:[%s365_s1 + $0x58] sm:$0xff]  ;;  %180 = vst [vmem:[%s366_s2 + $0x38] sm:$0xff] %v76_v25 }
   0xa   :  { %183 = vst [vmem:[%s366_s2 + $0x40] sm:$0xff] %v86_v26  ;;  %v106_v34 = vmul.f32 %v188_v31, %v187_v29  ;;  %v116_v35 = vmul.f32 %v191_v33, %v190_v32  ;;  %v193_v36 = vld [vmem:[%s364_s0 + $0x60] sm:$0xff]  ;;  %v196_v38 = vld [vmem:[%s364_s0 + $0x68] sm:$0xff]  ;;  %v199_v41 = vld [vmem:[%s364_s0 + $0x70] sm:$0xff] }
   0xb   :  { %v194_v37 = vld [vmem:[%s365_s1 + $0x60] sm:$0xff]  ;;  %186 = vst [vmem:[%s366_s2 + $0x48] sm:$0xff] %v96_v30  ;;  %v197_v40 = vld [vmem:[%s365_s1 + $0x68] sm:$0xff]  ;;  %v200_v42 = vld [vmem:[%s365_s1 + $0x70] sm:$0xff] }
   0xc   :  { %v126_v39 = vmul.f32 %v194_v37, %v193_v36  ;;  %189 = vst [vmem:[%s366_s2 + $0x50] sm:$0xff] %v106_v34  ;;  %192 = vst [vmem:[%s366_s2 + $0x58] sm:$0xff] %v116_v35  ;;  %v136_v43 = vmul.f32 %v197_v40, %v196_v38  ;;  %v146_v44 = vmul.f32 %v200_v42, %v199_v41  ;;  %v202_v45 = vld [vmem:[%s364_s0 + $0x78] sm:$0xff] }
   0xd   :  { %v203_v46 = vld [vmem:[%s365_s1 + $0x78] sm:$0xff] }
   0xe   :  { %195 = vst [vmem:[%s366_s2 + $0x60] sm:$0xff] %v126_v39  ;;  %v156_v47 = vmul.f32 %v203_v46, %v202_v45  ;;  %198 = vst [vmem:[%s366_s2 + $0x68] sm:$0xff] %v136_v43 }
   0xf   :  { %201 = vst [vmem:[%s366_s2 + $0x70] sm:$0xff] %v146_v44 }
  0x10   :  { %204 = vst [vmem:[%s366_s2 + $0x78] sm:$0xff] %v156_v47 }

// kernel: _lambda_.16
= control target key start
LH: loop header
LB: loop body
LE: loop exit
PB: predicated region body
PF: predicated region fallthrough
CT: control target
= control target key end

     0   :  { %vm200_vm0 = vcmask 1041408   ;;  %vm175_vm1 = vcmask 31744   ;;  %vm357_vm2 = vcmask 1045504   ;;  %vm332_vm3 = vcmask 97280   ;;  %s813_s3 = inlined_call_operand.vmem [shape: bf16[4,12], index: 3, kind: input, shape index: {}]   ;;  %s814_s0 = inlined_call_operand.vmem [shape: f32[128,4], index: 0, kind: input, shape index: {}]   ;;  %s815_s1 = inlined_call_operand.vmem [shape: f32[1,4], index: 1, kind: input, shape index: {}]   ;;  %s816_s2 = inlined_call_operand.vmem [shape: f32[1,4], index: 2, kind: input, shape index: {}]   ;;  %s817_s4 = inlined_call_operand.vmem [shape: bf16[12,12], index: 4, kind: input, shape index: {}]   ;;  %s818_s5 = inlined_call_operand.vmem [shape: f32[128,12], index: 5, kind: input, shape index: {}]   ;;  %s819_s6 = inlined_call_operand.vmem [shape: f32[128,12], index: 6, kind: output, shape index: {}]  }
   0x1   :  { %v174_v0 = vld [vmem:[%s813_s3] sm:$0x3]  ;;  %v25_v2 = vld [vmem:[%s814_s0 + $0x8] sm:$0xff]  ;;  %v26_v6 = vld [vmem:[%s814_s0 + $0x10] sm:$0xff] }
   0x2   :  { %v24_v1 = vld [vmem:[%s814_s0] sm:$0xff]  ;;  %551 = vmatprep.subr.msk.bf16.mxu0 %vm200_vm0, %v174_v0  ;;  %v202_v3 = vsel %vm200_vm0, %v174_v0, 0  ;;  %v27_v9 = vld [vmem:[%s814_s0 + $0x18] sm:$0xff]  ;;  %v29_v12 = vld [vmem:[%s814_s0 + $0x28] sm:$0xff] }
   0x3   :  { %v601_v4 = vld [vmem:[%s815_s1] ss:$0 sm:$0xff]  ;;  %516 = vmatpush3.bf16.msra.mxu0 %v202_v3  ;;  %v30_v16 = vld [vmem:[%s814_s0 + $0x30] sm:$0xff]  ;;  %v31_v17 = vld [vmem:[%s814_s0 + $0x38] sm:$0xff] }
   0x4   :  { %v606_v5 = vld [vmem:[%s816_s2] ss:$0 sm:$0xff]  ;;  %v47_v7 = vmul.f32 %v601_v4, %v24_v1  ;;  %v48_v8 = vmul.f32 %v601_v4, %v25_v2  ;;  %v49_v10 = vmul.f32 %v601_v4, %v26_v6  ;;  %v50_v13 = vmul.f32 %v601_v4, %v27_v9  ;;  %v33_v55 = vld [vmem:[%s814_s0 + $0x48] sm:$0xff]  ;;  %v34_v60 = vld [vmem:[%s814_s0 + $0x50] sm:$0xff] }
   0x5   :  { %v28_v11 = vld [vmem:[%s814_s0 + $0x20] sm:$0xff]  ;;  %v52_v15 = vmul.f32 %v601_v4, %v29_v12  ;;  %v53_v21 = vmul.f32 %v601_v4, %v30_v16  ;;  %v54_v25 = vmul.f32 %v601_v4, %v31_v17  ;;  %v35_v61 = vld [vmem:[%s814_s0 + $0x58] sm:$0xff]  ;;  %v56_v12 = vmul.f32 %v601_v4, %v33_v55 }
   0x6   :  { %v51_v14 = vmul.f32 %v601_v4, %v28_v11  ;;  %v70_v18 = vadd.f32 %v606_v5, %v47_v7  ;;  %v71_v19 = vadd.f32 %v606_v5, %v48_v8  ;;  %v72_v20 = vadd.f32 %v606_v5, %v49_v10  ;;  %v32_v54 = vld [vmem:[%s814_s0 + $0x40] sm:$0xff] }
   0x7   :  { %v73_v22 = vadd.f32 %v606_v5, %v50_v13  ;;  %v75_v24 = vadd.f32 %v606_v5, %v52_v15  ;;  %v76_v29 = vadd.f32 %v606_v5, %v53_v21  ;;  %v77_v33 = vadd.f32 %v606_v5, %v54_v25  ;;  %v36_v62 = vld [vmem:[%s814_s0 + $0x60] sm:$0xff]  ;;  %v37_v13 = vld [vmem:[%s814_s0 + $0x68] sm:$0xff] }
   0x8   :  { %v74_v23 = vadd.f32 %v606_v5, %v51_v14  ;;  %v86_v26 = vadd.f32 3.0, %v70_v18  ;;  %v87_v27 = vadd.f32 3.0, %v71_v19  ;;  %v88_v28 = vadd.f32 3.0, %v72_v20  ;;  %v38_v14 = vld [vmem:[%s814_s0 + $0x70] sm:$0xff] }
   0x9   :  { %v89_v30 = vadd.f32 3.0, %v73_v22  ;;  %v91_v32 = vadd.f32 3.0, %v75_v24  ;;  %v92_v37 = vadd.f32 3.0, %v76_v29  ;;  %v93_v41 = vadd.f32 3.0, %v77_v33 }
   0xa   :  { %v90_v31 = vadd.f32 3.0, %v74_v23  ;;  %v102_v34 = vmax.f32 %v86_v26, 0.0  ;;  %v103_v35 = vmax.f32 %v87_v27, 0.0  ;;  %v104_v36 = vmax.f32 %v88_v28, 0.0 }
   0xb   :  { %v105_v38 = vmax.f32 %v89_v30, 0.0  ;;  %v107_v40 = vmax.f32 %v91_v32, 0.0  ;;  %v108_v45 = vmax.f32 %v92_v37, 0.0  ;;  %v109_v49 = vmax.f32 %v93_v41, 0.0 }
   0xc   :  { %v106_v39 = vmax.f32 %v90_v31, 0.0  ;;  %v118_v42 = vmin.f32 %v102_v34, 6.0  ;;  %v119_v43 = vmin.f32 %v103_v35, 6.0  ;;  %v120_v44 = vmin.f32 %v104_v36, 6.0 }
   0xd   :  { %v121_v46 = vmin.f32 %v105_v38, 6.0  ;;  %v123_v48 = vmin.f32 %v107_v40, 6.0  ;;  %v124_v53 = vmin.f32 %v108_v45, 6.0  ;;  %v125_v59 = vmin.f32 %v109_v49, 6.0 }
   0xe   :  { %v122_v47 = vmin.f32 %v106_v39, 6.0  ;;  %v134_v50 = vmul.f32 %v118_v42, %v70_v18  ;;  %v135_v51 = vmul.f32 %v119_v43, %v71_v19  ;;  %v136_v52 = vmul.f32 %v120_v44, %v72_v20 }
   0xf   :  { %v137_v56 = vmul.f32 %v121_v46, %v73_v22  ;;  %v139_v58 = vmul.f32 %v123_v48, %v75_v24  ;;  %v140_v2 = vmul.f32 %v124_v53, %v76_v29  ;;  %v141_v8 = vmul.f32 %v125_v59, %v77_v33 }
  0x10   :  { %v138_v57 = vmul.f32 %v122_v47, %v74_v23  ;;  %v150_v63 = vmul.f32 0.16666667, %v134_v50  ;;  %v151_v0 = vmul.f32 0.16666667, %v135_v51  ;;  %v152_v1 = vmul.f32 0.16666667, %v136_v52 }
  0x11   :  { %v153_v3 = vmul.f32 0.16666667, %v137_v56  ;;  %v155_v7 = vmul.f32 0.16666667, %v139_v58  ;;  %v156_v10 = vmul.f32 0.16666667, %v140_v2  ;;  %v55_v11 = vmul.f32 %v601_v4, %v32_v54 }
  0x12   :  { %v154_v6 = vmul.f32 0.16666667, %v138_v57  ;;  %v166_v9 = vpack.c.bf16 %v151_v0, %v150_v63  ;;  %v157_v17 = vmul.f32 0.16666667, %v141_v8  ;;  %v57_v18 = vmul.f32 %v601_v4, %v34_v60  ;;  %v39_v23 = vld [vmem:[%s814_s0 + $0x78] sm:$0xff] }
  0x13   :  { %v167_v15 = vpack.c.bf16 %v153_v3, %v152_v1  ;;  %v78_v19 = vadd.f32 %v606_v5, %v55_v11  ;;  %v79_v20 = vadd.f32 %v606_v5, %v56_v12  ;;  %v58_v21 = vmul.f32 %v601_v4, %v35_v61 }
  0x14   :  { %v168_v16 = vpack.c.bf16 %v155_v7, %v154_v6  ;;  %517 = vmatprep.mubr.msk.bf16.mxu0 %vm175_vm1, %v166_v9  ;;  %v59_v22 = vmul.f32 %v601_v4, %v36_v62  ;;  %v169_v24 = vpack.c.bf16 %v157_v17, %v156_v10  ;;  %v80_v25 = vadd.f32 %v606_v5, %v57_v18 }
  0x15   :  { %518 = vmatmul.mubr.msk.bf16.vlgmr.msra.gmra.mrb[0].mxu0 %vm175_vm1, %v167_v15  ;;  %v60_v26 = vmul.f32 %v601_v4, %v37_v13  ;;  %v61_v27 = vmul.f32 %v601_v4, %v38_v14  ;;  %v94_v28 = vadd.f32 3.0, %v78_v19  ;;  %v95_v29 = vadd.f32 3.0, %v79_v20  ;;  %v553_v14 = vld [vmem:[%s817_s4] sm:$0x3f]  }
  0x16   :  { %521 = vmatprep.mubr.msk.bf16.mxu0 %vm175_vm1, %v168_v16  ;;  %v81_v30 = vadd.f32 %v606_v5, %v58_v21  ;;  %v82_v31 = vadd.f32 %v606_v5, %v59_v22  ;;  %v96_v32 = vadd.f32 3.0, %v80_v25  ;;  %v62_v34 = vmul.f32 %v601_v4, %v39_v23  ;;  %552 = vmatprep.subr.msk.bf16.mxu1 %vm357_vm2, %v553_v14 }
  0x17   :  { %v83_v33 = vadd.f32 %v606_v5, %v60_v26  ;;  %v84_v35 = vadd.f32 %v606_v5, %v61_v27  ;;  %v110_v36 = vmax.f32 %v94_v28, 0.0  ;;  %v111_v37 = vmax.f32 %v95_v29, 0.0 }
  0x18   :  { %v97_v38 = vadd.f32 3.0, %v81_v30  ;;  %v98_v39 = vadd.f32 3.0, %v82_v31  ;;  %v112_v40 = vmax.f32 %v96_v32, 0.0  ;;  %v85_v42 = vadd.f32 %v606_v5, %v62_v34 }
  0x19   :  { %v99_v41 = vadd.f32 3.0, %v83_v33  ;;  %v100_v43 = vadd.f32 3.0, %v84_v35  ;;  %v126_v44 = vmin.f32 %v110_v36, 6.0  ;;  %v127_v45 = vmin.f32 %v111_v37, 6.0 }
  0x1a   :  { %v113_v46 = vmax.f32 %v97_v38, 0.0  ;;  %v114_v47 = vmax.f32 %v98_v39, 0.0  ;;  %v128_v48 = vmin.f32 %v112_v40, 6.0  ;;  %v101_v50 = vadd.f32 3.0, %v85_v42  ;;  %v313_v40 = vld [vmem:[%s818_s5 + $0x10] sm:$0xff] }
  0x1b   :  { %v115_v49 = vmax.f32 %v99_v41, 0.0  ;;  %v116_v51 = vmax.f32 %v100_v43, 0.0  ;;  %v142_v4 = vmul.f32 %v126_v44, %v78_v19  ;;  %v143_v52 = vmul.f32 %v127_v45, %v79_v20  ;;  %v311_v41 = vld [vmem:[%s818_s5] sm:$0xff]  ;;  %v314_v43 = vld [vmem:[%s818_s5 + $0x18] sm:$0xff] }
  0x1c   :  { %v129_v53 = vmin.f32 %v113_v46, 6.0  ;;  %v130_v54 = vmin.f32 %v114_v47, 6.0  ;;  %v144_v55 = vmul.f32 %v128_v48, %v80_v25  ;;  %v117_v57 = vmax.f32 %v101_v50, 0.0  ;;  %v312_v46 = vld [vmem:[%s818_s5 + $0x8] sm:$0xff] }
  0x1d   :  { %522 = vmatmul.mubr.msk.bf16.gmra.mrb[4].mxu0 %vm175_vm1, %v169_v24  ;;  %v131_v56 = vmin.f32 %v115_v49, 6.0  ;;  %v132_v58 = vmin.f32 %v116_v51, 6.0  ;;  %v158_v5 = vmul.f32 0.16666667, %v142_v4  ;;  %v159_v59 = vmul.f32 0.16666667, %v143_v52 }
  0x1e   :  { %v145_v60 = vmul.f32 %v129_v53, %v81_v30  ;;  %v146_v61 = vmul.f32 %v130_v54, %v82_v31  ;;  %v160_v62 = vmul.f32 0.16666667, %v144_v55  ;;  %v133_v0 = vmin.f32 %v117_v57, 6.0  ;;  %v317_v4 = vld [vmem:[%s818_s5 + $0x30] sm:$0xff]  ;;  %v315_v52 = vld [vmem:[%s818_s5 + $0x20] sm:$0xff]  ;;  %v318_v54 = vld [vmem:[%s818_s5 + $0x38] sm:$0xff] }
  0x1f   :  { %v147_v63 = vmul.f32 %v131_v56, %v83_v33  ;;  %v170_v1 = vpack.c.bf16 %v159_v59, %v158_v5  ;;  %v148_v7 = vmul.f32 %v132_v58, %v84_v35  ;;  %v359_v15 = vsel %vm357_vm2, %v553_v14, 0  ;;  %v316_v57 = vld [vmem:[%s818_s5 + $0x28] sm:$0xff] }
  0x20   :  { %v161_v2 = vmul.f32 0.16666667, %v145_v60  ;;  %v162_v3 = vmul.f32 0.16666667, %v146_v61  ;;  %v149_v8 = vmul.f32 %v133_v0, %v85_v42  ;;  %534 = vmatpush3.bf16.msra.mxu1 %v359_v15  ;;  %v326_v15 = vld [vmem:[%s818_s5 + $0x78] sm:$0xff] }
  0x21   :  { %v163_v6 = vmul.f32 0.16666667, %v147_v63  ;;  %525 = vmatprep.mubr.msk.bf16.mxu0 %vm175_vm1, %v170_v1  ;;  %v164_v11 = vmul.f32 0.16666667, %v148_v7  ;;  %v319_v63 = vld [vmem:[%s818_s5 + $0x40] sm:$0xff]  ;;  %v322_v1 = vld [vmem:[%s818_s5 + $0x58] sm:$0xff] }
  0x22   :  { %v171_v9 = vpack.c.bf16 %v161_v2, %v160_v62  ;;  %v165_v12 = vmul.f32 0.16666667, %v149_v8  ;;  %v321_v62 = vld [vmem:[%s818_s5 + $0x50] sm:$0xff] }
  0x23   :  { %v172_v10 = vpack.c.bf16 %v163_v6, %v162_v3  ;;  %v320_v6 = vld [vmem:[%s818_s5 + $0x48] sm:$0xff] }
  0x24   :  { %v173_v13 = vpack.c.bf16 %v165_v12, %v164_v11  ;;  %v325_v12 = vld [vmem:[%s818_s5 + $0x70] sm:$0xff] }
  0x25   :  { %526 = vmatmul.mubr.msk.bf16.gmra.mrb[8].mxu0 %vm175_vm1, %v171_v9 }
  0x26   :  { %529 = vmatprep.mubr.msk.bf16.mxu0 %vm175_vm1, %v172_v10 }
  0x2d   :  { %530 = vmatmul.mubr.msk.bf16.gmra.mrb[12].mxu0 %vm175_vm1, %v173_v13  ;;  %v323_v13 = vld [vmem:[%s818_s5 + $0x60] sm:$0xff] }
  0xe8   :  { %v519_v16 = vpop.f32.mrb[0].mxu0 }
  0xe9   :  { %v238_v17 = vpop.f32.mrb[1].mxu0 }
  0xea   :  { %v520_v18 = vpop.f32.mrb[2].mxu0 }
  0xeb   :  { %v302_v19 = vpack.c.bf16 %v520_v18, %v519_v16  ;;  %v241_v20 = vpop.f32.mrb[3].mxu0  ;;  %v324_v18 = vld [vmem:[%s818_s5 + $0x68] sm:$0xff] }
  0xec   :  { %v301_v21 = vpack.c.bf16 %v241_v20, %v238_v17 }
  0xee   :  { %535 = vmatprep.mubr.msk.bf16.mxu1 %vm332_vm3, %v301_v21 }
  0xef   :  { %536 = vmatmul.mubr.msk.bf16.vlgmr.msra.gmra.mrb[0].mxu1 %vm332_vm3, %v302_v19 }
  0xf0   :  { %v523_v22 = vpop.f32.mrb[4].mxu0 }
  0xf1   :  { %v254_v23 = vpop.f32.mrb[5].mxu0 }
  0xf2   :  { %v524_v24 = vpop.f32.mrb[6].mxu0 }
  0xf3   :  { %v304_v25 = vpack.c.bf16 %v524_v24, %v523_v22  ;;  %v257_v26 = vpop.f32.mrb[7].mxu0 }
  0xf4   :  { %v303_v27 = vpack.c.bf16 %v257_v26, %v254_v23 }
  0xf6   :  { %539 = vmatprep.mubr.msk.bf16.mxu1 %vm332_vm3, %v303_v27 }
  0xf7   :  { %540 = vmatmul.mubr.msk.bf16.gmra.mrb[4].mxu1 %vm332_vm3, %v304_v25 }
  0xf8   :  { %v527_v28 = vpop.f32.mrb[8].mxu0 }
  0xf9   :  { %v270_v29 = vpop.f32.mrb[9].mxu0 }
  0xfa   :  { %v528_v30 = vpop.f32.mrb[10].mxu0 }
  0xfb   :  { %v306_v31 = vpack.c.bf16 %v528_v30, %v527_v28  ;;  %v273_v32 = vpop.f32.mrb[11].mxu0 }
  0xfc   :  { %v305_v33 = vpack.c.bf16 %v273_v32, %v270_v29 }
  0xfe   :  { %543 = vmatprep.mubr.msk.bf16.mxu1 %vm332_vm3, %v305_v33 }
  0xff   :  { %544 = vmatmul.mubr.msk.bf16.gmra.mrb[8].mxu1 %vm332_vm3, %v306_v31 }
 0x100   :  { %v531_v34 = vpop.f32.mrb[12].mxu0 }
 0x101   :  { %v286_v35 = vpop.f32.mrb[13].mxu0 }
 0x102   :  { %v532_v36 = vpop.f32.mrb[14].mxu0 }
 0x103   :  { %v308_v37 = vpack.c.bf16 %v532_v36, %v531_v34  ;;  %v289_v38 = vpop.f32.mrb[15].mxu0 }
 0x104   :  { %v307_v39 = vpack.c.bf16 %v289_v38, %v286_v35 }
 0x106   :  { %547 = vmatprep.mubr.msk.bf16.mxu1 %vm332_vm3, %v307_v39 }
 0x107   :  { %548 = vmatmul.mubr.msk.bf16.gmra.mrb[12].mxu1 %vm332_vm3, %v308_v37 }
 0x1c2   :  { %v537_v42 = vpop.f32.mrb[0].mxu1 }
 0x1c3   :  { %v404_v44 = vadd.f32 %v537_v42, %v313_v40  ;;  %v395_v45 = vpop.f32.mrb[1].mxu1 }
 0x1c4   :  { %v396_v47 = vadd.f32 %v395_v45, %v311_v41  ;;  %v538_v48 = vpop.f32.mrb[2].mxu1 }
 0x1c5   :  { %460 = vst.msk [vmem:[%s819_s6 + $0x10] sm:$0xff] %vm332_vm3, %v404_v44  ;;  %v407_v49 = vadd.f32 %v538_v48, %v314_v43  ;;  %v398_v50 = vpop.f32.mrb[3].mxu1 }
 0x1c6   :  { %458 = vst.msk [vmem:[%s819_s6] sm:$0xff] %vm332_vm3, %v396_v47  ;;  %v399_v51 = vadd.f32 %v398_v50, %v312_v46 }
 0x1c7   :  { %461 = vst.msk [vmem:[%s819_s6 + $0x18] sm:$0xff] %vm332_vm3, %v407_v49 }
 0x1c8   :  { %459 = vst.msk [vmem:[%s819_s6 + $0x8] sm:$0xff] %vm332_vm3, %v399_v51 }
 0x1ca   :  { %v541_v53 = vpop.f32.mrb[4].mxu1 }
 0x1cb   :  { %v420_v55 = vadd.f32 %v541_v53, %v317_v4  ;;  %v411_v56 = vpop.f32.mrb[5].mxu1 }
 0x1cc   :  { %v412_v58 = vadd.f32 %v411_v56, %v315_v52  ;;  %v542_v5 = vpop.f32.mrb[6].mxu1 }
 0x1cd   :  { %464 = vst.msk [vmem:[%s819_s6 + $0x30] sm:$0xff] %vm332_vm3, %v420_v55  ;;  %v423_v59 = vadd.f32 %v542_v5, %v318_v54  ;;  %v414_v60 = vpop.f32.mrb[7].mxu1 }
 0x1ce   :  { %462 = vst.msk [vmem:[%s819_s6 + $0x20] sm:$0xff] %vm332_vm3, %v412_v58  ;;  %v415_v61 = vadd.f32 %v414_v60, %v316_v57 }
 0x1cf   :  { %465 = vst.msk [vmem:[%s819_s6 + $0x38] sm:$0xff] %vm332_vm3, %v423_v59 }
 0x1d0   :  { %463 = vst.msk [vmem:[%s819_s6 + $0x28] sm:$0xff] %vm332_vm3, %v415_v61 }
 0x1d2   :  { %v545_v0 = vpop.f32.mrb[8].mxu1 }
 0x1d3   :  { %v436_v2 = vadd.f32 %v545_v0, %v321_v62  ;;  %v427_v3 = vpop.f32.mrb[9].mxu1 }
 0x1d4   :  { %v428_v7 = vadd.f32 %v427_v3, %v319_v63  ;;  %v546_v8 = vpop.f32.mrb[10].mxu1 }
 0x1d5   :  { %468 = vst.msk [vmem:[%s819_s6 + $0x50] sm:$0xff] %vm332_vm3, %v436_v2  ;;  %v439_v9 = vadd.f32 %v546_v8, %v322_v1  ;;  %v430_v10 = vpop.f32.mrb[11].mxu1 }
 0x1d6   :  { %466 = vst.msk [vmem:[%s819_s6 + $0x40] sm:$0xff] %vm332_vm3, %v428_v7  ;;  %v431_v11 = vadd.f32 %v430_v10, %v320_v6 }
 0x1d7   :  { %469 = vst.msk [vmem:[%s819_s6 + $0x58] sm:$0xff] %vm332_vm3, %v439_v9 }
 0x1d8   :  { %467 = vst.msk [vmem:[%s819_s6 + $0x48] sm:$0xff] %vm332_vm3, %v431_v11 }
 0x1da   :  { %v549_v14 = vpop.f32.mrb[12].mxu1 }
 0x1db   :  { %v452_v16 = vadd.f32 %v549_v14, %v325_v12  ;;  %v443_v17 = vpop.f32.mrb[13].mxu1 }
 0x1dc   :  { %v444_v19 = vadd.f32 %v443_v17, %v323_v13  ;;  %v550_v20 = vpop.f32.mrb[14].mxu1 }
 0x1dd   :  { %472 = vst.msk [vmem:[%s819_s6 + $0x70] sm:$0xff] %vm332_vm3, %v452_v16  ;;  %v455_v21 = vadd.f32 %v550_v20, %v326_v15  ;;  %v446_v22 = vpop.f32.mrb[15].mxu1 }
 0x1de   :  { %470 = vst.msk [vmem:[%s819_s6 + $0x60] sm:$0xff] %vm332_vm3, %v444_v19  ;;  %v447_v23 = vadd.f32 %v446_v22, %v324_v18 }
 0x1df   :  { %473 = vst.msk [vmem:[%s819_s6 + $0x78] sm:$0xff] %vm332_vm3, %v455_v21 }
 0x1e0   :  { %471 = vst.msk [vmem:[%s819_s6 + $0x68] sm:$0xff] %vm332_vm3, %v447_v23 }

// kernel: _lambda_.17
= control target key start
LH: loop header
LB: loop body
LE: loop exit
PB: predicated region body
PF: predicated region fallthrough
CT: control target
= control target key end

     0   :  { %vm18_vm0 = vcmask 122880   ;;  %v208_v0 = vmov 0.0   ;;  %vm144_vm1 = vcmask 130048   ;;  %s329_s0 = inlined_call_operand.vmem [shape: f32[2,64,16], index: 0, kind: input, shape index: {}]   ;;  %s330_s1 = inlined_call_operand.vmem [shape: f32[1,1,16], index: 1, kind: input, shape index: {}]   ;;  %s331_s2 = inlined_call_operand.vmem [shape: f32[1,1,16], index: 2, kind: input, shape index: {}]   ;;  %s332_s3 = inlined_call_operand.vmem [shape: f32[2,1,16], index: 3, kind: output, shape index: {}]  }
   0x1   :  { %19 = vst.msk [vmem:[#allocation2] sm:$0x1] %vm18_vm0, %v208_v0  ;;  %20 = vst.msk [vmem:[#allocation2 + $0x1] sm:$0x1] %vm18_vm0, %v208_v0  ;;  %v21_v1 = vld [vmem:[%s329_s0] sm:$0xff]  ;;  %v22_v2 = vld [vmem:[%s329_s0 + $0x8] sm:$0xff] }
   0x2   :  { %v23_v3 = vld [vmem:[%s329_s0 + $0x10] sm:$0xff]  ;;  %v24_v4 = vld [vmem:[%s329_s0 + $0x18] sm:$0xff]  ;;  %v25_v5 = vld [vmem:[%s329_s0 + $0x20] sm:$0xff] }
   0x3   :  { %v26_v6 = vld [vmem:[%s329_s0 + $0x28] sm:$0xff]  ;;  %v27_v7 = vld [vmem:[%s329_s0 + $0x30] sm:$0xff]  ;;  %v28_v8 = vld [vmem:[%s329_s0 + $0x38] sm:$0xff] }
   0x4   :  { %v205_v9 = vld [vmem:[%s330_s1] ss:$0 sm:$0xff]  ;;  %v30_v32 = vld [vmem:[%s329_s0 + $0x48] sm:$0xff]  ;;  %v31_v33 = vld [vmem:[%s329_s0 + $0x50] sm:$0xff] }
   0x5   :  { %v44_v10 = vmul.f32 %v205_v9, %v21_v1  ;;  %v45_v11 = vmul.f32 %v205_v9, %v22_v2  ;;  %v46_v12 = vmul.f32 %v205_v9, %v23_v3  ;;  %v47_v13 = vmul.f32 %v205_v9, %v24_v4  ;;  %v261_v14 = vld [vmem:[%s331_s2] ss:$0 sm:$0xff]  ;;  %v32_v34 = vld [vmem:[%s329_s0 + $0x58] sm:$0xff]  ;;  %v34_v40 = vld [vmem:[%s329_s0 + $0x68] sm:$0xff] }
   0x6   :  { %v48_v15 = vmul.f32 %v205_v9, %v25_v5  ;;  %v49_v16 = vmul.f32 %v205_v9, %v26_v6  ;;  %v50_v17 = vmul.f32 %v205_v9, %v27_v7  ;;  %v51_v18 = vmul.f32 %v205_v9, %v28_v8  ;;  %v29_v31 = vld [vmem:[%s329_s0 + $0x40] sm:$0xff]  ;;  %v35_v45 = vld [vmem:[%s329_s0 + $0x70] sm:$0xff]  ;;  %v36_v51 = vld [vmem:[%s329_s0 + $0x78] sm:$0xff] }
   0x7   :  { %v67_v19 = vadd.f32 %v261_v14, %v44_v10  ;;  %v68_v20 = vadd.f32 %v261_v14, %v45_v11  ;;  %v69_v21 = vadd.f32 %v261_v14, %v46_v12  ;;  %v70_v22 = vadd.f32 %v261_v14, %v47_v13  ;;  %v33_v39 = vld [vmem:[%s329_s0 + $0x60] sm:$0xff] }
   0x8   :  { %v71_v23 = vadd.f32 %v261_v14, %v48_v15  ;;  %v72_v24 = vadd.f32 %v261_v14, %v49_v16  ;;  %v73_v25 = vadd.f32 %v261_v14, %v50_v17  ;;  %v74_v26 = vadd.f32 %v261_v14, %v51_v18 }
   0x9   :  { %v83_v27 = vmax.f32 %v67_v19, 0.0  ;;  %v84_v28 = vmax.f32 %v68_v20, 0.0  ;;  %v85_v29 = vmax.f32 %v69_v21, 0.0  ;;  %v86_v30 = vmax.f32 %v70_v22, 0.0 }
   0xa   :  { %v87_v35 = vmax.f32 %v71_v23, 0.0  ;;  %v88_v41 = vmax.f32 %v72_v24, 0.0  ;;  %v89_v42 = vmax.f32 %v73_v25, 0.0  ;;  %v90_v43 = vmax.f32 %v74_v26, 0.0 }
   0xb   :  { %v145_v36 = vsel %vm144_vm1, %v83_v27, 0.0  ;;  %v146_v37 = vsel %vm144_vm1, %v84_v28, 0.0  ;;  %v148_v38 = vsel %vm144_vm1, %v85_v29, 0.0  ;;  %v150_v46 = vsel %vm144_vm1, %v86_v30, 0.0 }
   0xc   :  { %v147_v44 = vadd.f32 %v146_v37, %v145_v36  ;;  %v52_v47 = vmul.f32 %v205_v9, %v29_v31  ;;  %v53_v48 = vmul.f32 %v205_v9, %v30_v32  ;;  %v54_v49 = vmul.f32 %v205_v9, %v31_v33 }
   0xd   :  { %v55_v52 = vmul.f32 %v205_v9, %v32_v34  ;;  %v56_v53 = vmul.f32 %v205_v9, %v33_v39  ;;  %v57_v54 = vmul.f32 %v205_v9, %v34_v40  ;;  %v152_v55 = vsel %vm144_vm1, %v87_v35, 0.0 }
   0xe   :  { %v149_v50 = vadd.f32 %v148_v38, %v147_v44  ;;  %v58_v56 = vmul.f32 %v205_v9, %v35_v45  ;;  %v75_v57 = vadd.f32 %v261_v14, %v52_v47  ;;  %v76_v58 = vadd.f32 %v261_v14, %v53_v48  ;;  %v142_v38 = vld [vmem:[#allocation2] sm:$0x1] }
   0xf   :  { %v77_v60 = vadd.f32 %v261_v14, %v54_v49  ;;  %v78_v61 = vadd.f32 %v261_v14, %v55_v52  ;;  %v79_v62 = vadd.f32 %v261_v14, %v56_v53  ;;  %v154_v63 = vsel %vm144_vm1, %v88_v41, 0.0 }
  0x10   :  { %v151_v59 = vadd.f32 %v150_v46, %v149_v50  ;;  %v59_v0 = vmul.f32 %v205_v9, %v36_v51  ;;  %v80_v1 = vadd.f32 %v261_v14, %v57_v54  ;;  %v91_v2 = vmax.f32 %v75_v57, 0.0  ;;  %v143_v46 = vld [vmem:[#allocation2 + $0x1] sm:$0x1] }
  0x11   :  { %v92_v4 = vmax.f32 %v76_v58, 0.0  ;;  %v93_v5 = vmax.f32 %v77_v60, 0.0  ;;  %v94_v6 = vmax.f32 %v78_v61, 0.0  ;;  %v156_v7 = vsel %vm144_vm1, %v89_v42, 0.0 }
  0x12   :  { %v153_v3 = vadd.f32 %v152_v55, %v151_v59  ;;  %v81_v8 = vadd.f32 %v261_v14, %v58_v56  ;;  %v95_v10 = vmax.f32 %v79_v62, 0.0  ;;  %v166_v12 = vsel %vm144_vm1, %v91_v2, 0.0 }
  0x13   :  { %v167_v13 = vsel %vm144_vm1, %v92_v4, 0.0  ;;  %v169_v15 = vsel %vm144_vm1, %v93_v5, 0.0  ;;  %v158_v9 = vsel %vm144_vm1, %v90_v43, 0.0  ;;  %v82_v18 = vadd.f32 %v261_v14, %v59_v0 }
  0x14   :  { %v155_v11 = vadd.f32 %v154_v63, %v153_v3  ;;  %v168_v16 = vadd.f32 %v167_v13, %v166_v12  ;;  %v96_v19 = vmax.f32 %v80_v1, 0.0  ;;  %v171_v20 = vsel %vm144_vm1, %v94_v6, 0.0 }
  0x15   :  { %v97_v23 = vmax.f32 %v81_v8, 0.0  ;;  %v173_v24 = vsel %vm144_vm1, %v95_v10, 0.0  ;;  %v98_v27 = vmax.f32 %v82_v18, 0.0 }
  0x16   :  { %v157_v17 = vadd.f32 %v156_v7, %v155_v11  ;;  %v170_v21 = vadd.f32 %v169_v15, %v168_v16  ;;  %v175_v28 = vsel %vm144_vm1, %v96_v19, 0.0 }
  0x17   :  { %v177_v31 = vsel %vm144_vm1, %v97_v23, 0.0  ;;  %v179_v14 = vsel %vm144_vm1, %v98_v27, 0.0 }
  0x18   :  { %v159_v22 = vadd.f32 %v158_v9, %v157_v17  ;;  %v172_v25 = vadd.f32 %v171_v20, %v170_v21 }
  0x1a   :  { %v160_v26 = vrot.slane %v159_v22, 4  ;;  %v174_v29 = vadd.f32 %v173_v24, %v172_v25 }
  0x1c   :  { %v161_v30 = vadd.f32 %v160_v26, %v159_v22  ;;  %v176_v32 = vadd.f32 %v175_v28, %v174_v29 }
  0x1e   :  { %v162_v33 = vrot.slane %v161_v30, 2  ;;  %v178_v34 = vadd.f32 %v177_v31, %v176_v32 }
  0x20   :  { %v163_v35 = vadd.f32 %v162_v33, %v161_v30  ;;  %v180_v36 = vadd.f32 %v179_v14, %v178_v34 }
  0x22   :  { %v164_v37 = vrot.slane %v163_v35, 1  ;;  %v181_v39 = vrot.slane %v180_v36, 4 }
  0x24   :  { %v165_v40 = vadd.f32 %v164_v37, %v163_v35  ;;  %v182_v41 = vadd.f32 %v181_v39, %v180_v36 }
  0x26   :  { %v187_v42 = vadd.f32 %v165_v40, %v142_v38  ;;  %v183_v43 = vrot.slane %v182_v41, 2 }
  0x28   :  { %190 = vst.msk [vmem:[#allocation2] sm:$0x1] %vm18_vm0, %v187_v42  ;;  %v184_v44 = vadd.f32 %v183_v43, %v182_v41 }
  0x2a   :  { %v185_v45 = vrot.slane %v184_v44, 1 }
  0x2c   :  { %v186_v47 = vadd.f32 %v185_v45, %v184_v44 }
  0x2e   :  { %v188_v48 = vadd.f32 %v186_v47, %v143_v46 }
  0x2f   :  { %v195_v49 = vld [vmem:[#allocation2] sm:$0x1] }
  0x30   :  { %v197_v50 = vmul.f32 0.015625, %v195_v49  ;;  %191 = vst.msk [vmem:[#allocation2 + $0x1] sm:$0x1] %vm18_vm0, %v188_v48 }
  0x32   :  { %199 = vst.msk [vmem:[%s332_s3] sm:$0x1] %vm18_vm0, %v197_v50 }
  0x37   :  { %v196_v51 = vld [vmem:[#allocation2 + $0x1] sm:$0x1] }
  0x38   :  { %v198_v52 = vmul.f32 0.015625, %v196_v51 }
  0x3a   :  { %200 = vst.msk [vmem:[%s332_s3 + $0x1] sm:$0x1] %vm18_vm0, %v198_v52 }

</bundles_post_ra>
